<compile_context>
chip_gen: v5e
topology: v5e:2x2
jax: 0.10.0
libtpu: 0.0.40
codegen_flags: <defaults>
</compile_context>

<pallas_src>
import functools

import jax
import jax.numpy as jnp
from jax import lax
from jax.experimental import pallas as pl
from jax.experimental.pallas import tpu as pltpu

# Matmul operand dtype for activations (accumulation is always f32).
MATMUL_DTYPE = jnp.bfloat16


def fdm_kernel(x84_ref, x2p_ref, x1p_ref, xmask_ref,
               wb1_ref, wg_ref, wf_ref, wr1_ref, wr2_ref, wr3_ref, wr4_ref,
               k1_ref, k2_ref,
               out_ref, carry32, carry64, *, th, w4):
    """One (batch, H/4-row-tile) step of FDM.forward."""
    f32 = jnp.float32
    thw = th * w4
    t = pl.program_id(1)

    # Zero the halo carry at the top of every image (== global zero padding).
    @pl.when(t == 0)
    def _():
        carry32[...] = jnp.zeros_like(carry32)
        carry64[...] = jnp.zeros_like(carry64)

    def fc(x, wref):
        # Folded DSConv-1x1 (+BN) + ReLU.  wref rows [0:K] = weight, row K = bias.
        k = wref.shape[0] - 1
        y = jnp.dot(x.astype(MATMUL_DTYPE), wref[:k, :].astype(MATMUL_DTYPE),
                    preferred_element_type=f32)
        return jnp.maximum(y + wref[k:k + 1, :], 0.0)

    xm = xmask_ref[...]                       # (thw, 1): 1.0 where x-coordinate > 0

    # Halo rows (H/4 row just above this tile), carried from the previous tile.
    halos = {
        "u8": carry32[0], "d4": carry32[1],
        "d2_10": carry32[2], "d2_11": carry32[3],
        "d1_30": carry32[4], "d1_31": carry32[5],
        "d1_32": carry32[6], "d1_33": carry32[7],
        "r1_10": carry64[0], "r1_11": carry64[1],
    }

    shift_cache = {}

    def tap(name, src, dy, dx):
        # src evaluated at spatial offset (dy, dx) in {-1, 0}^2 on the (H/4, W/4)
        # grid.  dy == -1 reads the carried halo row; dx == -1 zeroes the x == 0
        # column (left image border).
        key = (name, dy, dx)
        if key in shift_cache:
            return shift_cache[key]
        if dy == 0 and dx == 0:
            v = src
        else:
            c = src.shape[-1]
            z1 = jnp.zeros((1, c), src.dtype)
            if dy == 0:                                       # (0, -1)
                v = jnp.concatenate([z1, src[:thw - 1]], axis=0) * xm
            else:
                halo = halos.get(name)
                if halo is None:
                    halo = jnp.zeros((w4, c), src.dtype)
                if dx == 0:                                   # (-1, 0)
                    v = jnp.concatenate([halo, src[:thw - w4]], axis=0)
                else:                                         # (-1, -1)
                    v = jnp.concatenate(
                        [z1, halo, src[:thw - w4 - 1]], axis=0) * xm
        shift_cache[key] = v
        return v

    # ---- feature-pyramid fusion: all per-pixel 1x1 convs in the phase domain -
    t84 = fc(x84_ref[0, 0], wb1_ref)          # basicconv1 on [Up2(out8) ; out4]
    u8 = t84[:thw]                            # == Up2(basicconv1(out_data_8)) at H/4
    d4 = t84[thw:2 * thw] + fc(u8, wf_ref)    # fused out_data_4
    fd4 = fc(d4, wf_ref)                      # upsample1's conv+relu on d4

    x2v = x2p_ref[0, 0]                       # (4*thw, 32): 2x2 phases of out_data_2
    d2, fd2 = {}, {}
    for r in range(2):
        for s in range(2):
            p = 2 * r + s
            d2[(r, s)] = x2v[p * thw:(p + 1) * thw] + fd4
            fd2[(r, s)] = fc(d2[(r, s)], wf_ref)

    gx1 = fc(x1p_ref[0, 0], wg_ref)           # basicconv6432 on 4x4 phases of out_data_1
    d1 = {(p, q): fd2[(p // 2, q // 2)]
          + gx1[(4 * p + q) * thw:(4 * p + q + 1) * thw]
          for p in range(4) for q in range(4)}

    # ---- reg conv #1: depthwise 3x3 stride 2 (full res -> H/2), polyphase ----
    # with the 128->64 pointwise fused right after each output phase.
    k1 = k1_ref[...]                          # (4, 9, 32) dw weights per concat block
    w1 = wr1_ref[:128, :].astype(MATMUL_DTYPE)
    b1 = wr1_ref[128:129, :]

    def sel(a):                               # full-res offset -> (H/4 phase, shift)
        return (3, -1) if a < 0 else (a, 0)

    r1 = {}
    for qy in range(2):
        for qx in range(2):
            # group taps of this output phase by (block, source, dy, dx) and
            # pre-sum their K1 weights (collapses 36 terms to <= 21).
            groups = {}
            for i in range(3):
                pa, dy = sel(2 * qy + i - 1)
                for j in range(3):
                    pb, dx = sel(2 * qx + j - 1)
                    tp = 3 * i + j
                    entries = ((0, "u8", u8), (1, "d4", d4),
                               (2, "d2_%d%d" % (pa // 2, pb // 2),
                                d2[(pa // 2, pb // 2)]),
                               (3, "d1_%d%d" % (pa, pb), d1[(pa, pb)]))
                    for blk, nm, src in entries:
                        key = (blk, nm, dy, dx)
                        wrow = k1[blk, tp:tp + 1, :]
                        if key in groups:
                            groups[key] = (groups[key][0] + wrow, src)
                        else:
                            groups[key] = (wrow, src)
            accs = [None, None, None, None]
            for (blk, nm, dy, dx), (wsum, src) in groups.items():
                term = tap(nm, src, dy, dx) * wsum
                accs[blk] = term if accs[blk] is None else accs[blk] + term
            cat = jnp.concatenate(accs, axis=-1)             # (thw, 128) lane-packed
            y = jnp.dot(cat.astype(MATMUL_DTYPE), w1,
                        preferred_element_type=f32)
            r1[(qy, qx)] = jnp.maximum(y + b1, 0.0)          # (thw, 64)

    # ---- reg conv #2: depthwise 3x3 stride 2 (H/2 -> H/4), polyphase --------
    k2 = k2_ref[...]                          # (9, 64)
    acc2 = None
    for i in range(3):
        ri, dy = (i - 1) % 2, (-1 if i == 0 else 0)
        for j in range(3):
            rj, dx = (j - 1) % 2, (-1 if j == 0 else 0)
            term = tap("r1_%d%d" % (ri, rj), r1[(ri, rj)], dy, dx) \
                * k2[3 * i + j:3 * i + j + 1, :]
            acc2 = term if acc2 is None else acc2 + term

    h = fc(acc2, wr2_ref)                     # 64 -> 32
    h = fc(h, wr3_ref)                        # 32 -> 16
    # Final 16 -> 1 as a VPU multiply + lane reduction (no 1-lane MXU push).
    w4o = wr4_ref[...]                        # (1, 17) = [weights(16) | bias]
    y = jnp.sum(h * w4o[:, :16], axis=-1, keepdims=True) + w4o[:, 16:17]
    out_ref[0, 0] = jnp.abs(jnp.maximum(y, 0.0))

    # ---- save this tile's last H/4 row as the next tile's halo --------------
    last = (th - 1) * w4
    carry32[0] = u8[last:thw]
    carry32[1] = d4[last:thw]
    carry32[2] = d2[(1, 0)][last:thw]
    carry32[3] = d2[(1, 1)][last:thw]
    for q in range(4):
        carry32[4 + q] = d1[(3, q)][last:thw]
    carry64[0] = r1[(1, 0)][last:thw]
    carry64[1] = r1[(1, 1)][last:thw]


def fdm_pallas(out_data_1, out_data_2, out_data_4, out_data_8, params,
               *, row_tile=None, target_tile_pixels=1024,
               vmem_limit_bytes=48 * 1024 * 1024):
    f32 = jnp.float32
    act = jnp.bfloat16
    x1 = out_data_1.astype(f32)
    x2 = out_data_2.astype(f32)
    x4 = out_data_4.astype(f32)
    x8 = out_data_8.astype(f32)

    n, _, h, w = x1.shape
    assert h % 8 == 0 and w % 8 == 0, (h, w)
    assert x2.shape == (n, 32, h // 2, w // 2)
    assert x4.shape == (n, 64, h // 4, w // 4)
    assert x8.shape == (n, 64, h // 8, w // 8)
    h4, w4 = h // 4, w // 4
    hw4 = h4 * w4

    # ---- H/4-row tile size (bounds per-step VMEM; independent of image size) -
    if row_tile is None:
        cands = [d for d in range(1, h4 + 1)
                 if h4 % d == 0 and (d * w4) % 8 == 0
                 and d * w4 <= target_tile_pixels]
        th = max(cands) if cands else h4
    else:
        th = row_tile
    assert h4 % th == 0, (h4, th)
    assert th == h4 or (th * w4) % 8 == 0, (th, w4)
    n_tiles = h4 // th
    thw = th * w4

    def rows(tnsr):                   # (N, C, y, x) -> (N, y*x, C)
        nn, c, hh, ww = tnsr.shape
        return jnp.transpose(tnsr, (0, 2, 3, 1)).reshape(nn, hh * ww, c)

    def tiled(tnsr_rows):             # (N, hw4, C) -> (N, n_tiles, thw, C)
        nn, _, c = tnsr_rows.shape
        return tnsr_rows.reshape(nn, n_tiles, thw, c)

    # Nearest x2 upsample of out_data_8 commutes with basicconv1 -> do it here.
    # TODO(synk): keeping out_data_8 at H/8 and upsampling in-kernel would cut
    #             its HBM traffic 4x, but it is <3% of total input bytes.
    x8u = jnp.repeat(jnp.repeat(x8, 2, axis=2), 2, axis=3)
    x84 = jnp.concatenate([tiled(rows(x8u)), tiled(rows(x4))],
                          axis=2).astype(act)                     # (N,T,2*thw,64)
    x2p = jnp.concatenate([tiled(rows(x2[:, :, r::2, s::2]))
                           for r in range(2) for s in range(2)],
                          axis=2).astype(act)                     # (N,T,4*thw,32)
    x1p = jnp.concatenate([tiled(rows(x1[:, :, p::4, q::4]))
                           for p in range(4) for q in range(4)],
                          axis=2).astype(act)                     # (N,T,16*thw,64)
    xmask = (jnp.arange(thw) % w4 > 0).astype(f32).reshape(thw, 1)

    def pack(wname, bname):           # (Cin,Cout) weight + (Cout,) bias -> (Cin+1,Cout)
        return jnp.concatenate(
            [params[wname], params[bname][None, :]], axis=0).astype(f32)

    wb1 = pack("Wb1", "bb1")
    wg = pack("Wg", "bg")
    wf = pack("Wf", "bf")
    wr1 = pack("Wr1", "br1")
    wr2 = pack("Wr2", "br2")
    wr3 = pack("Wr3", "br3")
    wr4 = jnp.concatenate([params["Wr4"].reshape(1, 16),
                           params["br4"].reshape(1, 1)], axis=1).astype(f32)
    k1 = jnp.transpose(params["K1"].reshape(4, 32, 9), (0, 2, 1)).astype(f32)  # (4,9,32)
    k2 = jnp.transpose(params["K2"].reshape(64, 9), (1, 0)).astype(f32)        # (9,64)
    weights = [wb1, wg, wf, wr1, wr2, wr3, wr4, k1, k2]

    def batched(shape):               # (N, n_tiles, R, C) -> per-(batch, tile) block
        nd = len(shape)
        return pl.BlockSpec((1, 1) + tuple(shape[2:]),
                            lambda b, t, _n=nd: (b, t) + (0,) * (_n - 2))

    def shared(shape):
        nd = len(shape)
        return pl.BlockSpec(tuple(shape), lambda b, t, _n=nd: (0,) * _n)

    out = pl.pallas_call(
        functools.partial(fdm_kernel, th=th, w4=w4),
        out_shape=jax.ShapeDtypeStruct((n, n_tiles, thw, 1), f32),
        grid_spec=pltpu.PrefetchScalarGridSpec(
            num_scalar_prefetch=0,
            grid=(n, n_tiles),
            in_specs=[batched(x84.shape), batched(x2p.shape), batched(x1p.shape),
                      shared(xmask.shape)]
                     + [shared(wt.shape) for wt in weights],
            out_specs=batched((n, n_tiles, thw, 1)),
            scratch_shapes=[pltpu.VMEM((8, w4, 32), f32),     # 32-ch halo carry
                            pltpu.VMEM((2, w4, 64), f32)],    # r1 halo carry
        ),
        compiler_params=pltpu.CompilerParams(
            dimension_semantics=("parallel", "arbitrary"),    # batch x row tiles
            vmem_limit_bytes=vmem_limit_bytes),
    )(x84, x2p, x1p, xmask, *weights)

    return out.reshape(n, h4, w4)[:, None, :, :]              # NCHW (N,1,H/4,W/4)


def fdm_reference(x1, x2, x4, x8, p):
    """Pure-JAX (XLA, f32) NCHW reference used only for validation."""
    hi = lax.Precision.HIGHEST

    def pconv(x, wm, b):              # folded DSConv-1x1 (+BN) + ReLU
        y = jnp.einsum("nchw,cd->ndhw", x, wm, precision=hi)
        return jnp.maximum(y + b[None, :, None, None], 0.0)

    def up(x, k):                     # nearest upsample, integer scale
        return jnp.repeat(jnp.repeat(x, k, axis=2), k, axis=3)

    def dw3x3_s2(x, k):               # depthwise 3x3, stride 2, pad 1
        c = x.shape[1]
        return lax.conv_general_dilated(
            x, k.reshape(c, 1, 3, 3), window_strides=(2, 2),
            padding=((1, 1), (1, 1)),
            dimension_numbers=("NCHW", "OIHW", "NCHW"),
            feature_group_count=c, precision=hi)

    d8 = pconv(x8, p["Wb1"], p["bb1"])
    d4 = pconv(x4, p["Wb1"], p["bb1"]) + pconv(up(d8, 2), p["Wf"], p["bf"])
    d2 = x2 + pconv(up(d4, 2), p["Wf"], p["bf"])
    d1 = pconv(up(d2, 2), p["Wf"], p["bf"]) + pconv(x1, p["Wg"], p["bg"])
    cat = jnp.concatenate([up(d8, 8), up(d4, 4), up(d2, 2), d1], axis=1)
    y = pconv(dw3x3_s2(cat, p["K1"]), p["Wr1"], p["br1"])
    y = pconv(dw3x3_s2(y, p["K2"]), p["Wr2"], p["br2"])
    y = pconv(y, p["Wr3"], p["br3"])
    y = pconv(y, p["Wr4"], p["br4"])
    return jnp.abs(y)


def init_params(key):
    """Folded parameters (eval-mode BN + 1x1 depthwise scales absorbed)."""
    ks = iter(jax.random.split(key, 24))

    def w(shape, scale):
        return (scale * jax.random.normal(next(ks), shape)).astype(jnp.float32)

    return {
        # basicconv1: BasicDSConvConv2d(64, 32, k=1)
        "Wb1": w((64, 32), 0.15), "bb1": w((32,), 0.1),
        # basicconv6432: BasicDSConvConv2d(64, 32, k=1)
        "Wg": w((64, 32), 0.15), "bg": w((32,), 0.1),
        # upsample1: Upsample(2, nearest) -> DSConv(32, 32, 1) -> ReLU
        "Wf": w((32, 32), 0.2), "bf": w((32,), 0.1),
        # reg_layer[0..2]: DSConv(128, 64, 3, s=2, p=1) + BN + ReLU
        "K1": w((128, 3, 3), 0.25), "Wr1": w((128, 64), 0.1), "br1": w((64,), 0.1),
        # reg_layer[3..5]: DSConv(64, 32, 3, s=2, p=1) + BN + ReLU
        "K2": w((64, 3, 3), 0.25), "Wr2": w((64, 32), 0.15), "br2": w((32,), 0.1),
        # reg_layer[6..8]: DSConv(32, 16, 1) + BN + ReLU
        "Wr3": w((32, 16), 0.2), "br3": w((16,), 0.1),
        # reg_layer[9..11]: DSConv(16, 1, 1) + BN + ReLU
        "Wr4": w((16, 1), 0.3), "br4": w((1,), 0.1),
    }


if __name__ == "__main__":
    N, H, W = 2, 32, 32
    kp, ka, kb, kc, kd = jax.random.split(jax.random.PRNGKey(0), 5)
    params = init_params(kp)
    out_data_1 = jax.random.normal(ka, (N, 64, H, W), jnp.float32)
    out_data_2 = jax.random.normal(kb, (N, 32, H // 2, W // 2), jnp.float32)
    out_data_4 = jax.random.normal(kc, (N, 64, H // 4, W // 4), jnp.float32)
    out_data_8 = jax.random.normal(kd, (N, 64, H // 8, W // 8), jnp.float32)

    # row_tile=2 -> 4 spatial tiles per image: exercises the halo carry path.
    fdm = jax.jit(functools.partial(fdm_pallas, row_tile=2))
    out = jax.block_until_ready(
        fdm(out_data_1, out_data_2, out_data_4, out_data_8, params))
    assert out.shape == (N, 1, H // 4, W // 4), out.shape

    ref = fdm_reference(out_data_1, out_data_2, out_data_4, out_data_8, params)
    scale = float(jnp.maximum(1.0, jnp.max(jnp.abs(ref))))
    err = float(jnp.max(jnp.abs(out - ref)))
    # bf16 activations vs f32 XLA reference -> loosened tolerance.
    if not (bool(jnp.all(jnp.isfinite(out))) and err < 5e-2 * scale):
        raise SystemExit(f"FDM kernel mismatch vs reference: max abs err = {err}")
    print("KERNEL_OK")
</pallas_src>

<mosaic_0001>
module attributes {stable_mosaic.version = 11 : i64} {
  func.func @fdm_kernel(%arg0: i32, %arg1: i32, %arg2: memref<1x1x32x64xbf16, #tpu.memory_space<vmem>>, %arg3: memref<1x1x64x32xbf16, #tpu.memory_space<vmem>>, %arg4: memref<1x1x256x64xbf16, #tpu.memory_space<vmem>>, %arg5: memref<16x1xf32, #tpu.memory_space<vmem>>, %arg6: memref<65x32xf32, #tpu.memory_space<vmem>>, %arg7: memref<65x32xf32, #tpu.memory_space<vmem>>, %arg8: memref<33x32xf32, #tpu.memory_space<vmem>>, %arg9: memref<129x64xf32, #tpu.memory_space<vmem>>, %arg10: memref<65x32xf32, #tpu.memory_space<vmem>>, %arg11: memref<33x16xf32, #tpu.memory_space<vmem>>, %arg12: memref<1x17xf32, #tpu.memory_space<vmem>>, %arg13: memref<4x9x32xf32, #tpu.memory_space<vmem>>, %arg14: memref<9x64xf32, #tpu.memory_space<vmem>>, %arg15: memref<1x1x16x1xf32, #tpu.memory_space<vmem>>, %arg16: memref<8x8x32xf32, #tpu.memory_space<vmem>>, %arg17: memref<2x8x64xf32, #tpu.memory_space<vmem>>) attributes {dimension_semantics = [#tpu.dimension_semantics<parallel>, #tpu.dimension_semantics<arbitrary>], iteration_bounds = array<i64: 2, 4>, scalar_prefetch = 0 : i64, scratch_operands = 2 : i64, tpu.core_type = #tpu.core_type<tc>, window_params = [{transform_indices = @transform_0, window_bounds = array<i64: 1, 1, 32, 64>}, {transform_indices = @transform_1, window_bounds = array<i64: 1, 1, 64, 32>}, {transform_indices = @transform_2, window_bounds = array<i64: 1, 1, 256, 64>}, {pipeline_mode = #tpu.pipeline_mode<synchronous>, transform_indices = @transform_3, window_bounds = array<i64: 16, 1>}, {pipeline_mode = #tpu.pipeline_mode<synchronous>, transform_indices = @transform_4, window_bounds = array<i64: 65, 32>}, {pipeline_mode = #tpu.pipeline_mode<synchronous>, transform_indices = @transform_5, window_bounds = array<i64: 65, 32>}, {pipeline_mode = #tpu.pipeline_mode<synchronous>, transform_indices = @transform_6, window_bounds = array<i64: 33, 32>}, {pipeline_mode = #tpu.pipeline_mode<synchronous>, transform_indices = @transform_7, window_bounds = array<i64: 129, 64>}, {pipeline_mode = #tpu.pipeline_mode<synchronous>, transform_indices = @transform_8, window_bounds = array<i64: 65, 32>}, {pipeline_mode = #tpu.pipeline_mode<synchronous>, transform_indices = @transform_9, window_bounds = array<i64: 33, 16>}, {pipeline_mode = #tpu.pipeline_mode<synchronous>, transform_indices = @transform_10, window_bounds = array<i64: 1, 17>}, {pipeline_mode = #tpu.pipeline_mode<synchronous>, transform_indices = @transform_11, window_bounds = array<i64: 4, 9, 32>}, {pipeline_mode = #tpu.pipeline_mode<synchronous>, transform_indices = @transform_12, window_bounds = array<i64: 9, 64>}, {transform_indices = @transform_13, window_bounds = array<i64: 1, 1, 16, 1>}]} {
    %c0_i32 = arith.constant 0 : i32
    %0 = arith.cmpi eq, %arg1, %c0_i32 : i32
    %1 = arith.extui %0 : i1 to i32
    %c0_i32_0 = arith.constant 0 : i32
    %2 = arith.cmpi ne, %1, %c0_i32_0 : i32
    scf.if %2 {
      %cst_163 = arith.constant 0.000000e+00 : f32
      %939 = vector.broadcast %cst_163 : f32 to vector<8x8x32xf32>
      %c0_164 = arith.constant 0 : index
      %c0_165 = arith.constant 0 : index
      %c0_166 = arith.constant 0 : index
      %940 = vector.load %arg16[%c0_164, %c0_165, %c0_166] : memref<8x8x32xf32, #tpu.memory_space<vmem>>, vector<8x8x32xf32>
      tpu.vector_store %arg16[%c0_164, %c0_165, %c0_166], %939 {strides = array<i32>} : memref<8x8x32xf32, #tpu.memory_space<vmem>>, vector<8x8x32xf32>,
      %cst_167 = arith.constant 0.000000e+00 : f32
      %941 = vector.broadcast %cst_167 : f32 to vector<2x8x64xf32>
      %c0_168 = arith.constant 0 : index
      %c0_169 = arith.constant 0 : index
      %c0_170 = arith.constant 0 : index
      %942 = vector.load %arg17[%c0_168, %c0_169, %c0_170] : memref<2x8x64xf32, #tpu.memory_space<vmem>>, vector<2x8x64xf32>
      tpu.vector_store %arg17[%c0_168, %c0_169, %c0_170], %941 {strides = array<i32>} : memref<2x8x64xf32, #tpu.memory_space<vmem>>, vector<2x8x64xf32>,
    } else {
    }
    %c0 = arith.constant 0 : index
    %c0_1 = arith.constant 0 : index
    %3 = vector.load %arg5[%c0, %c0_1] : memref<16x1xf32, #tpu.memory_space<vmem>>, vector<16x1xf32>
    %c0_2 = arith.constant 0 : index
    %c0_3 = arith.constant 0 : index
    %c0_4 = arith.constant 0 : index
    %4 = vector.load %arg16[%c0_2, %c0_3, %c0_4] : memref<8x8x32xf32, #tpu.memory_space<vmem>>, vector<1x8x32xf32>
    %5 = vector.shape_cast %4 : vector<1x8x32xf32> to vector<8x32xf32>
    %c1 = arith.constant 1 : index
    %c0_5 = arith.constant 0 : index
    %c0_6 = arith.constant 0 : index
    %6 = vector.load %arg16[%c1, %c0_5, %c0_6] : memref<8x8x32xf32, #tpu.memory_space<vmem>>, vector<1x8x32xf32>
    %7 = vector.shape_cast %6 : vector<1x8x32xf32> to vector<8x32xf32>
    %c2 = arith.constant 2 : index
    %c0_7 = arith.constant 0 : index
    %c0_8 = arith.constant 0 : index
    %8 = vector.load %arg16[%c2, %c0_7, %c0_8] : memref<8x8x32xf32, #tpu.memory_space<vmem>>, vector<1x8x32xf32>
    %9 = vector.shape_cast %8 : vector<1x8x32xf32> to vector<8x32xf32>
    %c3 = arith.constant 3 : index
    %c0_9 = arith.constant 0 : index
    %c0_10 = arith.constant 0 : index
    %10 = vector.load %arg16[%c3, %c0_9, %c0_10] : memref<8x8x32xf32, #tpu.memory_space<vmem>>, vector<1x8x32xf32>
    %11 = vector.shape_cast %10 : vector<1x8x32xf32> to vector<8x32xf32>
    %c4 = arith.constant 4 : index
    %c0_11 = arith.constant 0 : index
    %c0_12 = arith.constant 0 : index
    %12 = vector.load %arg16[%c4, %c0_11, %c0_12] : memref<8x8x32xf32, #tpu.memory_space<vmem>>, vector<1x8x32xf32>
    %13 = vector.shape_cast %12 : vector<1x8x32xf32> to vector<8x32xf32>
    %c5 = arith.constant 5 : index
    %c0_13 = arith.constant 0 : index
    %c0_14 = arith.constant 0 : index
    %14 = vector.load %arg16[%c5, %c0_13, %c0_14] : memref<8x8x32xf32, #tpu.memory_space<vmem>>, vector<1x8x32xf32>
    %15 = vector.shape_cast %14 : vector<1x8x32xf32> to vector<8x32xf32>
    %c6 = arith.constant 6 : index
    %c0_15 = arith.constant 0 : index
    %c0_16 = arith.constant 0 : index
    %16 = vector.load %arg16[%c6, %c0_15, %c0_16] : memref<8x8x32xf32, #tpu.memory_space<vmem>>, vector<1x8x32xf32>
    %17 = vector.shape_cast %16 : vector<1x8x32xf32> to vector<8x32xf32>
    %c7 = arith.constant 7 : index
    %c0_17 = arith.constant 0 : index
    %c0_18 = arith.constant 0 : index
    %18 = vector.load %arg16[%c7, %c0_17, %c0_18] : memref<8x8x32xf32, #tpu.memory_space<vmem>>, vector<1x8x32xf32>
    %19 = vector.shape_cast %18 : vector<1x8x32xf32> to vector<8x32xf32>
    %c0_19 = arith.constant 0 : index
    %c0_20 = arith.constant 0 : index
    %c0_21 = arith.constant 0 : index
    %20 = vector.load %arg17[%c0_19, %c0_20, %c0_21] : memref<2x8x64xf32, #tpu.memory_space<vmem>>, vector<1x8x64xf32>
    %21 = vector.shape_cast %20 : vector<1x8x64xf32> to vector<8x64xf32>
    %c1_22 = arith.constant 1 : index
    %c0_23 = arith.constant 0 : index
    %c0_24 = arith.constant 0 : index
    %22 = vector.load %arg17[%c1_22, %c0_23, %c0_24] : memref<2x8x64xf32, #tpu.memory_space<vmem>>, vector<1x8x64xf32>
    %23 = vector.shape_cast %22 : vector<1x8x64xf32> to vector<8x64xf32>
    %c0_25 = arith.constant 0 : index
    %c0_26 = arith.constant 0 : index
    %c0_27 = arith.constant 0 : index
    %c0_28 = arith.constant 0 : index
    %24 = vector.load %arg2[%c0_25, %c0_26, %c0_27, %c0_28] : memref<1x1x32x64xbf16, #tpu.memory_space<vmem>>, vector<1x1x32x64xbf16>
    %25 = vector.shape_cast %24 : vector<1x1x32x64xbf16> to vector<32x64xbf16>
    %c0_29 = arith.constant 0 : index
    %c0_30 = arith.constant 0 : index
    %26 = vector.load %arg6[%c0_29, %c0_30] : memref<65x32xf32, #tpu.memory_space<vmem>>, vector<64x32xf32>
    %27 = arith.truncf %26 : vector<64x32xf32> to vector<64x32xbf16>
    %cst = arith.constant dense<0.000000e+00> : vector<32x32xf32>
    %28 = tpu.matmul %25, %27, %cst {dimension_numbers = #tpu.dot_dimension_numbers<[1], [0], [0], [1], [0, 0, 1, 1], [], []>} : vector<32x64xbf16>, vector<64x32xbf16>, vector<32x32xf32> -> vector<32x32xf32>
    %c64 = arith.constant 64 : index
    %c0_31 = arith.constant 0 : index
    %29 = vector.load %arg6[%c64, %c0_31] : memref<65x32xf32, #tpu.memory_space<vmem>>, vector<1x32xf32>
    %30 = vector.broadcast %29 : vector<1x32xf32> to vector<32x32xf32>
    %31 = arith.addf %28, %30 : vector<32x32xf32>
    %cst_32 = arith.constant 0.000000e+00 : f32
    %32 = vector.broadcast %cst_32 : f32 to vector<32x32xf32>
    %33 = arith.maximumf %31, %32 : vector<32x32xf32>
    %34 = vector.extract_strided_slice %33 {offsets = [0, 0], sizes = [16, 32], strides = [1, 1]} : vector<32x32xf32> to vector<16x32xf32>
    %35 = vector.extract_strided_slice %33 {offsets = [16, 0], sizes = [16, 32], strides = [1, 1]} : vector<32x32xf32> to vector<16x32xf32>
    %36 = arith.truncf %34 : vector<16x32xf32> to vector<16x32xbf16>
    %c0_33 = arith.constant 0 : index
    %c0_34 = arith.constant 0 : index
    %37 = vector.load %arg8[%c0_33, %c0_34] : memref<33x32xf32, #tpu.memory_space<vmem>>, vector<32x32xf32>
    %38 = arith.truncf %37 : vector<32x32xf32> to vector<32x32xbf16>
    %cst_35 = arith.constant dense<0.000000e+00> : vector<16x32xf32>
    %39 = tpu.matmul %36, %38, %cst_35 {dimension_numbers = #tpu.dot_dimension_numbers<[1], [0], [0], [1], [0, 0, 1, 1], [], []>} : vector<16x32xbf16>, vector<32x32xbf16>, vector<16x32xf32> -> vector<16x32xf32>
    %c32 = arith.constant 32 : index
    %c0_36 = arith.constant 0 : index
    %40 = vector.load %arg8[%c32, %c0_36] : memref<33x32xf32, #tpu.memory_space<vmem>>, vector<1x32xf32>
    %41 = vector.broadcast %40 : vector<1x32xf32> to vector<16x32xf32>
    %42 = arith.addf %39, %41 : vector<16x32xf32>
    %cst_37 = arith.constant 0.000000e+00 : f32
    %43 = vector.broadcast %cst_37 : f32 to vector<16x32xf32>
    %44 = arith.maximumf %42, %43 : vector<16x32xf32>
    %45 = arith.addf %35, %44 : vector<16x32xf32>
    %46 = arith.truncf %45 : vector<16x32xf32> to vector<16x32xbf16>
    %c0_38 = arith.constant 0 : index
    %c0_39 = arith.constant 0 : index
    %47 = vector.load %arg8[%c0_38, %c0_39] : memref<33x32xf32, #tpu.memory_space<vmem>>, vector<32x32xf32>
    %48 = arith.truncf %47 : vector<32x32xf32> to vector<32x32xbf16>
    %cst_40 = arith.constant dense<0.000000e+00> : vector<16x32xf32>
    %49 = tpu.matmul %46, %48, %cst_40 {dimension_numbers = #tpu.dot_dimension_numbers<[1], [0], [0], [1], [0, 0, 1, 1], [], []>} : vector<16x32xbf16>, vector<32x32xbf16>, vector<16x32xf32> -> vector<16x32xf32>
    %c32_41 = arith.constant 32 : index
    %c0_42 = arith.constant 0 : index
    %50 = vector.load %arg8[%c32_41, %c0_42] : memref<33x32xf32, #tpu.memory_space<vmem>>, vector<1x32xf32>
    %51 = vector.broadcast %50 : vector<1x32xf32> to vector<16x32xf32>
    %52 = arith.addf %49, %51 : vector<16x32xf32>
    %cst_43 = arith.constant 0.000000e+00 : f32
    %53 = vector.broadcast %cst_43 : f32 to vector<16x32xf32>
    %54 = arith.maximumf %52, %53 : vector<16x32xf32>
    %c0_44 = arith.constant 0 : index
    %c0_45 = arith.constant 0 : index
    %c0_46 = arith.constant 0 : index
    %c0_47 = arith.constant 0 : index
    %55 = vector.load %arg3[%c0_44, %c0_45, %c0_46, %c0_47] : memref<1x1x64x32xbf16, #tpu.memory_space<vmem>>, vector<1x1x64x32xbf16>
    %56 = vector.shape_cast %55 : vector<1x1x64x32xbf16> to vector<64x32xbf16>
    %57 = vector.extract_strided_slice %56 {offsets = [0, 0], sizes = [16, 32], strides = [1, 1]} : vector<64x32xbf16> to vector<16x32xbf16>
    %58 = arith.extf %57 : vector<16x32xbf16> to vector<16x32xf32>
    %59 = arith.addf %58, %54 : vector<16x32xf32>
    %60 = arith.truncf %59 : vector<16x32xf32> to vector<16x32xbf16>
    %c0_48 = arith.constant 0 : index
    %c0_49 = arith.constant 0 : index
    %61 = vector.load %arg8[%c0_48, %c0_49] : memref<33x32xf32, #tpu.memory_space<vmem>>, vector<32x32xf32>
    %62 = arith.truncf %61 : vector<32x32xf32> to vector<32x32xbf16>
    %cst_50 = arith.constant dense<0.000000e+00> : vector<16x32xf32>
    %63 = tpu.matmul %60, %62, %cst_50 {dimension_numbers = #tpu.dot_dimension_numbers<[1], [0], [0], [1], [0, 0, 1, 1], [], []>} : vector<16x32xbf16>, vector<32x32xbf16>, vector<16x32xf32> -> vector<16x32xf32>
    %c32_51 = arith.constant 32 : index
    %c0_52 = arith.constant 0 : index
    %64 = vector.load %arg8[%c32_51, %c0_52] : memref<33x32xf32, #tpu.memory_space<vmem>>, vector<1x32xf32>
    %65 = vector.broadcast %64 : vector<1x32xf32> to vector<16x32xf32>
    %66 = arith.addf %63, %65 : vector<16x32xf32>
    %cst_53 = arith.constant 0.000000e+00 : f32
    %67 = vector.broadcast %cst_53 : f32 to vector<16x32xf32>
    %68 = arith.maximumf %66, %67 : vector<16x32xf32>
    %69 = vector.extract_strided_slice %56 {offsets = [16, 0], sizes = [16, 32], strides = [1, 1]} : vector<64x32xbf16> to vector<16x32xbf16>
    %70 = arith.extf %69 : vector<16x32xbf16> to vector<16x32xf32>
    %71 = arith.addf %70, %54 : vector<16x32xf32>
    %72 = arith.truncf %71 : vector<16x32xf32> to vector<16x32xbf16>
    %c0_54 = arith.constant 0 : index
    %c0_55 = arith.constant 0 : index
    %73 = vector.load %arg8[%c0_54, %c0_55] : memref<33x32xf32, #tpu.memory_space<vmem>>, vector<32x32xf32>
    %74 = arith.truncf %73 : vector<32x32xf32> to vector<32x32xbf16>
    %cst_56 = arith.constant dense<0.000000e+00> : vector<16x32xf32>
    %75 = tpu.matmul %72, %74, %cst_56 {dimension_numbers = #tpu.dot_dimension_numbers<[1], [0], [0], [1], [0, 0, 1, 1], [], []>} : vector<16x32xbf16>, vector<32x32xbf16>, vector<16x32xf32> -> vector<16x32xf32>
    %c32_57 = arith.constant 32 : index
    %c0_58 = arith.constant 0 : index
    %76 = vector.load %arg8[%c32_57, %c0_58] : memref<33x32xf32, #tpu.memory_space<vmem>>, vector<1x32xf32>
    %77 = vector.broadcast %76 : vector<1x32xf32> to vector<16x32xf32>
    %78 = arith.addf %75, %77 : vector<16x32xf32>
    %cst_59 = arith.constant 0.000000e+00 : f32
    %79 = vector.broadcast %cst_59 : f32 to vector<16x32xf32>
    %80 = arith.maximumf %78, %79 : vector<16x32xf32>
    %81 = vector.extract_strided_slice %56 {offsets = [32, 0], sizes = [16, 32], strides = [1, 1]} : vector<64x32xbf16> to vector<16x32xbf16>
    %82 = arith.extf %81 : vector<16x32xbf16> to vector<16x32xf32>
    %83 = arith.addf %82, %54 : vector<16x32xf32>
    %84 = arith.truncf %83 : vector<16x32xf32> to vector<16x32xbf16>
    %c0_60 = arith.constant 0 : index
    %c0_61 = arith.constant 0 : index
    %85 = vector.load %arg8[%c0_60, %c0_61] : memref<33x32xf32, #tpu.memory_space<vmem>>, vector<32x32xf32>
    %86 = arith.truncf %85 : vector<32x32xf32> to vector<32x32xbf16>
    %cst_62 = arith.constant dense<0.000000e+00> : vector<16x32xf32>
    %87 = tpu.matmul %84, %86, %cst_62 {dimension_numbers = #tpu.dot_dimension_numbers<[1], [0], [0], [1], [0, 0, 1, 1], [], []>} : vector<16x32xbf16>, vector<32x32xbf16>, vector<16x32xf32> -> vector<16x32xf32>
    %c32_63 = arith.constant 32 : index
    %c0_64 = arith.constant 0 : index
    %88 = vector.load %arg8[%c32_63, %c0_64] : memref<33x32xf32, #tpu.memory_space<vmem>>, vector<1x32xf32>
    %89 = vector.broadcast %88 : vector<1x32xf32> to vector<16x32xf32>
    %90 = arith.addf %87, %89 : vector<16x32xf32>
    %cst_65 = arith.constant 0.000000e+00 : f32
    %91 = vector.broadcast %cst_65 : f32 to vector<16x32xf32>
    %92 = arith.maximumf %90, %91 : vector<16x32xf32>
    %93 = vector.extract_strided_slice %56 {offsets = [48, 0], sizes = [16, 32], strides = [1, 1]} : vector<64x32xbf16> to vector<16x32xbf16>
    %94 = arith.extf %93 : vector<16x32xbf16> to vector<16x32xf32>
    %95 = arith.addf %94, %54 : vector<16x32xf32>
    %96 = arith.truncf %95 : vector<16x32xf32> to vector<16x32xbf16>
    %c0_66 = arith.constant 0 : index
    %c0_67 = arith.constant 0 : index
    %97 = vector.load %arg8[%c0_66, %c0_67] : memref<33x32xf32, #tpu.memory_space<vmem>>, vector<32x32xf32>
    %98 = arith.truncf %97 : vector<32x32xf32> to vector<32x32xbf16>
    %cst_68 = arith.constant dense<0.000000e+00> : vector<16x32xf32>
    %99 = tpu.matmul %96, %98, %cst_68 {dimension_numbers = #tpu.dot_dimension_numbers<[1], [0], [0], [1], [0, 0, 1, 1], [], []>} : vector<16x32xbf16>, vector<32x32xbf16>, vector<16x32xf32> -> vector<16x32xf32>
    %c32_69 = arith.constant 32 : index
    %c0_70 = arith.constant 0 : index
    %100 = vector.load %arg8[%c32_69, %c0_70] : memref<33x32xf32, #tpu.memory_space<vmem>>, vector<1x32xf32>
    %101 = vector.broadcast %100 : vector<1x32xf32> to vector<16x32xf32>
    %102 = arith.addf %99, %101 : vector<16x32xf32>
    %cst_71 = arith.constant 0.000000e+00 : f32
    %103 = vector.broadcast %cst_71 : f32 to vector<16x32xf32>
    %104 = arith.maximumf %102, %103 : vector<16x32xf32>
    %c0_72 = arith.constant 0 : index
    %c0_73 = arith.constant 0 : index
    %c0_74 = arith.constant 0 : index
    %c0_75 = arith.constant 0 : index
    %105 = vector.load %arg4[%c0_72, %c0_73, %c0_74, %c0_75] : memref<1x1x256x64xbf16, #tpu.memory_space<vmem>>, vector<1x1x256x64xbf16>
    %106 = vector.shape_cast %105 : vector<1x1x256x64xbf16> to vector<256x64xbf16>
    %c0_76 = arith.constant 0 : index
    %c0_77 = arith.constant 0 : index
    %107 = vector.load %arg7[%c0_76, %c0_77] : memref<65x32xf32, #tpu.memory_space<vmem>>, vector<64x32xf32>
    %108 = arith.truncf %107 : vector<64x32xf32> to vector<64x32xbf16>
    %cst_78 = arith.constant dense<0.000000e+00> : vector<256x32xf32>
    %109 = tpu.matmul %106, %108, %cst_78 {dimension_numbers = #tpu.dot_dimension_numbers<[1], [0], [0], [1], [0, 0, 1, 1], [], []>} : vector<256x64xbf16>, vector<64x32xbf16>, vector<256x32xf32> -> vector<256x32xf32>
    %c64_79 = arith.constant 64 : index
    %c0_80 = arith.constant 0 : index
    %110 = vector.load %arg7[%c64_79, %c0_80] : memref<65x32xf32, #tpu.memory_space<vmem>>, vector<1x32xf32>
    %111 = vector.broadcast %110 : vector<1x32xf32> to vector<256x32xf32>
    %112 = arith.addf %109, %111 : vector<256x32xf32>
    %cst_81 = arith.constant 0.000000e+00 : f32
    %113 = vector.broadcast %cst_81 : f32 to vector<256x32xf32>
    %114 = arith.maximumf %112, %113 : vector<256x32xf32>
    %115 = vector.extract_strided_slice %114 {offsets = [0, 0], sizes = [16, 32], strides = [1, 1]} : vector<256x32xf32> to vector<16x32xf32>
    %116 = arith.addf %68, %115 : vector<16x32xf32>
    %117 = vector.extract_strided_slice %114 {offsets = [16, 0], sizes = [16, 32], strides = [1, 1]} : vector<256x32xf32> to vector<16x32xf32>
    %118 = arith.addf %68, %117 : vector<16x32xf32>
    %119 = vector.extract_strided_slice %114 {offsets = [32, 0], sizes = [16, 32], strides = [1, 1]} : vector<256x32xf32> to vector<16x32xf32>
    %120 = arith.addf %80, %119 : vector<16x32xf32>
    %121 = vector.extract_strided_slice %114 {offsets = [48, 0], sizes = [16, 32], strides = [1, 1]} : vector<256x32xf32> to vector<16x32xf32>
    %122 = arith.addf %80, %121 : vector<16x32xf32>
    %123 = vector.extract_strided_slice %114 {offsets = [64, 0], sizes = [16, 32], strides = [1, 1]} : vector<256x32xf32> to vector<16x32xf32>
    %124 = arith.addf %68, %123 : vector<16x32xf32>
    %125 = vector.extract_strided_slice %114 {offsets = [80, 0], sizes = [16, 32], strides = [1, 1]} : vector<256x32xf32> to vector<16x32xf32>
    %126 = arith.addf %68, %125 : vector<16x32xf32>
    %127 = vector.extract_strided_slice %114 {offsets = [96, 0], sizes = [16, 32], strides = [1, 1]} : vector<256x32xf32> to vector<16x32xf32>
    %128 = arith.addf %80, %127 : vector<16x32xf32>
    %129 = vector.extract_strided_slice %114 {offsets = [112, 0], sizes = [16, 32], strides = [1, 1]} : vector<256x32xf32> to vector<16x32xf32>
    %130 = arith.addf %80, %129 : vector<16x32xf32>
    %131 = vector.extract_strided_slice %114 {offsets = [128, 0], sizes = [16, 32], strides = [1, 1]} : vector<256x32xf32> to vector<16x32xf32>
    %132 = arith.addf %92, %131 : vector<16x32xf32>
    %133 = vector.extract_strided_slice %114 {offsets = [144, 0], sizes = [16, 32], strides = [1, 1]} : vector<256x32xf32> to vector<16x32xf32>
    %134 = arith.addf %92, %133 : vector<16x32xf32>
    %135 = vector.extract_strided_slice %114 {offsets = [160, 0], sizes = [16, 32], strides = [1, 1]} : vector<256x32xf32> to vector<16x32xf32>
    %136 = arith.addf %104, %135 : vector<16x32xf32>
    %137 = vector.extract_strided_slice %114 {offsets = [176, 0], sizes = [16, 32], strides = [1, 1]} : vector<256x32xf32> to vector<16x32xf32>
    %138 = arith.addf %104, %137 : vector<16x32xf32>
    %139 = vector.extract_strided_slice %114 {offsets = [192, 0], sizes = [16, 32], strides = [1, 1]} : vector<256x32xf32> to vector<16x32xf32>
    %140 = arith.addf %92, %139 : vector<16x32xf32>
    %141 = vector.extract_strided_slice %114 {offsets = [208, 0], sizes = [16, 32], strides = [1, 1]} : vector<256x32xf32> to vector<16x32xf32>
    %142 = arith.addf %92, %141 : vector<16x32xf32>
    %143 = vector.extract_strided_slice %114 {offsets = [224, 0], sizes = [16, 32], strides = [1, 1]} : vector<256x32xf32> to vector<16x32xf32>
    %144 = arith.addf %104, %143 : vector<16x32xf32>
    %145 = vector.extract_strided_slice %114 {offsets = [240, 0], sizes = [16, 32], strides = [1, 1]} : vector<256x32xf32> to vector<16x32xf32>
    %146 = arith.addf %104, %145 : vector<16x32xf32>
    %c0_82 = arith.constant 0 : index
    %c0_83 = arith.constant 0 : index
    %c0_84 = arith.constant 0 : index
    %147 = vector.load %arg13[%c0_82, %c0_83, %c0_84] : memref<4x9x32xf32, #tpu.memory_space<vmem>>, vector<4x9x32xf32>
    %c0_85 = arith.constant 0 : index
    %c0_86 = arith.constant 0 : index
    %148 = vector.load %arg9[%c0_85, %c0_86] : memref<129x64xf32, #tpu.memory_space<vmem>>, vector<128x64xf32>
    %149 = arith.truncf %148 : vector<128x64xf32> to vector<128x64xbf16>
    %c128 = arith.constant 128 : index
    %c0_87 = arith.constant 0 : index
    %150 = vector.load %arg9[%c128, %c0_87] : memref<129x64xf32, #tpu.memory_space<vmem>>, vector<1x64xf32>
    %151 = vector.extract_strided_slice %147 {offsets = [0, 0, 0], sizes = [1, 1, 32], strides = [1, 1, 1]} : vector<4x9x32xf32> to vector<1x1x32xf32>
    %152 = vector.shape_cast %151 : vector<1x1x32xf32> to vector<1x32xf32>
    %153 = vector.extract_strided_slice %147 {offsets = [1, 0, 0], sizes = [1, 1, 32], strides = [1, 1, 1]} : vector<4x9x32xf32> to vector<1x1x32xf32>
    %154 = vector.shape_cast %153 : vector<1x1x32xf32> to vector<1x32xf32>
    %155 = vector.extract_strided_slice %147 {offsets = [2, 0, 0], sizes = [1, 1, 32], strides = [1, 1, 1]} : vector<4x9x32xf32> to vector<1x1x32xf32>
    %156 = vector.shape_cast %155 : vector<1x1x32xf32> to vector<1x32xf32>
    %157 = vector.extract_strided_slice %147 {offsets = [3, 0, 0], sizes = [1, 1, 32], strides = [1, 1, 1]} : vector<4x9x32xf32> to vector<1x1x32xf32>
    %158 = vector.shape_cast %157 : vector<1x1x32xf32> to vector<1x32xf32>
    %159 = vector.extract_strided_slice %147 {offsets = [0, 1, 0], sizes = [1, 1, 32], strides = [1, 1, 1]} : vector<4x9x32xf32> to vector<1x1x32xf32>
    %160 = vector.shape_cast %159 : vector<1x1x32xf32> to vector<1x32xf32>
    %161 = vector.extract_strided_slice %147 {offsets = [1, 1, 0], sizes = [1, 1, 32], strides = [1, 1, 1]} : vector<4x9x32xf32> to vector<1x1x32xf32>
    %162 = vector.shape_cast %161 : vector<1x1x32xf32> to vector<1x32xf32>
    %163 = vector.extract_strided_slice %147 {offsets = [2, 1, 0], sizes = [1, 1, 32], strides = [1, 1, 1]} : vector<4x9x32xf32> to vector<1x1x32xf32>
    %164 = vector.shape_cast %163 : vector<1x1x32xf32> to vector<1x32xf32>
    %165 = vector.extract_strided_slice %147 {offsets = [3, 1, 0], sizes = [1, 1, 32], strides = [1, 1, 1]} : vector<4x9x32xf32> to vector<1x1x32xf32>
    %166 = vector.shape_cast %165 : vector<1x1x32xf32> to vector<1x32xf32>
    %167 = vector.extract_strided_slice %147 {offsets = [0, 2, 0], sizes = [1, 1, 32], strides = [1, 1, 1]} : vector<4x9x32xf32> to vector<1x1x32xf32>
    %168 = vector.shape_cast %167 : vector<1x1x32xf32> to vector<1x32xf32>
    %169 = arith.addf %160, %168 : vector<1x32xf32>
    %170 = vector.extract_strided_slice %147 {offsets = [1, 2, 0], sizes = [1, 1, 32], strides = [1, 1, 1]} : vector<4x9x32xf32> to vector<1x1x32xf32>
    %171 = vector.shape_cast %170 : vector<1x1x32xf32> to vector<1x32xf32>
    %172 = arith.addf %162, %171 : vector<1x32xf32>
    %173 = vector.extract_strided_slice %147 {offsets = [2, 2, 0], sizes = [1, 1, 32], strides = [1, 1, 1]} : vector<4x9x32xf32> to vector<1x1x32xf32>
    %174 = vector.shape_cast %173 : vector<1x1x32xf32> to vector<1x32xf32>
    %175 = arith.addf %164, %174 : vector<1x32xf32>
    %176 = vector.extract_strided_slice %147 {offsets = [3, 2, 0], sizes = [1, 1, 32], strides = [1, 1, 1]} : vector<4x9x32xf32> to vector<1x1x32xf32>
    %177 = vector.shape_cast %176 : vector<1x1x32xf32> to vector<1x32xf32>
    %178 = vector.extract_strided_slice %147 {offsets = [0, 3, 0], sizes = [1, 1, 32], strides = [1, 1, 1]} : vector<4x9x32xf32> to vector<1x1x32xf32>
    %179 = vector.shape_cast %178 : vector<1x1x32xf32> to vector<1x32xf32>
    %180 = vector.extract_strided_slice %147 {offsets = [1, 3, 0], sizes = [1, 1, 32], strides = [1, 1, 1]} : vector<4x9x32xf32> to vector<1x1x32xf32>
    %181 = vector.shape_cast %180 : vector<1x1x32xf32> to vector<1x32xf32>
    %182 = vector.extract_strided_slice %147 {offsets = [2, 3, 0], sizes = [1, 1, 32], strides = [1, 1, 1]} : vector<4x9x32xf32> to vector<1x1x32xf32>
    %183 = vector.shape_cast %182 : vector<1x1x32xf32> to vector<1x32xf32>
    %184 = vector.extract_strided_slice %147 {offsets = [3, 3, 0], sizes = [1, 1, 32], strides = [1, 1, 1]} : vector<4x9x32xf32> to vector<1x1x32xf32>
    %185 = vector.shape_cast %184 : vector<1x1x32xf32> to vector<1x32xf32>
    %186 = vector.extract_strided_slice %147 {offsets = [0, 4, 0], sizes = [1, 1, 32], strides = [1, 1, 1]} : vector<4x9x32xf32> to vector<1x1x32xf32>
    %187 = vector.shape_cast %186 : vector<1x1x32xf32> to vector<1x32xf32>
    %188 = vector.extract_strided_slice %147 {offsets = [1, 4, 0], sizes = [1, 1, 32], strides = [1, 1, 1]} : vector<4x9x32xf32> to vector<1x1x32xf32>
    %189 = vector.shape_cast %188 : vector<1x1x32xf32> to vector<1x32xf32>
    %190 = vector.extract_strided_slice %147 {offsets = [2, 4, 0], sizes = [1, 1, 32], strides = [1, 1, 1]} : vector<4x9x32xf32> to vector<1x1x32xf32>
    %191 = vector.shape_cast %190 : vector<1x1x32xf32> to vector<1x32xf32>
    %192 = vector.extract_strided_slice %147 {offsets = [3, 4, 0], sizes = [1, 1, 32], strides = [1, 1, 1]} : vector<4x9x32xf32> to vector<1x1x32xf32>
    %193 = vector.shape_cast %192 : vector<1x1x32xf32> to vector<1x32xf32>
    %194 = vector.extract_strided_slice %147 {offsets = [0, 5, 0], sizes = [1, 1, 32], strides = [1, 1, 1]} : vector<4x9x32xf32> to vector<1x1x32xf32>
    %195 = vector.shape_cast %194 : vector<1x1x32xf32> to vector<1x32xf32>
    %196 = arith.addf %187, %195 : vector<1x32xf32>
    %197 = vector.extract_strided_slice %147 {offsets = [1, 5, 0], sizes = [1, 1, 32], strides = [1, 1, 1]} : vector<4x9x32xf32> to vector<1x1x32xf32>
    %198 = vector.shape_cast %197 : vector<1x1x32xf32> to vector<1x32xf32>
    %199 = arith.addf %189, %198 : vector<1x32xf32>
    %200 = vector.extract_strided_slice %147 {offsets = [2, 5, 0], sizes = [1, 1, 32], strides = [1, 1, 1]} : vector<4x9x32xf32> to vector<1x1x32xf32>
    %201 = vector.shape_cast %200 : vector<1x1x32xf32> to vector<1x32xf32>
    %202 = arith.addf %191, %201 : vector<1x32xf32>
    %203 = vector.extract_strided_slice %147 {offsets = [3, 5, 0], sizes = [1, 1, 32], strides = [1, 1, 1]} : vector<4x9x32xf32> to vector<1x1x32xf32>
    %204 = vector.shape_cast %203 : vector<1x1x32xf32> to vector<1x32xf32>
    %205 = vector.extract_strided_slice %147 {offsets = [0, 6, 0], sizes = [1, 1, 32], strides = [1, 1, 1]} : vector<4x9x32xf32> to vector<1x1x32xf32>
    %206 = vector.shape_cast %205 : vector<1x1x32xf32> to vector<1x32xf32>
    %207 = arith.addf %179, %206 : vector<1x32xf32>
    %208 = vector.extract_strided_slice %147 {offsets = [1, 6, 0], sizes = [1, 1, 32], strides = [1, 1, 1]} : vector<4x9x32xf32> to vector<1x1x32xf32>
    %209 = vector.shape_cast %208 : vector<1x1x32xf32> to vector<1x32xf32>
    %210 = arith.addf %181, %209 : vector<1x32xf32>
    %211 = vector.extract_strided_slice %147 {offsets = [2, 6, 0], sizes = [1, 1, 32], strides = [1, 1, 1]} : vector<4x9x32xf32> to vector<1x1x32xf32>
    %212 = vector.shape_cast %211 : vector<1x1x32xf32> to vector<1x32xf32>
    %213 = arith.addf %183, %212 : vector<1x32xf32>
    %214 = vector.extract_strided_slice %147 {offsets = [3, 6, 0], sizes = [1, 1, 32], strides = [1, 1, 1]} : vector<4x9x32xf32> to vector<1x1x32xf32>
    %215 = vector.shape_cast %214 : vector<1x1x32xf32> to vector<1x32xf32>
    %216 = vector.extract_strided_slice %147 {offsets = [0, 7, 0], sizes = [1, 1, 32], strides = [1, 1, 1]} : vector<4x9x32xf32> to vector<1x1x32xf32>
    %217 = vector.shape_cast %216 : vector<1x1x32xf32> to vector<1x32xf32>
    %218 = arith.addf %196, %217 : vector<1x32xf32>
    %219 = vector.extract_strided_slice %147 {offsets = [1, 7, 0], sizes = [1, 1, 32], strides = [1, 1, 1]} : vector<4x9x32xf32> to vector<1x1x32xf32>
    %220 = vector.shape_cast %219 : vector<1x1x32xf32> to vector<1x32xf32>
    %221 = arith.addf %199, %220 : vector<1x32xf32>
    %222 = vector.extract_strided_slice %147 {offsets = [2, 7, 0], sizes = [1, 1, 32], strides = [1, 1, 1]} : vector<4x9x32xf32> to vector<1x1x32xf32>
    %223 = vector.shape_cast %222 : vector<1x1x32xf32> to vector<1x32xf32>
    %224 = arith.addf %202, %223 : vector<1x32xf32>
    %225 = vector.extract_strided_slice %147 {offsets = [3, 7, 0], sizes = [1, 1, 32], strides = [1, 1, 1]} : vector<4x9x32xf32> to vector<1x1x32xf32>
    %226 = vector.shape_cast %225 : vector<1x1x32xf32> to vector<1x32xf32>
    %227 = vector.extract_strided_slice %147 {offsets = [0, 8, 0], sizes = [1, 1, 32], strides = [1, 1, 1]} : vector<4x9x32xf32> to vector<1x1x32xf32>
    %228 = vector.shape_cast %227 : vector<1x1x32xf32> to vector<1x32xf32>
    %229 = arith.addf %218, %228 : vector<1x32xf32>
    %230 = vector.extract_strided_slice %147 {offsets = [1, 8, 0], sizes = [1, 1, 32], strides = [1, 1, 1]} : vector<4x9x32xf32> to vector<1x1x32xf32>
    %231 = vector.shape_cast %230 : vector<1x1x32xf32> to vector<1x32xf32>
    %232 = arith.addf %221, %231 : vector<1x32xf32>
    %233 = vector.extract_strided_slice %147 {offsets = [2, 8, 0], sizes = [1, 1, 32], strides = [1, 1, 1]} : vector<4x9x32xf32> to vector<1x1x32xf32>
    %234 = vector.shape_cast %233 : vector<1x1x32xf32> to vector<1x32xf32>
    %235 = arith.addf %224, %234 : vector<1x32xf32>
    %236 = vector.extract_strided_slice %147 {offsets = [3, 8, 0], sizes = [1, 1, 32], strides = [1, 1, 1]} : vector<4x9x32xf32> to vector<1x1x32xf32>
    %237 = vector.shape_cast %236 : vector<1x1x32xf32> to vector<1x32xf32>
    %cst_88 = arith.constant 0.000000e+00 : f32
    %238 = vector.broadcast %cst_88 : f32 to vector<1x32xf32>
    %239 = vector.extract_strided_slice %34 {offsets = [0, 0], sizes = [7, 32], strides = [1, 1]} : vector<16x32xf32> to vector<7x32xf32>
    %240 = tpu.concatenate %238, %5, %239 in 0 : vector<1x32xf32>, vector<8x32xf32>, vector<7x32xf32> -> vector<16x32xf32>
    %241 = vector.broadcast %3 : vector<16x1xf32> to vector<16x32xf32>
    %242 = arith.mulf %240, %241 : vector<16x32xf32>
    %243 = vector.broadcast %152 : vector<1x32xf32> to vector<16x32xf32>
    %244 = arith.mulf %242, %243 : vector<16x32xf32>
    %cst_89 = arith.constant 0.000000e+00 : f32
    %245 = vector.broadcast %cst_89 : f32 to vector<1x32xf32>
    %246 = vector.extract_strided_slice %45 {offsets = [0, 0], sizes = [7, 32], strides = [1, 1]} : vector<16x32xf32> to vector<7x32xf32>
    %247 = tpu.concatenate %245, %7, %246 in 0 : vector<1x32xf32>, vector<8x32xf32>, vector<7x32xf32> -> vector<16x32xf32>
    %248 = vector.broadcast %3 : vector<16x1xf32> to vector<16x32xf32>
    %249 = arith.mulf %247, %248 : vector<16x32xf32>
    %250 = vector.broadcast %154 : vector<1x32xf32> to vector<16x32xf32>
    %251 = arith.mulf %249, %250 : vector<16x32xf32>
    %cst_90 = arith.constant 0.000000e+00 : f32
    %252 = vector.broadcast %cst_90 : f32 to vector<1x32xf32>
    %253 = vector.extract_strided_slice %95 {offsets = [0, 0], sizes = [7, 32], strides = [1, 1]} : vector<16x32xf32> to vector<7x32xf32>
    %254 = tpu.concatenate %252, %11, %253 in 0 : vector<1x32xf32>, vector<8x32xf32>, vector<7x32xf32> -> vector<16x32xf32>
    %255 = vector.broadcast %3 : vector<16x1xf32> to vector<16x32xf32>
    %256 = arith.mulf %254, %255 : vector<16x32xf32>
    %257 = vector.broadcast %156 : vector<1x32xf32> to vector<16x32xf32>
    %258 = arith.mulf %256, %257 : vector<16x32xf32>
    %cst_91 = arith.constant 0.000000e+00 : f32
    %259 = vector.broadcast %cst_91 : f32 to vector<1x32xf32>
    %260 = vector.extract_strided_slice %146 {offsets = [0, 0], sizes = [7, 32], strides = [1, 1]} : vector<16x32xf32> to vector<7x32xf32>
    %261 = tpu.concatenate %259, %19, %260 in 0 : vector<1x32xf32>, vector<8x32xf32>, vector<7x32xf32> -> vector<16x32xf32>
    %262 = vector.broadcast %3 : vector<16x1xf32> to vector<16x32xf32>
    %263 = arith.mulf %261, %262 : vector<16x32xf32>
    %264 = vector.broadcast %158 : vector<1x32xf32> to vector<16x32xf32>
    %265 = arith.mulf %263, %264 : vector<16x32xf32>
    %266 = vector.extract_strided_slice %34 {offsets = [0, 0], sizes = [8, 32], strides = [1, 1]} : vector<16x32xf32> to vector<8x32xf32>
    %267 = tpu.concatenate %5, %266 in 0 : vector<8x32xf32>, vector<8x32xf32> -> vector<16x32xf32>
    %268 = vector.broadcast %169 : vector<1x32xf32> to vector<16x32xf32>
    %269 = arith.mulf %267, %268 : vector<16x32xf32>
    %270 = arith.addf %244, %269 : vector<16x32xf32>
    %271 = vector.extract_strided_slice %45 {offsets = [0, 0], sizes = [8, 32], strides = [1, 1]} : vector<16x32xf32> to vector<8x32xf32>
    %272 = tpu.concatenate %7, %271 in 0 : vector<8x32xf32>, vector<8x32xf32> -> vector<16x32xf32>
    %273 = vector.broadcast %172 : vector<1x32xf32> to vector<16x32xf32>
    %274 = arith.mulf %272, %273 : vector<16x32xf32>
    %275 = arith.addf %251, %274 : vector<16x32xf32>
    %276 = vector.extract_strided_slice %83 {offsets = [0, 0], sizes = [8, 32], strides = [1, 1]} : vector<16x32xf32> to vector<8x32xf32>
    %277 = tpu.concatenate %9, %276 in 0 : vector<8x32xf32>, vector<8x32xf32> -> vector<16x32xf32>
    %278 = vector.broadcast %175 : vector<1x32xf32> to vector<16x32xf32>
    %279 = arith.mulf %277, %278 : vector<16x32xf32>
    %280 = arith.addf %258, %279 : vector<16x32xf32>
    %281 = vector.extract_strided_slice %140 {offsets = [0, 0], sizes = [8, 32], strides = [1, 1]} : vector<16x32xf32> to vector<8x32xf32>
    %282 = tpu.concatenate %13, %281 in 0 : vector<8x32xf32>, vector<8x32xf32> -> vector<16x32xf32>
    %283 = vector.broadcast %166 : vector<1x32xf32> to vector<16x32xf32>
    %284 = arith.mulf %282, %283 : vector<16x32xf32>
    %285 = arith.addf %265, %284 : vector<16x32xf32>
    %286 = vector.extract_strided_slice %142 {offsets = [0, 0], sizes = [8, 32], strides = [1, 1]} : vector<16x32xf32> to vector<8x32xf32>
    %287 = tpu.concatenate %15, %286 in 0 : vector<8x32xf32>, vector<8x32xf32> -> vector<16x32xf32>
    %288 = vector.broadcast %177 : vector<1x32xf32> to vector<16x32xf32>
    %289 = arith.mulf %287, %288 : vector<16x32xf32>
    %290 = arith.addf %285, %289 : vector<16x32xf32>
    %cst_92 = arith.constant 0.000000e+00 : f32
    %291 = vector.broadcast %cst_92 : f32 to vector<1x32xf32>
    %292 = vector.extract_strided_slice %34 {offsets = [0, 0], sizes = [15, 32], strides = [1, 1]} : vector<16x32xf32> to vector<15x32xf32>
    %293 = tpu.concatenate %291, %292 in 0 : vector<1x32xf32>, vector<15x32xf32> -> vector<16x32xf32>
    %294 = vector.broadcast %3 : vector<16x1xf32> to vector<16x32xf32>
    %295 = arith.mulf %293, %294 : vector<16x32xf32>
    %296 = vector.broadcast %207 : vector<1x32xf32> to vector<16x32xf32>
    %297 = arith.mulf %295, %296 : vector<16x32xf32>
    %298 = arith.addf %270, %297 : vector<16x32xf32>
    %cst_93 = arith.constant 0.000000e+00 : f32
    %299 = vector.broadcast %cst_93 : f32 to vector<1x32xf32>
    %300 = vector.extract_strided_slice %45 {offsets = [0, 0], sizes = [15, 32], strides = [1, 1]} : vector<16x32xf32> to vector<15x32xf32>
    %301 = tpu.concatenate %299, %300 in 0 : vector<1x32xf32>, vector<15x32xf32> -> vector<16x32xf32>
    %302 = vector.broadcast %3 : vector<16x1xf32> to vector<16x32xf32>
    %303 = arith.mulf %301, %302 : vector<16x32xf32>
    %304 = vector.broadcast %210 : vector<1x32xf32> to vector<16x32xf32>
    %305 = arith.mulf %303, %304 : vector<16x32xf32>
    %306 = arith.addf %275, %305 : vector<16x32xf32>
    %cst_94 = arith.constant 0.000000e+00 : f32
    %307 = vector.broadcast %cst_94 : f32 to vector<1x32xf32>
    %308 = vector.extract_strided_slice %71 {offsets = [0, 0], sizes = [15, 32], strides = [1, 1]} : vector<16x32xf32> to vector<15x32xf32>
    %309 = tpu.concatenate %307, %308 in 0 : vector<1x32xf32>, vector<15x32xf32> -> vector<16x32xf32>
    %310 = vector.broadcast %3 : vector<16x1xf32> to vector<16x32xf32>
    %311 = arith.mulf %309, %310 : vector<16x32xf32>
    %312 = vector.broadcast %213 : vector<1x32xf32> to vector<16x32xf32>
    %313 = arith.mulf %311, %312 : vector<16x32xf32>
    %314 = arith.addf %280, %313 : vector<16x32xf32>
    %cst_95 = arith.constant 0.000000e+00 : f32
    %315 = vector.broadcast %cst_95 : f32 to vector<1x32xf32>
    %316 = vector.extract_strided_slice %122 {offsets = [0, 0], sizes = [15, 32], strides = [1, 1]} : vector<16x32xf32> to vector<15x32xf32>
    %317 = tpu.concatenate %315, %316 in 0 : vector<1x32xf32>, vector<15x32xf32> -> vector<16x32xf32>
    %318 = vector.broadcast %3 : vector<16x1xf32> to vector<16x32xf32>
    %319 = arith.mulf %317, %318 : vector<16x32xf32>
    %320 = vector.broadcast %185 : vector<1x32xf32> to vector<16x32xf32>
    %321 = arith.mulf %319, %320 : vector<16x32xf32>
    %322 = arith.addf %290, %321 : vector<16x32xf32>
    %323 = vector.broadcast %229 : vector<1x32xf32> to vector<16x32xf32>
    %324 = arith.mulf %34, %323 : vector<16x32xf32>
    %325 = arith.addf %298, %324 : vector<16x32xf32>
    %326 = vector.broadcast %232 : vector<1x32xf32> to vector<16x32xf32>
    %327 = arith.mulf %45, %326 : vector<16x32xf32>
    %328 = arith.addf %306, %327 : vector<16x32xf32>
    %329 = vector.broadcast %235 : vector<1x32xf32> to vector<16x32xf32>
    %330 = arith.mulf %59, %329 : vector<16x32xf32>
    %331 = arith.addf %314, %330 : vector<16x32xf32>
    %332 = vector.broadcast %193 : vector<1x32xf32> to vector<16x32xf32>
    %333 = arith.mulf %116, %332 : vector<16x32xf32>
    %334 = arith.addf %322, %333 : vector<16x32xf32>
    %335 = vector.broadcast %204 : vector<1x32xf32> to vector<16x32xf32>
    %336 = arith.mulf %118, %335 : vector<16x32xf32>
    %337 = arith.addf %334, %336 : vector<16x32xf32>
    %cst_96 = arith.constant 0.000000e+00 : f32
    %338 = vector.broadcast %cst_96 : f32 to vector<1x32xf32>
    %339 = vector.extract_strided_slice %130 {offsets = [0, 0], sizes = [15, 32], strides = [1, 1]} : vector<16x32xf32> to vector<15x32xf32>
    %340 = tpu.concatenate %338, %339 in 0 : vector<1x32xf32>, vector<15x32xf32> -> vector<16x32xf32>
    %341 = vector.broadcast %3 : vector<16x1xf32> to vector<16x32xf32>
    %342 = arith.mulf %340, %341 : vector<16x32xf32>
    %343 = vector.broadcast %215 : vector<1x32xf32> to vector<16x32xf32>
    %344 = arith.mulf %342, %343 : vector<16x32xf32>
    %345 = arith.addf %337, %344 : vector<16x32xf32>
    %346 = vector.broadcast %226 : vector<1x32xf32> to vector<16x32xf32>
    %347 = arith.mulf %124, %346 : vector<16x32xf32>
    %348 = arith.addf %345, %347 : vector<16x32xf32>
    %349 = vector.broadcast %237 : vector<1x32xf32> to vector<16x32xf32>
    %350 = arith.mulf %126, %349 : vector<16x32xf32>
    %351 = arith.addf %348, %350 : vector<16x32xf32>
    %352 = tpu.concatenate %325, %328, %331, %351 in 1 : vector<16x32xf32>, vector<16x32xf32>, vector<16x32xf32>, vector<16x32xf32> -> vector<16x128xf32>
    %353 = arith.truncf %352 : vector<16x128xf32> to vector<16x128xbf16>
    %cst_97 = arith.constant dense<0.000000e+00> : vector<16x64xf32>
    %354 = tpu.matmul %353, %149, %cst_97 {dimension_numbers = #tpu.dot_dimension_numbers<[1], [0], [0], [1], [0, 0, 1, 1], [], []>} : vector<16x128xbf16>, vector<128x64xbf16>, vector<16x64xf32> -> vector<16x64xf32>
    %355 = vector.broadcast %150 : vector<1x64xf32> to vector<16x64xf32>
    %356 = arith.addf %354, %355 : vector<16x64xf32>
    %cst_98 = arith.constant 0.000000e+00 : f32
    %357 = vector.broadcast %cst_98 : f32 to vector<16x64xf32>
    %358 = arith.maximumf %356, %357 : vector<16x64xf32>
    %359 = vector.extract_strided_slice %147 {offsets = [0, 0, 0], sizes = [1, 1, 32], strides = [1, 1, 1]} : vector<4x9x32xf32> to vector<1x1x32xf32>
    %360 = vector.shape_cast %359 : vector<1x1x32xf32> to vector<1x32xf32>
    %361 = vector.extract_strided_slice %147 {offsets = [1, 0, 0], sizes = [1, 1, 32], strides = [1, 1, 1]} : vector<4x9x32xf32> to vector<1x1x32xf32>
    %362 = vector.shape_cast %361 : vector<1x1x32xf32> to vector<1x32xf32>
    %363 = vector.extract_strided_slice %147 {offsets = [2, 0, 0], sizes = [1, 1, 32], strides = [1, 1, 1]} : vector<4x9x32xf32> to vector<1x1x32xf32>
    %364 = vector.shape_cast %363 : vector<1x1x32xf32> to vector<1x32xf32>
    %365 = vector.extract_strided_slice %147 {offsets = [3, 0, 0], sizes = [1, 1, 32], strides = [1, 1, 1]} : vector<4x9x32xf32> to vector<1x1x32xf32>
    %366 = vector.shape_cast %365 : vector<1x1x32xf32> to vector<1x32xf32>
    %367 = vector.extract_strided_slice %147 {offsets = [0, 1, 0], sizes = [1, 1, 32], strides = [1, 1, 1]} : vector<4x9x32xf32> to vector<1x1x32xf32>
    %368 = vector.shape_cast %367 : vector<1x1x32xf32> to vector<1x32xf32>
    %369 = arith.addf %360, %368 : vector<1x32xf32>
    %370 = vector.extract_strided_slice %147 {offsets = [1, 1, 0], sizes = [1, 1, 32], strides = [1, 1, 1]} : vector<4x9x32xf32> to vector<1x1x32xf32>
    %371 = vector.shape_cast %370 : vector<1x1x32xf32> to vector<1x32xf32>
    %372 = arith.addf %362, %371 : vector<1x32xf32>
    %373 = vector.extract_strided_slice %147 {offsets = [2, 1, 0], sizes = [1, 1, 32], strides = [1, 1, 1]} : vector<4x9x32xf32> to vector<1x1x32xf32>
    %374 = vector.shape_cast %373 : vector<1x1x32xf32> to vector<1x32xf32>
    %375 = vector.extract_strided_slice %147 {offsets = [3, 1, 0], sizes = [1, 1, 32], strides = [1, 1, 1]} : vector<4x9x32xf32> to vector<1x1x32xf32>
    %376 = vector.shape_cast %375 : vector<1x1x32xf32> to vector<1x32xf32>
    %377 = vector.extract_strided_slice %147 {offsets = [0, 2, 0], sizes = [1, 1, 32], strides = [1, 1, 1]} : vector<4x9x32xf32> to vector<1x1x32xf32>
    %378 = vector.shape_cast %377 : vector<1x1x32xf32> to vector<1x32xf32>
    %379 = arith.addf %369, %378 : vector<1x32xf32>
    %380 = vector.extract_strided_slice %147 {offsets = [1, 2, 0], sizes = [1, 1, 32], strides = [1, 1, 1]} : vector<4x9x32xf32> to vector<1x1x32xf32>
    %381 = vector.shape_cast %380 : vector<1x1x32xf32> to vector<1x32xf32>
    %382 = arith.addf %372, %381 : vector<1x32xf32>
    %383 = vector.extract_strided_slice %147 {offsets = [2, 2, 0], sizes = [1, 1, 32], strides = [1, 1, 1]} : vector<4x9x32xf32> to vector<1x1x32xf32>
    %384 = vector.shape_cast %383 : vector<1x1x32xf32> to vector<1x32xf32>
    %385 = arith.addf %374, %384 : vector<1x32xf32>
    %386 = vector.extract_strided_slice %147 {offsets = [3, 2, 0], sizes = [1, 1, 32], strides = [1, 1, 1]} : vector<4x9x32xf32> to vector<1x1x32xf32>
    %387 = vector.shape_cast %386 : vector<1x1x32xf32> to vector<1x32xf32>
    %388 = vector.extract_strided_slice %147 {offsets = [0, 3, 0], sizes = [1, 1, 32], strides = [1, 1, 1]} : vector<4x9x32xf32> to vector<1x1x32xf32>
    %389 = vector.shape_cast %388 : vector<1x1x32xf32> to vector<1x32xf32>
    %390 = vector.extract_strided_slice %147 {offsets = [1, 3, 0], sizes = [1, 1, 32], strides = [1, 1, 1]} : vector<4x9x32xf32> to vector<1x1x32xf32>
    %391 = vector.shape_cast %390 : vector<1x1x32xf32> to vector<1x32xf32>
    %392 = vector.extract_strided_slice %147 {offsets = [2, 3, 0], sizes = [1, 1, 32], strides = [1, 1, 1]} : vector<4x9x32xf32> to vector<1x1x32xf32>
    %393 = vector.shape_cast %392 : vector<1x1x32xf32> to vector<1x32xf32>
    %394 = vector.extract_strided_slice %147 {offsets = [3, 3, 0], sizes = [1, 1, 32], strides = [1, 1, 1]} : vector<4x9x32xf32> to vector<1x1x32xf32>
    %395 = vector.shape_cast %394 : vector<1x1x32xf32> to vector<1x32xf32>
    %396 = vector.extract_strided_slice %147 {offsets = [0, 4, 0], sizes = [1, 1, 32], strides = [1, 1, 1]} : vector<4x9x32xf32> to vector<1x1x32xf32>
    %397 = vector.shape_cast %396 : vector<1x1x32xf32> to vector<1x32xf32>
    %398 = arith.addf %389, %397 : vector<1x32xf32>
    %399 = vector.extract_strided_slice %147 {offsets = [1, 4, 0], sizes = [1, 1, 32], strides = [1, 1, 1]} : vector<4x9x32xf32> to vector<1x1x32xf32>
    %400 = vector.shape_cast %399 : vector<1x1x32xf32> to vector<1x32xf32>
    %401 = arith.addf %391, %400 : vector<1x32xf32>
    %402 = vector.extract_strided_slice %147 {offsets = [2, 4, 0], sizes = [1, 1, 32], strides = [1, 1, 1]} : vector<4x9x32xf32> to vector<1x1x32xf32>
    %403 = vector.shape_cast %402 : vector<1x1x32xf32> to vector<1x32xf32>
    %404 = vector.extract_strided_slice %147 {offsets = [3, 4, 0], sizes = [1, 1, 32], strides = [1, 1, 1]} : vector<4x9x32xf32> to vector<1x1x32xf32>
    %405 = vector.shape_cast %404 : vector<1x1x32xf32> to vector<1x32xf32>
    %406 = vector.extract_strided_slice %147 {offsets = [0, 5, 0], sizes = [1, 1, 32], strides = [1, 1, 1]} : vector<4x9x32xf32> to vector<1x1x32xf32>
    %407 = vector.shape_cast %406 : vector<1x1x32xf32> to vector<1x32xf32>
    %408 = arith.addf %398, %407 : vector<1x32xf32>
    %409 = vector.extract_strided_slice %147 {offsets = [1, 5, 0], sizes = [1, 1, 32], strides = [1, 1, 1]} : vector<4x9x32xf32> to vector<1x1x32xf32>
    %410 = vector.shape_cast %409 : vector<1x1x32xf32> to vector<1x32xf32>
    %411 = arith.addf %401, %410 : vector<1x32xf32>
    %412 = vector.extract_strided_slice %147 {offsets = [2, 5, 0], sizes = [1, 1, 32], strides = [1, 1, 1]} : vector<4x9x32xf32> to vector<1x1x32xf32>
    %413 = vector.shape_cast %412 : vector<1x1x32xf32> to vector<1x32xf32>
    %414 = arith.addf %403, %413 : vector<1x32xf32>
    %415 = vector.extract_strided_slice %147 {offsets = [3, 5, 0], sizes = [1, 1, 32], strides = [1, 1, 1]} : vector<4x9x32xf32> to vector<1x1x32xf32>
    %416 = vector.shape_cast %415 : vector<1x1x32xf32> to vector<1x32xf32>
    %417 = vector.extract_strided_slice %147 {offsets = [0, 6, 0], sizes = [1, 1, 32], strides = [1, 1, 1]} : vector<4x9x32xf32> to vector<1x1x32xf32>
    %418 = vector.shape_cast %417 : vector<1x1x32xf32> to vector<1x32xf32>
    %419 = arith.addf %408, %418 : vector<1x32xf32>
    %420 = vector.extract_strided_slice %147 {offsets = [1, 6, 0], sizes = [1, 1, 32], strides = [1, 1, 1]} : vector<4x9x32xf32> to vector<1x1x32xf32>
    %421 = vector.shape_cast %420 : vector<1x1x32xf32> to vector<1x32xf32>
    %422 = arith.addf %411, %421 : vector<1x32xf32>
    %423 = vector.extract_strided_slice %147 {offsets = [2, 6, 0], sizes = [1, 1, 32], strides = [1, 1, 1]} : vector<4x9x32xf32> to vector<1x1x32xf32>
    %424 = vector.shape_cast %423 : vector<1x1x32xf32> to vector<1x32xf32>
    %425 = arith.addf %393, %424 : vector<1x32xf32>
    %426 = vector.extract_strided_slice %147 {offsets = [3, 6, 0], sizes = [1, 1, 32], strides = [1, 1, 1]} : vector<4x9x32xf32> to vector<1x1x32xf32>
    %427 = vector.shape_cast %426 : vector<1x1x32xf32> to vector<1x32xf32>
    %428 = vector.extract_strided_slice %147 {offsets = [0, 7, 0], sizes = [1, 1, 32], strides = [1, 1, 1]} : vector<4x9x32xf32> to vector<1x1x32xf32>
    %429 = vector.shape_cast %428 : vector<1x1x32xf32> to vector<1x32xf32>
    %430 = arith.addf %419, %429 : vector<1x32xf32>
    %431 = vector.extract_strided_slice %147 {offsets = [1, 7, 0], sizes = [1, 1, 32], strides = [1, 1, 1]} : vector<4x9x32xf32> to vector<1x1x32xf32>
    %432 = vector.shape_cast %431 : vector<1x1x32xf32> to vector<1x32xf32>
    %433 = arith.addf %422, %432 : vector<1x32xf32>
    %434 = vector.extract_strided_slice %147 {offsets = [2, 7, 0], sizes = [1, 1, 32], strides = [1, 1, 1]} : vector<4x9x32xf32> to vector<1x1x32xf32>
    %435 = vector.shape_cast %434 : vector<1x1x32xf32> to vector<1x32xf32>
    %436 = arith.addf %414, %435 : vector<1x32xf32>
    %437 = vector.extract_strided_slice %147 {offsets = [3, 7, 0], sizes = [1, 1, 32], strides = [1, 1, 1]} : vector<4x9x32xf32> to vector<1x1x32xf32>
    %438 = vector.shape_cast %437 : vector<1x1x32xf32> to vector<1x32xf32>
    %439 = vector.extract_strided_slice %147 {offsets = [0, 8, 0], sizes = [1, 1, 32], strides = [1, 1, 1]} : vector<4x9x32xf32> to vector<1x1x32xf32>
    %440 = vector.shape_cast %439 : vector<1x1x32xf32> to vector<1x32xf32>
    %441 = arith.addf %430, %440 : vector<1x32xf32>
    %442 = vector.extract_strided_slice %147 {offsets = [1, 8, 0], sizes = [1, 1, 32], strides = [1, 1, 1]} : vector<4x9x32xf32> to vector<1x1x32xf32>
    %443 = vector.shape_cast %442 : vector<1x1x32xf32> to vector<1x32xf32>
    %444 = arith.addf %433, %443 : vector<1x32xf32>
    %445 = vector.extract_strided_slice %147 {offsets = [2, 8, 0], sizes = [1, 1, 32], strides = [1, 1, 1]} : vector<4x9x32xf32> to vector<1x1x32xf32>
    %446 = vector.shape_cast %445 : vector<1x1x32xf32> to vector<1x32xf32>
    %447 = arith.addf %436, %446 : vector<1x32xf32>
    %448 = vector.extract_strided_slice %147 {offsets = [3, 8, 0], sizes = [1, 1, 32], strides = [1, 1, 1]} : vector<4x9x32xf32> to vector<1x1x32xf32>
    %449 = vector.shape_cast %448 : vector<1x1x32xf32> to vector<1x32xf32>
    %450 = vector.broadcast %379 : vector<1x32xf32> to vector<16x32xf32>
    %451 = arith.mulf %267, %450 : vector<16x32xf32>
    %452 = vector.broadcast %382 : vector<1x32xf32> to vector<16x32xf32>
    %453 = arith.mulf %272, %452 : vector<16x32xf32>
    %454 = vector.broadcast %364 : vector<1x32xf32> to vector<16x32xf32>
    %455 = arith.mulf %277, %454 : vector<16x32xf32>
    %456 = vector.broadcast %366 : vector<1x32xf32> to vector<16x32xf32>
    %457 = arith.mulf %287, %456 : vector<16x32xf32>
    %458 = vector.extract_strided_slice %95 {offsets = [0, 0], sizes = [8, 32], strides = [1, 1]} : vector<16x32xf32> to vector<8x32xf32>
    %459 = tpu.concatenate %11, %458 in 0 : vector<8x32xf32>, vector<8x32xf32> -> vector<16x32xf32>
    %460 = vector.broadcast %385 : vector<1x32xf32> to vector<16x32xf32>
    %461 = arith.mulf %459, %460 : vector<16x32xf32>
    %462 = arith.addf %455, %461 : vector<16x32xf32>
    %463 = vector.extract_strided_slice %144 {offsets = [0, 0], sizes = [8, 32], strides = [1, 1]} : vector<16x32xf32> to vector<8x32xf32>
    %464 = tpu.concatenate %17, %463 in 0 : vector<8x32xf32>, vector<8x32xf32> -> vector<16x32xf32>
    %465 = vector.broadcast %376 : vector<1x32xf32> to vector<16x32xf32>
    %466 = arith.mulf %464, %465 : vector<16x32xf32>
    %467 = arith.addf %457, %466 : vector<16x32xf32>
    %468 = vector.extract_strided_slice %146 {offsets = [0, 0], sizes = [8, 32], strides = [1, 1]} : vector<16x32xf32> to vector<8x32xf32>
    %469 = tpu.concatenate %19, %468 in 0 : vector<8x32xf32>, vector<8x32xf32> -> vector<16x32xf32>
    %470 = vector.broadcast %387 : vector<1x32xf32> to vector<16x32xf32>
    %471 = arith.mulf %469, %470 : vector<16x32xf32>
    %472 = arith.addf %467, %471 : vector<16x32xf32>
    %473 = vector.broadcast %441 : vector<1x32xf32> to vector<16x32xf32>
    %474 = arith.mulf %34, %473 : vector<16x32xf32>
    %475 = arith.addf %451, %474 : vector<16x32xf32>
    %476 = vector.broadcast %444 : vector<1x32xf32> to vector<16x32xf32>
    %477 = arith.mulf %45, %476 : vector<16x32xf32>
    %478 = arith.addf %453, %477 : vector<16x32xf32>
    %479 = vector.broadcast %425 : vector<1x32xf32> to vector<16x32xf32>
    %480 = arith.mulf %59, %479 : vector<16x32xf32>
    %481 = arith.addf %462, %480 : vector<16x32xf32>
    %482 = vector.broadcast %395 : vector<1x32xf32> to vector<16x32xf32>
    %483 = arith.mulf %118, %482 : vector<16x32xf32>
    %484 = arith.addf %472, %483 : vector<16x32xf32>
    %485 = vector.broadcast %447 : vector<1x32xf32> to vector<16x32xf32>
    %486 = arith.mulf %71, %485 : vector<16x32xf32>
    %487 = arith.addf %481, %486 : vector<16x32xf32>
    %488 = vector.broadcast %405 : vector<1x32xf32> to vector<16x32xf32>
    %489 = arith.mulf %120, %488 : vector<16x32xf32>
    %490 = arith.addf %484, %489 : vector<16x32xf32>
    %491 = vector.broadcast %416 : vector<1x32xf32> to vector<16x32xf32>
    %492 = arith.mulf %122, %491 : vector<16x32xf32>
    %493 = arith.addf %490, %492 : vector<16x32xf32>
    %494 = vector.broadcast %427 : vector<1x32xf32> to vector<16x32xf32>
    %495 = arith.mulf %126, %494 : vector<16x32xf32>
    %496 = arith.addf %493, %495 : vector<16x32xf32>
    %497 = vector.broadcast %438 : vector<1x32xf32> to vector<16x32xf32>
    %498 = arith.mulf %128, %497 : vector<16x32xf32>
    %499 = arith.addf %496, %498 : vector<16x32xf32>
    %500 = vector.broadcast %449 : vector<1x32xf32> to vector<16x32xf32>
    %501 = arith.mulf %130, %500 : vector<16x32xf32>
    %502 = arith.addf %499, %501 : vector<16x32xf32>
    %503 = tpu.concatenate %475, %478, %487, %502 in 1 : vector<16x32xf32>, vector<16x32xf32>, vector<16x32xf32>, vector<16x32xf32> -> vector<16x128xf32>
    %504 = arith.truncf %503 : vector<16x128xf32> to vector<16x128xbf16>
    %cst_99 = arith.constant dense<0.000000e+00> : vector<16x64xf32>
    %505 = tpu.matmul %504, %149, %cst_99 {dimension_numbers = #tpu.dot_dimension_numbers<[1], [0], [0], [1], [0, 0, 1, 1], [], []>} : vector<16x128xbf16>, vector<128x64xbf16>, vector<16x64xf32> -> vector<16x64xf32>
    %506 = vector.broadcast %150 : vector<1x64xf32> to vector<16x64xf32>
    %507 = arith.addf %505, %506 : vector<16x64xf32>
    %cst_100 = arith.constant 0.000000e+00 : f32
    %508 = vector.broadcast %cst_100 : f32 to vector<16x64xf32>
    %509 = arith.maximumf %507, %508 : vector<16x64xf32>
    %510 = vector.extract_strided_slice %147 {offsets = [0, 0, 0], sizes = [1, 1, 32], strides = [1, 1, 1]} : vector<4x9x32xf32> to vector<1x1x32xf32>
    %511 = vector.shape_cast %510 : vector<1x1x32xf32> to vector<1x32xf32>
    %512 = vector.extract_strided_slice %147 {offsets = [1, 0, 0], sizes = [1, 1, 32], strides = [1, 1, 1]} : vector<4x9x32xf32> to vector<1x1x32xf32>
    %513 = vector.shape_cast %512 : vector<1x1x32xf32> to vector<1x32xf32>
    %514 = vector.extract_strided_slice %147 {offsets = [2, 0, 0], sizes = [1, 1, 32], strides = [1, 1, 1]} : vector<4x9x32xf32> to vector<1x1x32xf32>
    %515 = vector.shape_cast %514 : vector<1x1x32xf32> to vector<1x32xf32>
    %516 = vector.extract_strided_slice %147 {offsets = [3, 0, 0], sizes = [1, 1, 32], strides = [1, 1, 1]} : vector<4x9x32xf32> to vector<1x1x32xf32>
    %517 = vector.shape_cast %516 : vector<1x1x32xf32> to vector<1x32xf32>
    %518 = vector.extract_strided_slice %147 {offsets = [0, 1, 0], sizes = [1, 1, 32], strides = [1, 1, 1]} : vector<4x9x32xf32> to vector<1x1x32xf32>
    %519 = vector.shape_cast %518 : vector<1x1x32xf32> to vector<1x32xf32>
    %520 = vector.extract_strided_slice %147 {offsets = [1, 1, 0], sizes = [1, 1, 32], strides = [1, 1, 1]} : vector<4x9x32xf32> to vector<1x1x32xf32>
    %521 = vector.shape_cast %520 : vector<1x1x32xf32> to vector<1x32xf32>
    %522 = vector.extract_strided_slice %147 {offsets = [2, 1, 0], sizes = [1, 1, 32], strides = [1, 1, 1]} : vector<4x9x32xf32> to vector<1x1x32xf32>
    %523 = vector.shape_cast %522 : vector<1x1x32xf32> to vector<1x32xf32>
    %524 = vector.extract_strided_slice %147 {offsets = [3, 1, 0], sizes = [1, 1, 32], strides = [1, 1, 1]} : vector<4x9x32xf32> to vector<1x1x32xf32>
    %525 = vector.shape_cast %524 : vector<1x1x32xf32> to vector<1x32xf32>
    %526 = vector.extract_strided_slice %147 {offsets = [0, 2, 0], sizes = [1, 1, 32], strides = [1, 1, 1]} : vector<4x9x32xf32> to vector<1x1x32xf32>
    %527 = vector.shape_cast %526 : vector<1x1x32xf32> to vector<1x32xf32>
    %528 = arith.addf %519, %527 : vector<1x32xf32>
    %529 = vector.extract_strided_slice %147 {offsets = [1, 2, 0], sizes = [1, 1, 32], strides = [1, 1, 1]} : vector<4x9x32xf32> to vector<1x1x32xf32>
    %530 = vector.shape_cast %529 : vector<1x1x32xf32> to vector<1x32xf32>
    %531 = arith.addf %521, %530 : vector<1x32xf32>
    %532 = vector.extract_strided_slice %147 {offsets = [2, 2, 0], sizes = [1, 1, 32], strides = [1, 1, 1]} : vector<4x9x32xf32> to vector<1x1x32xf32>
    %533 = vector.shape_cast %532 : vector<1x1x32xf32> to vector<1x32xf32>
    %534 = arith.addf %523, %533 : vector<1x32xf32>
    %535 = vector.extract_strided_slice %147 {offsets = [3, 2, 0], sizes = [1, 1, 32], strides = [1, 1, 1]} : vector<4x9x32xf32> to vector<1x1x32xf32>
    %536 = vector.shape_cast %535 : vector<1x1x32xf32> to vector<1x32xf32>
    %537 = vector.extract_strided_slice %147 {offsets = [0, 3, 0], sizes = [1, 1, 32], strides = [1, 1, 1]} : vector<4x9x32xf32> to vector<1x1x32xf32>
    %538 = vector.shape_cast %537 : vector<1x1x32xf32> to vector<1x32xf32>
    %539 = arith.addf %511, %538 : vector<1x32xf32>
    %540 = vector.extract_strided_slice %147 {offsets = [1, 3, 0], sizes = [1, 1, 32], strides = [1, 1, 1]} : vector<4x9x32xf32> to vector<1x1x32xf32>
    %541 = vector.shape_cast %540 : vector<1x1x32xf32> to vector<1x32xf32>
    %542 = arith.addf %513, %541 : vector<1x32xf32>
    %543 = vector.extract_strided_slice %147 {offsets = [2, 3, 0], sizes = [1, 1, 32], strides = [1, 1, 1]} : vector<4x9x32xf32> to vector<1x1x32xf32>
    %544 = vector.shape_cast %543 : vector<1x1x32xf32> to vector<1x32xf32>
    %545 = vector.extract_strided_slice %147 {offsets = [3, 3, 0], sizes = [1, 1, 32], strides = [1, 1, 1]} : vector<4x9x32xf32> to vector<1x1x32xf32>
    %546 = vector.shape_cast %545 : vector<1x1x32xf32> to vector<1x32xf32>
    %547 = vector.extract_strided_slice %147 {offsets = [0, 4, 0], sizes = [1, 1, 32], strides = [1, 1, 1]} : vector<4x9x32xf32> to vector<1x1x32xf32>
    %548 = vector.shape_cast %547 : vector<1x1x32xf32> to vector<1x32xf32>
    %549 = arith.addf %528, %548 : vector<1x32xf32>
    %550 = vector.extract_strided_slice %147 {offsets = [1, 4, 0], sizes = [1, 1, 32], strides = [1, 1, 1]} : vector<4x9x32xf32> to vector<1x1x32xf32>
    %551 = vector.shape_cast %550 : vector<1x1x32xf32> to vector<1x32xf32>
    %552 = arith.addf %531, %551 : vector<1x32xf32>
    %553 = vector.extract_strided_slice %147 {offsets = [2, 4, 0], sizes = [1, 1, 32], strides = [1, 1, 1]} : vector<4x9x32xf32> to vector<1x1x32xf32>
    %554 = vector.shape_cast %553 : vector<1x1x32xf32> to vector<1x32xf32>
    %555 = vector.extract_strided_slice %147 {offsets = [3, 4, 0], sizes = [1, 1, 32], strides = [1, 1, 1]} : vector<4x9x32xf32> to vector<1x1x32xf32>
    %556 = vector.shape_cast %555 : vector<1x1x32xf32> to vector<1x32xf32>
    %557 = vector.extract_strided_slice %147 {offsets = [0, 5, 0], sizes = [1, 1, 32], strides = [1, 1, 1]} : vector<4x9x32xf32> to vector<1x1x32xf32>
    %558 = vector.shape_cast %557 : vector<1x1x32xf32> to vector<1x32xf32>
    %559 = arith.addf %549, %558 : vector<1x32xf32>
    %560 = vector.extract_strided_slice %147 {offsets = [1, 5, 0], sizes = [1, 1, 32], strides = [1, 1, 1]} : vector<4x9x32xf32> to vector<1x1x32xf32>
    %561 = vector.shape_cast %560 : vector<1x1x32xf32> to vector<1x32xf32>
    %562 = arith.addf %552, %561 : vector<1x32xf32>
    %563 = vector.extract_strided_slice %147 {offsets = [2, 5, 0], sizes = [1, 1, 32], strides = [1, 1, 1]} : vector<4x9x32xf32> to vector<1x1x32xf32>
    %564 = vector.shape_cast %563 : vector<1x1x32xf32> to vector<1x32xf32>
    %565 = arith.addf %554, %564 : vector<1x32xf32>
    %566 = vector.extract_strided_slice %147 {offsets = [3, 5, 0], sizes = [1, 1, 32], strides = [1, 1, 1]} : vector<4x9x32xf32> to vector<1x1x32xf32>
    %567 = vector.shape_cast %566 : vector<1x1x32xf32> to vector<1x32xf32>
    %568 = vector.extract_strided_slice %147 {offsets = [0, 6, 0], sizes = [1, 1, 32], strides = [1, 1, 1]} : vector<4x9x32xf32> to vector<1x1x32xf32>
    %569 = vector.shape_cast %568 : vector<1x1x32xf32> to vector<1x32xf32>
    %570 = arith.addf %539, %569 : vector<1x32xf32>
    %571 = vector.extract_strided_slice %147 {offsets = [1, 6, 0], sizes = [1, 1, 32], strides = [1, 1, 1]} : vector<4x9x32xf32> to vector<1x1x32xf32>
    %572 = vector.shape_cast %571 : vector<1x1x32xf32> to vector<1x32xf32>
    %573 = arith.addf %542, %572 : vector<1x32xf32>
    %574 = vector.extract_strided_slice %147 {offsets = [2, 6, 0], sizes = [1, 1, 32], strides = [1, 1, 1]} : vector<4x9x32xf32> to vector<1x1x32xf32>
    %575 = vector.shape_cast %574 : vector<1x1x32xf32> to vector<1x32xf32>
    %576 = arith.addf %544, %575 : vector<1x32xf32>
    %577 = vector.extract_strided_slice %147 {offsets = [3, 6, 0], sizes = [1, 1, 32], strides = [1, 1, 1]} : vector<4x9x32xf32> to vector<1x1x32xf32>
    %578 = vector.shape_cast %577 : vector<1x1x32xf32> to vector<1x32xf32>
    %579 = vector.extract_strided_slice %147 {offsets = [0, 7, 0], sizes = [1, 1, 32], strides = [1, 1, 1]} : vector<4x9x32xf32> to vector<1x1x32xf32>
    %580 = vector.shape_cast %579 : vector<1x1x32xf32> to vector<1x32xf32>
    %581 = arith.addf %559, %580 : vector<1x32xf32>
    %582 = vector.extract_strided_slice %147 {offsets = [1, 7, 0], sizes = [1, 1, 32], strides = [1, 1, 1]} : vector<4x9x32xf32> to vector<1x1x32xf32>
    %583 = vector.shape_cast %582 : vector<1x1x32xf32> to vector<1x32xf32>
    %584 = arith.addf %562, %583 : vector<1x32xf32>
    %585 = vector.extract_strided_slice %147 {offsets = [2, 7, 0], sizes = [1, 1, 32], strides = [1, 1, 1]} : vector<4x9x32xf32> to vector<1x1x32xf32>
    %586 = vector.shape_cast %585 : vector<1x1x32xf32> to vector<1x32xf32>
    %587 = arith.addf %565, %586 : vector<1x32xf32>
    %588 = vector.extract_strided_slice %147 {offsets = [3, 7, 0], sizes = [1, 1, 32], strides = [1, 1, 1]} : vector<4x9x32xf32> to vector<1x1x32xf32>
    %589 = vector.shape_cast %588 : vector<1x1x32xf32> to vector<1x32xf32>
    %590 = vector.extract_strided_slice %147 {offsets = [0, 8, 0], sizes = [1, 1, 32], strides = [1, 1, 1]} : vector<4x9x32xf32> to vector<1x1x32xf32>
    %591 = vector.shape_cast %590 : vector<1x1x32xf32> to vector<1x32xf32>
    %592 = arith.addf %581, %591 : vector<1x32xf32>
    %593 = vector.extract_strided_slice %147 {offsets = [1, 8, 0], sizes = [1, 1, 32], strides = [1, 1, 1]} : vector<4x9x32xf32> to vector<1x1x32xf32>
    %594 = vector.shape_cast %593 : vector<1x1x32xf32> to vector<1x32xf32>
    %595 = arith.addf %584, %594 : vector<1x32xf32>
    %596 = vector.extract_strided_slice %147 {offsets = [2, 8, 0], sizes = [1, 1, 32], strides = [1, 1, 1]} : vector<4x9x32xf32> to vector<1x1x32xf32>
    %597 = vector.shape_cast %596 : vector<1x1x32xf32> to vector<1x32xf32>
    %598 = arith.addf %587, %597 : vector<1x32xf32>
    %599 = vector.extract_strided_slice %147 {offsets = [3, 8, 0], sizes = [1, 1, 32], strides = [1, 1, 1]} : vector<4x9x32xf32> to vector<1x1x32xf32>
    %600 = vector.shape_cast %599 : vector<1x1x32xf32> to vector<1x32xf32>
    %601 = vector.broadcast %570 : vector<1x32xf32> to vector<16x32xf32>
    %602 = arith.mulf %295, %601 : vector<16x32xf32>
    %603 = vector.broadcast %573 : vector<1x32xf32> to vector<16x32xf32>
    %604 = arith.mulf %303, %603 : vector<16x32xf32>
    %605 = vector.broadcast %515 : vector<1x32xf32> to vector<16x32xf32>
    %606 = arith.mulf %311, %605 : vector<16x32xf32>
    %607 = vector.broadcast %517 : vector<1x32xf32> to vector<16x32xf32>
    %608 = arith.mulf %342, %607 : vector<16x32xf32>
    %609 = vector.broadcast %592 : vector<1x32xf32> to vector<16x32xf32>
    %610 = arith.mulf %34, %609 : vector<16x32xf32>
    %611 = arith.addf %602, %610 : vector<16x32xf32>
    %612 = vector.broadcast %595 : vector<1x32xf32> to vector<16x32xf32>
    %613 = arith.mulf %45, %612 : vector<16x32xf32>
    %614 = arith.addf %604, %613 : vector<16x32xf32>
    %615 = vector.broadcast %534 : vector<1x32xf32> to vector<16x32xf32>
    %616 = arith.mulf %59, %615 : vector<16x32xf32>
    %617 = arith.addf %606, %616 : vector<16x32xf32>
    %618 = vector.broadcast %525 : vector<1x32xf32> to vector<16x32xf32>
    %619 = arith.mulf %124, %618 : vector<16x32xf32>
    %620 = arith.addf %608, %619 : vector<16x32xf32>
    %621 = vector.broadcast %536 : vector<1x32xf32> to vector<16x32xf32>
    %622 = arith.mulf %126, %621 : vector<16x32xf32>
    %623 = arith.addf %620, %622 : vector<16x32xf32>
    %cst_101 = arith.constant 0.000000e+00 : f32
    %624 = vector.broadcast %cst_101 : f32 to vector<1x32xf32>
    %625 = vector.extract_strided_slice %95 {offsets = [0, 0], sizes = [15, 32], strides = [1, 1]} : vector<16x32xf32> to vector<15x32xf32>
    %626 = tpu.concatenate %624, %625 in 0 : vector<1x32xf32>, vector<15x32xf32> -> vector<16x32xf32>
    %627 = vector.broadcast %3 : vector<16x1xf32> to vector<16x32xf32>
    %628 = arith.mulf %626, %627 : vector<16x32xf32>
    %629 = vector.broadcast %576 : vector<1x32xf32> to vector<16x32xf32>
    %630 = arith.mulf %628, %629 : vector<16x32xf32>
    %631 = arith.addf %617, %630 : vector<16x32xf32>
    %cst_102 = arith.constant 0.000000e+00 : f32
    %632 = vector.broadcast %cst_102 : f32 to vector<1x32xf32>
    %633 = vector.extract_strided_slice %138 {offsets = [0, 0], sizes = [15, 32], strides = [1, 1]} : vector<16x32xf32> to vector<15x32xf32>
    %634 = tpu.concatenate %632, %633 in 0 : vector<1x32xf32>, vector<15x32xf32> -> vector<16x32xf32>
    %635 = vector.broadcast %3 : vector<16x1xf32> to vector<16x32xf32>
    %636 = arith.mulf %634, %635 : vector<16x32xf32>
    %637 = vector.broadcast %546 : vector<1x32xf32> to vector<16x32xf32>
    %638 = arith.mulf %636, %637 : vector<16x32xf32>
    %639 = arith.addf %623, %638 : vector<16x32xf32>
    %640 = vector.broadcast %598 : vector<1x32xf32> to vector<16x32xf32>
    %641 = arith.mulf %83, %640 : vector<16x32xf32>
    %642 = arith.addf %631, %641 : vector<16x32xf32>
    %643 = vector.broadcast %556 : vector<1x32xf32> to vector<16x32xf32>
    %644 = arith.mulf %132, %643 : vector<16x32xf32>
    %645 = arith.addf %639, %644 : vector<16x32xf32>
    %646 = vector.broadcast %567 : vector<1x32xf32> to vector<16x32xf32>
    %647 = arith.mulf %134, %646 : vector<16x32xf32>
    %648 = arith.addf %645, %647 : vector<16x32xf32>
    %cst_103 = arith.constant 0.000000e+00 : f32
    %649 = vector.broadcast %cst_103 : f32 to vector<1x32xf32>
    %650 = vector.extract_strided_slice %146 {offsets = [0, 0], sizes = [15, 32], strides = [1, 1]} : vector<16x32xf32> to vector<15x32xf32>
    %651 = tpu.concatenate %649, %650 in 0 : vector<1x32xf32>, vector<15x32xf32> -> vector<16x32xf32>
    %652 = vector.broadcast %3 : vector<16x1xf32> to vector<16x32xf32>
    %653 = arith.mulf %651, %652 : vector<16x32xf32>
    %654 = vector.broadcast %578 : vector<1x32xf32> to vector<16x32xf32>
    %655 = arith.mulf %653, %654 : vector<16x32xf32>
    %656 = arith.addf %648, %655 : vector<16x32xf32>
    %657 = vector.broadcast %589 : vector<1x32xf32> to vector<16x32xf32>
    %658 = arith.mulf %140, %657 : vector<16x32xf32>
    %659 = arith.addf %656, %658 : vector<16x32xf32>
    %660 = vector.broadcast %600 : vector<1x32xf32> to vector<16x32xf32>
    %661 = arith.mulf %142, %660 : vector<16x32xf32>
    %662 = arith.addf %659, %661 : vector<16x32xf32>
    %663 = tpu.concatenate %611, %614, %642, %662 in 1 : vector<16x32xf32>, vector<16x32xf32>, vector<16x32xf32>, vector<16x32xf32> -> vector<16x128xf32>
    %664 = arith.truncf %663 : vector<16x128xf32> to vector<16x128xbf16>
    %cst_104 = arith.constant dense<0.000000e+00> : vector<16x64xf32>
    %665 = tpu.matmul %664, %149, %cst_104 {dimension_numbers = #tpu.dot_dimension_numbers<[1], [0], [0], [1], [0, 0, 1, 1], [], []>} : vector<16x128xbf16>, vector<128x64xbf16>, vector<16x64xf32> -> vector<16x64xf32>
    %666 = vector.broadcast %150 : vector<1x64xf32> to vector<16x64xf32>
    %667 = arith.addf %665, %666 : vector<16x64xf32>
    %cst_105 = arith.constant 0.000000e+00 : f32
    %668 = vector.broadcast %cst_105 : f32 to vector<16x64xf32>
    %669 = arith.maximumf %667, %668 : vector<16x64xf32>
    %670 = vector.extract_strided_slice %147 {offsets = [0, 0, 0], sizes = [1, 1, 32], strides = [1, 1, 1]} : vector<4x9x32xf32> to vector<1x1x32xf32>
    %671 = vector.shape_cast %670 : vector<1x1x32xf32> to vector<1x32xf32>
    %672 = vector.extract_strided_slice %147 {offsets = [1, 0, 0], sizes = [1, 1, 32], strides = [1, 1, 1]} : vector<4x9x32xf32> to vector<1x1x32xf32>
    %673 = vector.shape_cast %672 : vector<1x1x32xf32> to vector<1x32xf32>
    %674 = vector.extract_strided_slice %147 {offsets = [2, 0, 0], sizes = [1, 1, 32], strides = [1, 1, 1]} : vector<4x9x32xf32> to vector<1x1x32xf32>
    %675 = vector.shape_cast %674 : vector<1x1x32xf32> to vector<1x32xf32>
    %676 = vector.extract_strided_slice %147 {offsets = [3, 0, 0], sizes = [1, 1, 32], strides = [1, 1, 1]} : vector<4x9x32xf32> to vector<1x1x32xf32>
    %677 = vector.shape_cast %676 : vector<1x1x32xf32> to vector<1x32xf32>
    %678 = vector.extract_strided_slice %147 {offsets = [0, 1, 0], sizes = [1, 1, 32], strides = [1, 1, 1]} : vector<4x9x32xf32> to vector<1x1x32xf32>
    %679 = vector.shape_cast %678 : vector<1x1x32xf32> to vector<1x32xf32>
    %680 = arith.addf %671, %679 : vector<1x32xf32>
    %681 = vector.extract_strided_slice %147 {offsets = [1, 1, 0], sizes = [1, 1, 32], strides = [1, 1, 1]} : vector<4x9x32xf32> to vector<1x1x32xf32>
    %682 = vector.shape_cast %681 : vector<1x1x32xf32> to vector<1x32xf32>
    %683 = arith.addf %673, %682 : vector<1x32xf32>
    %684 = vector.extract_strided_slice %147 {offsets = [2, 1, 0], sizes = [1, 1, 32], strides = [1, 1, 1]} : vector<4x9x32xf32> to vector<1x1x32xf32>
    %685 = vector.shape_cast %684 : vector<1x1x32xf32> to vector<1x32xf32>
    %686 = vector.extract_strided_slice %147 {offsets = [3, 1, 0], sizes = [1, 1, 32], strides = [1, 1, 1]} : vector<4x9x32xf32> to vector<1x1x32xf32>
    %687 = vector.shape_cast %686 : vector<1x1x32xf32> to vector<1x32xf32>
    %688 = vector.extract_strided_slice %147 {offsets = [0, 2, 0], sizes = [1, 1, 32], strides = [1, 1, 1]} : vector<4x9x32xf32> to vector<1x1x32xf32>
    %689 = vector.shape_cast %688 : vector<1x1x32xf32> to vector<1x32xf32>
    %690 = arith.addf %680, %689 : vector<1x32xf32>
    %691 = vector.extract_strided_slice %147 {offsets = [1, 2, 0], sizes = [1, 1, 32], strides = [1, 1, 1]} : vector<4x9x32xf32> to vector<1x1x32xf32>
    %692 = vector.shape_cast %691 : vector<1x1x32xf32> to vector<1x32xf32>
    %693 = arith.addf %683, %692 : vector<1x32xf32>
    %694 = vector.extract_strided_slice %147 {offsets = [2, 2, 0], sizes = [1, 1, 32], strides = [1, 1, 1]} : vector<4x9x32xf32> to vector<1x1x32xf32>
    %695 = vector.shape_cast %694 : vector<1x1x32xf32> to vector<1x32xf32>
    %696 = arith.addf %685, %695 : vector<1x32xf32>
    %697 = vector.extract_strided_slice %147 {offsets = [3, 2, 0], sizes = [1, 1, 32], strides = [1, 1, 1]} : vector<4x9x32xf32> to vector<1x1x32xf32>
    %698 = vector.shape_cast %697 : vector<1x1x32xf32> to vector<1x32xf32>
    %699 = vector.extract_strided_slice %147 {offsets = [0, 3, 0], sizes = [1, 1, 32], strides = [1, 1, 1]} : vector<4x9x32xf32> to vector<1x1x32xf32>
    %700 = vector.shape_cast %699 : vector<1x1x32xf32> to vector<1x32xf32>
    %701 = arith.addf %690, %700 : vector<1x32xf32>
    %702 = vector.extract_strided_slice %147 {offsets = [1, 3, 0], sizes = [1, 1, 32], strides = [1, 1, 1]} : vector<4x9x32xf32> to vector<1x1x32xf32>
    %703 = vector.shape_cast %702 : vector<1x1x32xf32> to vector<1x32xf32>
    %704 = arith.addf %693, %703 : vector<1x32xf32>
    %705 = vector.extract_strided_slice %147 {offsets = [2, 3, 0], sizes = [1, 1, 32], strides = [1, 1, 1]} : vector<4x9x32xf32> to vector<1x1x32xf32>
    %706 = vector.shape_cast %705 : vector<1x1x32xf32> to vector<1x32xf32>
    %707 = vector.extract_strided_slice %147 {offsets = [3, 3, 0], sizes = [1, 1, 32], strides = [1, 1, 1]} : vector<4x9x32xf32> to vector<1x1x32xf32>
    %708 = vector.shape_cast %707 : vector<1x1x32xf32> to vector<1x32xf32>
    %709 = vector.extract_strided_slice %147 {offsets = [0, 4, 0], sizes = [1, 1, 32], strides = [1, 1, 1]} : vector<4x9x32xf32> to vector<1x1x32xf32>
    %710 = vector.shape_cast %709 : vector<1x1x32xf32> to vector<1x32xf32>
    %711 = arith.addf %701, %710 : vector<1x32xf32>
    %712 = vector.extract_strided_slice %147 {offsets = [1, 4, 0], sizes = [1, 1, 32], strides = [1, 1, 1]} : vector<4x9x32xf32> to vector<1x1x32xf32>
    %713 = vector.shape_cast %712 : vector<1x1x32xf32> to vector<1x32xf32>
    %714 = arith.addf %704, %713 : vector<1x32xf32>
    %715 = vector.extract_strided_slice %147 {offsets = [2, 4, 0], sizes = [1, 1, 32], strides = [1, 1, 1]} : vector<4x9x32xf32> to vector<1x1x32xf32>
    %716 = vector.shape_cast %715 : vector<1x1x32xf32> to vector<1x32xf32>
    %717 = vector.extract_strided_slice %147 {offsets = [3, 4, 0], sizes = [1, 1, 32], strides = [1, 1, 1]} : vector<4x9x32xf32> to vector<1x1x32xf32>
    %718 = vector.shape_cast %717 : vector<1x1x32xf32> to vector<1x32xf32>
    %719 = vector.extract_strided_slice %147 {offsets = [0, 5, 0], sizes = [1, 1, 32], strides = [1, 1, 1]} : vector<4x9x32xf32> to vector<1x1x32xf32>
    %720 = vector.shape_cast %719 : vector<1x1x32xf32> to vector<1x32xf32>
    %721 = arith.addf %711, %720 : vector<1x32xf32>
    %722 = vector.extract_strided_slice %147 {offsets = [1, 5, 0], sizes = [1, 1, 32], strides = [1, 1, 1]} : vector<4x9x32xf32> to vector<1x1x32xf32>
    %723 = vector.shape_cast %722 : vector<1x1x32xf32> to vector<1x32xf32>
    %724 = arith.addf %714, %723 : vector<1x32xf32>
    %725 = vector.extract_strided_slice %147 {offsets = [2, 5, 0], sizes = [1, 1, 32], strides = [1, 1, 1]} : vector<4x9x32xf32> to vector<1x1x32xf32>
    %726 = vector.shape_cast %725 : vector<1x1x32xf32> to vector<1x32xf32>
    %727 = arith.addf %716, %726 : vector<1x32xf32>
    %728 = vector.extract_strided_slice %147 {offsets = [3, 5, 0], sizes = [1, 1, 32], strides = [1, 1, 1]} : vector<4x9x32xf32> to vector<1x1x32xf32>
    %729 = vector.shape_cast %728 : vector<1x1x32xf32> to vector<1x32xf32>
    %730 = vector.extract_strided_slice %147 {offsets = [0, 6, 0], sizes = [1, 1, 32], strides = [1, 1, 1]} : vector<4x9x32xf32> to vector<1x1x32xf32>
    %731 = vector.shape_cast %730 : vector<1x1x32xf32> to vector<1x32xf32>
    %732 = arith.addf %721, %731 : vector<1x32xf32>
    %733 = vector.extract_strided_slice %147 {offsets = [1, 6, 0], sizes = [1, 1, 32], strides = [1, 1, 1]} : vector<4x9x32xf32> to vector<1x1x32xf32>
    %734 = vector.shape_cast %733 : vector<1x1x32xf32> to vector<1x32xf32>
    %735 = arith.addf %724, %734 : vector<1x32xf32>
    %736 = vector.extract_strided_slice %147 {offsets = [2, 6, 0], sizes = [1, 1, 32], strides = [1, 1, 1]} : vector<4x9x32xf32> to vector<1x1x32xf32>
    %737 = vector.shape_cast %736 : vector<1x1x32xf32> to vector<1x32xf32>
    %738 = arith.addf %706, %737 : vector<1x32xf32>
    %739 = vector.extract_strided_slice %147 {offsets = [3, 6, 0], sizes = [1, 1, 32], strides = [1, 1, 1]} : vector<4x9x32xf32> to vector<1x1x32xf32>
    %740 = vector.shape_cast %739 : vector<1x1x32xf32> to vector<1x32xf32>
    %741 = vector.extract_strided_slice %147 {offsets = [0, 7, 0], sizes = [1, 1, 32], strides = [1, 1, 1]} : vector<4x9x32xf32> to vector<1x1x32xf32>
    %742 = vector.shape_cast %741 : vector<1x1x32xf32> to vector<1x32xf32>
    %743 = arith.addf %732, %742 : vector<1x32xf32>
    %744 = vector.extract_strided_slice %147 {offsets = [1, 7, 0], sizes = [1, 1, 32], strides = [1, 1, 1]} : vector<4x9x32xf32> to vector<1x1x32xf32>
    %745 = vector.shape_cast %744 : vector<1x1x32xf32> to vector<1x32xf32>
    %746 = arith.addf %735, %745 : vector<1x32xf32>
    %747 = vector.extract_strided_slice %147 {offsets = [2, 7, 0], sizes = [1, 1, 32], strides = [1, 1, 1]} : vector<4x9x32xf32> to vector<1x1x32xf32>
    %748 = vector.shape_cast %747 : vector<1x1x32xf32> to vector<1x32xf32>
    %749 = arith.addf %727, %748 : vector<1x32xf32>
    %750 = vector.extract_strided_slice %147 {offsets = [3, 7, 0], sizes = [1, 1, 32], strides = [1, 1, 1]} : vector<4x9x32xf32> to vector<1x1x32xf32>
    %751 = vector.shape_cast %750 : vector<1x1x32xf32> to vector<1x32xf32>
    %752 = vector.extract_strided_slice %147 {offsets = [0, 8, 0], sizes = [1, 1, 32], strides = [1, 1, 1]} : vector<4x9x32xf32> to vector<1x1x32xf32>
    %753 = vector.shape_cast %752 : vector<1x1x32xf32> to vector<1x32xf32>
    %754 = arith.addf %743, %753 : vector<1x32xf32>
    %755 = vector.extract_strided_slice %147 {offsets = [1, 8, 0], sizes = [1, 1, 32], strides = [1, 1, 1]} : vector<4x9x32xf32> to vector<1x1x32xf32>
    %756 = vector.shape_cast %755 : vector<1x1x32xf32> to vector<1x32xf32>
    %757 = arith.addf %746, %756 : vector<1x32xf32>
    %758 = vector.extract_strided_slice %147 {offsets = [2, 8, 0], sizes = [1, 1, 32], strides = [1, 1, 1]} : vector<4x9x32xf32> to vector<1x1x32xf32>
    %759 = vector.shape_cast %758 : vector<1x1x32xf32> to vector<1x32xf32>
    %760 = arith.addf %749, %759 : vector<1x32xf32>
    %761 = vector.extract_strided_slice %147 {offsets = [3, 8, 0], sizes = [1, 1, 32], strides = [1, 1, 1]} : vector<4x9x32xf32> to vector<1x1x32xf32>
    %762 = vector.shape_cast %761 : vector<1x1x32xf32> to vector<1x32xf32>
    %763 = vector.broadcast %754 : vector<1x32xf32> to vector<16x32xf32>
    %764 = arith.mulf %34, %763 : vector<16x32xf32>
    %765 = vector.broadcast %757 : vector<1x32xf32> to vector<16x32xf32>
    %766 = arith.mulf %45, %765 : vector<16x32xf32>
    %767 = vector.broadcast %675 : vector<1x32xf32> to vector<16x32xf32>
    %768 = arith.mulf %59, %767 : vector<16x32xf32>
    %769 = vector.broadcast %677 : vector<1x32xf32> to vector<16x32xf32>
    %770 = arith.mulf %126, %769 : vector<16x32xf32>
    %771 = vector.broadcast %696 : vector<1x32xf32> to vector<16x32xf32>
    %772 = arith.mulf %71, %771 : vector<16x32xf32>
    %773 = arith.addf %768, %772 : vector<16x32xf32>
    %774 = vector.broadcast %687 : vector<1x32xf32> to vector<16x32xf32>
    %775 = arith.mulf %128, %774 : vector<16x32xf32>
    %776 = arith.addf %770, %775 : vector<16x32xf32>
    %777 = vector.broadcast %698 : vector<1x32xf32> to vector<16x32xf32>
    %778 = arith.mulf %130, %777 : vector<16x32xf32>
    %779 = arith.addf %776, %778 : vector<16x32xf32>
    %780 = vector.broadcast %738 : vector<1x32xf32> to vector<16x32xf32>
    %781 = arith.mulf %83, %780 : vector<16x32xf32>
    %782 = arith.addf %773, %781 : vector<16x32xf32>
    %783 = vector.broadcast %708 : vector<1x32xf32> to vector<16x32xf32>
    %784 = arith.mulf %134, %783 : vector<16x32xf32>
    %785 = arith.addf %779, %784 : vector<16x32xf32>
    %786 = vector.broadcast %760 : vector<1x32xf32> to vector<16x32xf32>
    %787 = arith.mulf %95, %786 : vector<16x32xf32>
    %788 = arith.addf %782, %787 : vector<16x32xf32>
    %789 = vector.broadcast %718 : vector<1x32xf32> to vector<16x32xf32>
    %790 = arith.mulf %136, %789 : vector<16x32xf32>
    %791 = arith.addf %785, %790 : vector<16x32xf32>
    %792 = vector.broadcast %729 : vector<1x32xf32> to vector<16x32xf32>
    %793 = arith.mulf %138, %792 : vector<16x32xf32>
    %794 = arith.addf %791, %793 : vector<16x32xf32>
    %795 = vector.broadcast %740 : vector<1x32xf32> to vector<16x32xf32>
    %796 = arith.mulf %142, %795 : vector<16x32xf32>
    %797 = arith.addf %794, %796 : vector<16x32xf32>
    %798 = vector.broadcast %751 : vector<1x32xf32> to vector<16x32xf32>
    %799 = arith.mulf %144, %798 : vector<16x32xf32>
    %800 = arith.addf %797, %799 : vector<16x32xf32>
    %801 = vector.broadcast %762 : vector<1x32xf32> to vector<16x32xf32>
    %802 = arith.mulf %146, %801 : vector<16x32xf32>
    %803 = arith.addf %800, %802 : vector<16x32xf32>
    %804 = tpu.concatenate %764, %766, %788, %803 in 1 : vector<16x32xf32>, vector<16x32xf32>, vector<16x32xf32>, vector<16x32xf32> -> vector<16x128xf32>
    %805 = arith.truncf %804 : vector<16x128xf32> to vector<16x128xbf16>
    %cst_106 = arith.constant dense<0.000000e+00> : vector<16x64xf32>
    %806 = tpu.matmul %805, %149, %cst_106 {dimension_numbers = #tpu.dot_dimension_numbers<[1], [0], [0], [1], [0, 0, 1, 1], [], []>} : vector<16x128xbf16>, vector<128x64xbf16>, vector<16x64xf32> -> vector<16x64xf32>
    %807 = vector.broadcast %150 : vector<1x64xf32> to vector<16x64xf32>
    %808 = arith.addf %806, %807 : vector<16x64xf32>
    %cst_107 = arith.constant 0.000000e+00 : f32
    %809 = vector.broadcast %cst_107 : f32 to vector<16x64xf32>
    %810 = arith.maximumf %808, %809 : vector<16x64xf32>
    %c0_108 = arith.constant 0 : index
    %c0_109 = arith.constant 0 : index
    %811 = vector.load %arg14[%c0_108, %c0_109] : memref<9x64xf32, #tpu.memory_space<vmem>>, vector<9x64xf32>
    %cst_110 = arith.constant 0.000000e+00 : f32
    %812 = vector.broadcast %cst_110 : f32 to vector<1x64xf32>
    %813 = vector.extract_strided_slice %810 {offsets = [0, 0], sizes = [7, 64], strides = [1, 1]} : vector<16x64xf32> to vector<7x64xf32>
    %814 = tpu.concatenate %812, %23, %813 in 0 : vector<1x64xf32>, vector<8x64xf32>, vector<7x64xf32> -> vector<16x64xf32>
    %815 = vector.broadcast %3 : vector<16x1xf32> to vector<16x64xf32>
    %816 = arith.mulf %814, %815 : vector<16x64xf32>
    %817 = vector.extract_strided_slice %811 {offsets = [0, 0], sizes = [1, 64], strides = [1, 1]} : vector<9x64xf32> to vector<1x64xf32>
    %818 = vector.broadcast %817 : vector<1x64xf32> to vector<16x64xf32>
    %819 = arith.mulf %816, %818 : vector<16x64xf32>
    %820 = vector.extract_strided_slice %669 {offsets = [0, 0], sizes = [8, 64], strides = [1, 1]} : vector<16x64xf32> to vector<8x64xf32>
    %821 = tpu.concatenate %21, %820 in 0 : vector<8x64xf32>, vector<8x64xf32> -> vector<16x64xf32>
    %822 = vector.extract_strided_slice %811 {offsets = [1, 0], sizes = [1, 64], strides = [1, 1]} : vector<9x64xf32> to vector<1x64xf32>
    %823 = vector.broadcast %822 : vector<1x64xf32> to vector<16x64xf32>
    %824 = arith.mulf %821, %823 : vector<16x64xf32>
    %825 = arith.addf %819, %824 : vector<16x64xf32>
    %826 = vector.extract_strided_slice %810 {offsets = [0, 0], sizes = [8, 64], strides = [1, 1]} : vector<16x64xf32> to vector<8x64xf32>
    %827 = tpu.concatenate %23, %826 in 0 : vector<8x64xf32>, vector<8x64xf32> -> vector<16x64xf32>
    %828 = vector.extract_strided_slice %811 {offsets = [2, 0], sizes = [1, 64], strides = [1, 1]} : vector<9x64xf32> to vector<1x64xf32>
    %829 = vector.broadcast %828 : vector<1x64xf32> to vector<16x64xf32>
    %830 = arith.mulf %827, %829 : vector<16x64xf32>
    %831 = arith.addf %825, %830 : vector<16x64xf32>
    %cst_111 = arith.constant 0.000000e+00 : f32
    %832 = vector.broadcast %cst_111 : f32 to vector<1x64xf32>
    %833 = vector.extract_strided_slice %509 {offsets = [0, 0], sizes = [15, 64], strides = [1, 1]} : vector<16x64xf32> to vector<15x64xf32>
    %834 = tpu.concatenate %832, %833 in 0 : vector<1x64xf32>, vector<15x64xf32> -> vector<16x64xf32>
    %835 = vector.broadcast %3 : vector<16x1xf32> to vector<16x64xf32>
    %836 = arith.mulf %834, %835 : vector<16x64xf32>
    %837 = vector.extract_strided_slice %811 {offsets = [3, 0], sizes = [1, 64], strides = [1, 1]} : vector<9x64xf32> to vector<1x64xf32>
    %838 = vector.broadcast %837 : vector<1x64xf32> to vector<16x64xf32>
    %839 = arith.mulf %836, %838 : vector<16x64xf32>
    %840 = arith.addf %831, %839 : vector<16x64xf32>
    %841 = vector.extract_strided_slice %811 {offsets = [4, 0], sizes = [1, 64], strides = [1, 1]} : vector<9x64xf32> to vector<1x64xf32>
    %842 = vector.broadcast %841 : vector<1x64xf32> to vector<16x64xf32>
    %843 = arith.mulf %358, %842 : vector<16x64xf32>
    %844 = arith.addf %840, %843 : vector<16x64xf32>
    %845 = vector.extract_strided_slice %811 {offsets = [5, 0], sizes = [1, 64], strides = [1, 1]} : vector<9x64xf32> to vector<1x64xf32>
    %846 = vector.broadcast %845 : vector<1x64xf32> to vector<16x64xf32>
    %847 = arith.mulf %509, %846 : vector<16x64xf32>
    %848 = arith.addf %844, %847 : vector<16x64xf32>
    %cst_112 = arith.constant 0.000000e+00 : f32
    %849 = vector.broadcast %cst_112 : f32 to vector<1x64xf32>
    %850 = vector.extract_strided_slice %810 {offsets = [0, 0], sizes = [15, 64], strides = [1, 1]} : vector<16x64xf32> to vector<15x64xf32>
    %851 = tpu.concatenate %849, %850 in 0 : vector<1x64xf32>, vector<15x64xf32> -> vector<16x64xf32>
    %852 = vector.broadcast %3 : vector<16x1xf32> to vector<16x64xf32>
    %853 = arith.mulf %851, %852 : vector<16x64xf32>
    %854 = vector.extract_strided_slice %811 {offsets = [6, 0], sizes = [1, 64], strides = [1, 1]} : vector<9x64xf32> to vector<1x64xf32>
    %855 = vector.broadcast %854 : vector<1x64xf32> to vector<16x64xf32>
    %856 = arith.mulf %853, %855 : vector<16x64xf32>
    %857 = arith.addf %848, %856 : vector<16x64xf32>
    %858 = vector.extract_strided_slice %811 {offsets = [7, 0], sizes = [1, 64], strides = [1, 1]} : vector<9x64xf32> to vector<1x64xf32>
    %859 = vector.broadcast %858 : vector<1x64xf32> to vector<16x64xf32>
    %860 = arith.mulf %669, %859 : vector<16x64xf32>
    %861 = arith.addf %857, %860 : vector<16x64xf32>
    %862 = vector.extract_strided_slice %811 {offsets = [8, 0], sizes = [1, 64], strides = [1, 1]} : vector<9x64xf32> to vector<1x64xf32>
    %863 = vector.broadcast %862 : vector<1x64xf32> to vector<16x64xf32>
    %864 = arith.mulf %810, %863 : vector<16x64xf32>
    %865 = arith.addf %861, %864 : vector<16x64xf32>
    %866 = arith.truncf %865 : vector<16x64xf32> to vector<16x64xbf16>
    %c0_113 = arith.constant 0 : index
    %c0_114 = arith.constant 0 : index
    %867 = vector.load %arg10[%c0_113, %c0_114] : memref<65x32xf32, #tpu.memory_space<vmem>>, vector<64x32xf32>
    %868 = arith.truncf %867 : vector<64x32xf32> to vector<64x32xbf16>
    %cst_115 = arith.constant dense<0.000000e+00> : vector<16x32xf32>
    %869 = tpu.matmul %866, %868, %cst_115 {dimension_numbers = #tpu.dot_dimension_numbers<[1], [0], [0], [1], [0, 0, 1, 1], [], []>} : vector<16x64xbf16>, vector<64x32xbf16>, vector<16x32xf32> -> vector<16x32xf32>
    %c64_116 = arith.constant 64 : index
    %c0_117 = arith.constant 0 : index
    %870 = vector.load %arg10[%c64_116, %c0_117] : memref<65x32xf32, #tpu.memory_space<vmem>>, vector<1x32xf32>
    %871 = vector.broadcast %870 : vector<1x32xf32> to vector<16x32xf32>
    %872 = arith.addf %869, %871 : vector<16x32xf32>
    %cst_118 = arith.constant 0.000000e+00 : f32
    %873 = vector.broadcast %cst_118 : f32 to vector<16x32xf32>
    %874 = arith.maximumf %872, %873 : vector<16x32xf32>
    %875 = arith.truncf %874 : vector<16x32xf32> to vector<16x32xbf16>
    %c0_119 = arith.constant 0 : index
    %c0_120 = arith.constant 0 : index
    %876 = vector.load %arg11[%c0_119, %c0_120] : memref<33x16xf32, #tpu.memory_space<vmem>>, vector<32x16xf32>
    %877 = arith.truncf %876 : vector<32x16xf32> to vector<32x16xbf16>
    %cst_121 = arith.constant dense<0.000000e+00> : vector<16x16xf32>
    %878 = tpu.matmul %875, %877, %cst_121 {dimension_numbers = #tpu.dot_dimension_numbers<[1], [0], [0], [1], [0, 0, 1, 1], [], []>} : vector<16x32xbf16>, vector<32x16xbf16>, vector<16x16xf32> -> vector<16x16xf32>
    %c32_122 = arith.constant 32 : index
    %c0_123 = arith.constant 0 : index
    %879 = vector.load %arg11[%c32_122, %c0_123] : memref<33x16xf32, #tpu.memory_space<vmem>>, vector<1x16xf32>
    %880 = vector.broadcast %879 : vector<1x16xf32> to vector<16x16xf32>
    %881 = arith.addf %878, %880 : vector<16x16xf32>
    %cst_124 = arith.constant 0.000000e+00 : f32
    %882 = vector.broadcast %cst_124 : f32 to vector<16x16xf32>
    %883 = arith.maximumf %881, %882 : vector<16x16xf32>
    %c0_125 = arith.constant 0 : index
    %c0_126 = arith.constant 0 : index
    %884 = vector.load %arg12[%c0_125, %c0_126] : memref<1x17xf32, #tpu.memory_space<vmem>>, vector<1x17xf32>
    %885 = vector.extract_strided_slice %884 {offsets = [0, 0], sizes = [1, 16], strides = [1, 1]} : vector<1x17xf32> to vector<1x16xf32>
    %886 = vector.broadcast %885 : vector<1x16xf32> to vector<16x16xf32>
    %887 = arith.mulf %883, %886 : vector<16x16xf32>
    %cst_127 = arith.constant dense<0.000000e+00> : vector<16xf32>
    %888 = vector.multi_reduction <add>, %887, %cst_127 [1] : vector<16x16xf32> to vector<16xf32>
    %889 = vector.shape_cast %888 : vector<16xf32> to vector<16x1xf32>
    %890 = vector.extract_strided_slice %884 {offsets = [0, 16], sizes = [1, 1], strides = [1, 1]} : vector<1x17xf32> to vector<1x1xf32>
    %891 = vector.broadcast %890 : vector<1x1xf32> to vector<16x1xf32>
    %892 = arith.addf %889, %891 : vector<16x1xf32>
    %cst_128 = arith.constant 0.000000e+00 : f32
    %893 = vector.broadcast %cst_128 : f32 to vector<16x1xf32>
    %894 = arith.maximumf %892, %893 : vector<16x1xf32>
    %895 = math.absf %894 : vector<16x1xf32>
    %c0_129 = arith.constant 0 : index
    %c0_130 = arith.constant 0 : index
    %c0_131 = arith.constant 0 : index
    %c0_132 = arith.constant 0 : index
    %896 = vector.load %arg15[%c0_129, %c0_130, %c0_131, %c0_132] : memref<1x1x16x1xf32, #tpu.memory_space<vmem>>, vector<1x1x16x1xf32>
    %897 = vector.shape_cast %896 : vector<1x1x16x1xf32> to vector<16x1xf32>
    %898 = vector.shape_cast %895 : vector<16x1xf32> to vector<1x1x16x1xf32>
    tpu.vector_store %arg15[%c0_129, %c0_130, %c0_131, %c0_132], %898 {strides = array<i32>} : memref<1x1x16x1xf32, #tpu.memory_space<vmem>>, vector<1x1x16x1xf32>,
    %899 = vector.extract_strided_slice %34 {offsets = [8, 0], sizes = [8, 32], strides = [1, 1]} : vector<16x32xf32> to vector<8x32xf32>
    %c0_133 = arith.constant 0 : index
    %c0_134 = arith.constant 0 : index
    %c0_135 = arith.constant 0 : index
    %900 = vector.load %arg16[%c0_133, %c0_134, %c0_135] : memref<8x8x32xf32, #tpu.memory_space<vmem>>, vector<1x8x32xf32>
    %901 = vector.shape_cast %900 : vector<1x8x32xf32> to vector<8x32xf32>
    %902 = vector.shape_cast %899 : vector<8x32xf32> to vector<1x8x32xf32>
    tpu.vector_store %arg16[%c0_133, %c0_134, %c0_135], %902 {strides = array<i32>} : memref<8x8x32xf32, #tpu.memory_space<vmem>>, vector<1x8x32xf32>,
    %903 = vector.extract_strided_slice %45 {offsets = [8, 0], sizes = [8, 32], strides = [1, 1]} : vector<16x32xf32> to vector<8x32xf32>
    %c1_136 = arith.constant 1 : index
    %c0_137 = arith.constant 0 : index
    %c0_138 = arith.constant 0 : index
    %904 = vector.load %arg16[%c1_136, %c0_137, %c0_138] : memref<8x8x32xf32, #tpu.memory_space<vmem>>, vector<1x8x32xf32>
    %905 = vector.shape_cast %904 : vector<1x8x32xf32> to vector<8x32xf32>
    %906 = vector.shape_cast %903 : vector<8x32xf32> to vector<1x8x32xf32>
    tpu.vector_store %arg16[%c1_136, %c0_137, %c0_138], %906 {strides = array<i32>} : memref<8x8x32xf32, #tpu.memory_space<vmem>>, vector<1x8x32xf32>,
    %907 = vector.extract_strided_slice %83 {offsets = [8, 0], sizes = [8, 32], strides = [1, 1]} : vector<16x32xf32> to vector<8x32xf32>
    %c2_139 = arith.constant 2 : index
    %c0_140 = arith.constant 0 : index
    %c0_141 = arith.constant 0 : index
    %908 = vector.load %arg16[%c2_139, %c0_140, %c0_141] : memref<8x8x32xf32, #tpu.memory_space<vmem>>, vector<1x8x32xf32>
    %909 = vector.shape_cast %908 : vector<1x8x32xf32> to vector<8x32xf32>
    %910 = vector.shape_cast %907 : vector<8x32xf32> to vector<1x8x32xf32>
    tpu.vector_store %arg16[%c2_139, %c0_140, %c0_141], %910 {strides = array<i32>} : memref<8x8x32xf32, #tpu.memory_space<vmem>>, vector<1x8x32xf32>,
    %911 = vector.extract_strided_slice %95 {offsets = [8, 0], sizes = [8, 32], strides = [1, 1]} : vector<16x32xf32> to vector<8x32xf32>
    %c3_142 = arith.constant 3 : index
    %c0_143 = arith.constant 0 : index
    %c0_144 = arith.constant 0 : index
    %912 = vector.load %arg16[%c3_142, %c0_143, %c0_144] : memref<8x8x32xf32, #tpu.memory_space<vmem>>, vector<1x8x32xf32>
    %913 = vector.shape_cast %912 : vector<1x8x32xf32> to vector<8x32xf32>
    %914 = vector.shape_cast %911 : vector<8x32xf32> to vector<1x8x32xf32>
    tpu.vector_store %arg16[%c3_142, %c0_143, %c0_144], %914 {strides = array<i32>} : memref<8x8x32xf32, #tpu.memory_space<vmem>>, vector<1x8x32xf32>,
    %915 = vector.extract_strided_slice %140 {offsets = [8, 0], sizes = [8, 32], strides = [1, 1]} : vector<16x32xf32> to vector<8x32xf32>
    %c4_145 = arith.constant 4 : index
    %c0_146 = arith.constant 0 : index
    %c0_147 = arith.constant 0 : index
    %916 = vector.load %arg16[%c4_145, %c0_146, %c0_147] : memref<8x8x32xf32, #tpu.memory_space<vmem>>, vector<1x8x32xf32>
    %917 = vector.shape_cast %916 : vector<1x8x32xf32> to vector<8x32xf32>
    %918 = vector.shape_cast %915 : vector<8x32xf32> to vector<1x8x32xf32>
    tpu.vector_store %arg16[%c4_145, %c0_146, %c0_147], %918 {strides = array<i32>} : memref<8x8x32xf32, #tpu.memory_space<vmem>>, vector<1x8x32xf32>,
    %919 = vector.extract_strided_slice %142 {offsets = [8, 0], sizes = [8, 32], strides = [1, 1]} : vector<16x32xf32> to vector<8x32xf32>
    %c5_148 = arith.constant 5 : index
    %c0_149 = arith.constant 0 : index
    %c0_150 = arith.constant 0 : index
    %920 = vector.load %arg16[%c5_148, %c0_149, %c0_150] : memref<8x8x32xf32, #tpu.memory_space<vmem>>, vector<1x8x32xf32>
    %921 = vector.shape_cast %920 : vector<1x8x32xf32> to vector<8x32xf32>
    %922 = vector.shape_cast %919 : vector<8x32xf32> to vector<1x8x32xf32>
    tpu.vector_store %arg16[%c5_148, %c0_149, %c0_150], %922 {strides = array<i32>} : memref<8x8x32xf32, #tpu.memory_space<vmem>>, vector<1x8x32xf32>,
    %923 = vector.extract_strided_slice %144 {offsets = [8, 0], sizes = [8, 32], strides = [1, 1]} : vector<16x32xf32> to vector<8x32xf32>
    %c6_151 = arith.constant 6 : index
    %c0_152 = arith.constant 0 : index
    %c0_153 = arith.constant 0 : index
    %924 = vector.load %arg16[%c6_151, %c0_152, %c0_153] : memref<8x8x32xf32, #tpu.memory_space<vmem>>, vector<1x8x32xf32>
    %925 = vector.shape_cast %924 : vector<1x8x32xf32> to vector<8x32xf32>
    %926 = vector.shape_cast %923 : vector<8x32xf32> to vector<1x8x32xf32>
    tpu.vector_store %arg16[%c6_151, %c0_152, %c0_153], %926 {strides = array<i32>} : memref<8x8x32xf32, #tpu.memory_space<vmem>>, vector<1x8x32xf32>,
    %927 = vector.extract_strided_slice %146 {offsets = [8, 0], sizes = [8, 32], strides = [1, 1]} : vector<16x32xf32> to vector<8x32xf32>
    %c7_154 = arith.constant 7 : index
    %c0_155 = arith.constant 0 : index
    %c0_156 = arith.constant 0 : index
    %928 = vector.load %arg16[%c7_154, %c0_155, %c0_156] : memref<8x8x32xf32, #tpu.memory_space<vmem>>, vector<1x8x32xf32>
    %929 = vector.shape_cast %928 : vector<1x8x32xf32> to vector<8x32xf32>
    %930 = vector.shape_cast %927 : vector<8x32xf32> to vector<1x8x32xf32>
    tpu.vector_store %arg16[%c7_154, %c0_155, %c0_156], %930 {strides = array<i32>} : memref<8x8x32xf32, #tpu.memory_space<vmem>>, vector<1x8x32xf32>,
    %931 = vector.extract_strided_slice %669 {offsets = [8, 0], sizes = [8, 64], strides = [1, 1]} : vector<16x64xf32> to vector<8x64xf32>
    %c0_157 = arith.constant 0 : index
    %c0_158 = arith.constant 0 : index
    %c0_159 = arith.constant 0 : index
    %932 = vector.load %arg17[%c0_157, %c0_158, %c0_159] : memref<2x8x64xf32, #tpu.memory_space<vmem>>, vector<1x8x64xf32>
    %933 = vector.shape_cast %932 : vector<1x8x64xf32> to vector<8x64xf32>
    %934 = vector.shape_cast %931 : vector<8x64xf32> to vector<1x8x64xf32>
    tpu.vector_store %arg17[%c0_157, %c0_158, %c0_159], %934 {strides = array<i32>} : memref<2x8x64xf32, #tpu.memory_space<vmem>>, vector<1x8x64xf32>,
    %935 = vector.extract_strided_slice %810 {offsets = [8, 0], sizes = [8, 64], strides = [1, 1]} : vector<16x64xf32> to vector<8x64xf32>
    %c1_160 = arith.constant 1 : index
    %c0_161 = arith.constant 0 : index
    %c0_162 = arith.constant 0 : index
    %936 = vector.load %arg17[%c1_160, %c0_161, %c0_162] : memref<2x8x64xf32, #tpu.memory_space<vmem>>, vector<1x8x64xf32>
    %937 = vector.shape_cast %936 : vector<1x8x64xf32> to vector<8x64xf32>
    %938 = vector.shape_cast %935 : vector<8x64xf32> to vector<1x8x64xf32>
    tpu.vector_store %arg17[%c1_160, %c0_161, %c0_162], %938 {strides = array<i32>} : memref<2x8x64xf32, #tpu.memory_space<vmem>>, vector<1x8x64xf32>,
    return
  }
  func.func @transform_0(%arg0: i32, %arg1: i32) -> (i32, i32, i32, i32) {
    %c0_i32 = arith.constant 0 : i32
    %c0_i32_0 = arith.constant 0 : i32
    %c0_i32_1 = arith.constant 0 : i32
    return %arg0, %arg1, %c0_i32, %c0_i32_0 : i32, i32, i32, i32
  }
  func.func @transform_1(%arg0: i32, %arg1: i32) -> (i32, i32, i32, i32) {
    %c0_i32 = arith.constant 0 : i32
    %c0_i32_0 = arith.constant 0 : i32
    %c0_i32_1 = arith.constant 0 : i32
    return %arg0, %arg1, %c0_i32, %c0_i32_0 : i32, i32, i32, i32
  }
  func.func @transform_2(%arg0: i32, %arg1: i32) -> (i32, i32, i32, i32) {
    %c0_i32 = arith.constant 0 : i32
    %c0_i32_0 = arith.constant 0 : i32
    %c0_i32_1 = arith.constant 0 : i32
    return %arg0, %arg1, %c0_i32, %c0_i32_0 : i32, i32, i32, i32
  }
  func.func @transform_3(%arg0: i32, %arg1: i32) -> (i32, i32) {
    %c0_i32 = arith.constant 0 : i32
    %c0_i32_0 = arith.constant 0 : i32
    %c0_i32_1 = arith.constant 0 : i32
    return %c0_i32, %c0_i32_0 : i32, i32
  }
  func.func @transform_4(%arg0: i32, %arg1: i32) -> (i32, i32) {
    %c0_i32 = arith.constant 0 : i32
    %c0_i32_0 = arith.constant 0 : i32
    %c0_i32_1 = arith.constant 0 : i32
    return %c0_i32, %c0_i32_0 : i32, i32
  }
  func.func @transform_5(%arg0: i32, %arg1: i32) -> (i32, i32) {
    %c0_i32 = arith.constant 0 : i32
    %c0_i32_0 = arith.constant 0 : i32
    %c0_i32_1 = arith.constant 0 : i32
    return %c0_i32, %c0_i32_0 : i32, i32
  }
  func.func @transform_6(%arg0: i32, %arg1: i32) -> (i32, i32) {
    %c0_i32 = arith.constant 0 : i32
    %c0_i32_0 = arith.constant 0 : i32
    %c0_i32_1 = arith.constant 0 : i32
    return %c0_i32, %c0_i32_0 : i32, i32
  }
  func.func @transform_7(%arg0: i32, %arg1: i32) -> (i32, i32) {
    %c0_i32 = arith.constant 0 : i32
    %c0_i32_0 = arith.constant 0 : i32
    %c0_i32_1 = arith.constant 0 : i32
    return %c0_i32, %c0_i32_0 : i32, i32
  }
  func.func @transform_8(%arg0: i32, %arg1: i32) -> (i32, i32) {
    %c0_i32 = arith.constant 0 : i32
    %c0_i32_0 = arith.constant 0 : i32
    %c0_i32_1 = arith.constant 0 : i32
    return %c0_i32, %c0_i32_0 : i32, i32
  }
  func.func @transform_9(%arg0: i32, %arg1: i32) -> (i32, i32) {
    %c0_i32 = arith.constant 0 : i32
    %c0_i32_0 = arith.constant 0 : i32
    %c0_i32_1 = arith.constant 0 : i32
    return %c0_i32, %c0_i32_0 : i32, i32
  }
  func.func @transform_10(%arg0: i32, %arg1: i32) -> (i32, i32) {
    %c0_i32 = arith.constant 0 : i32
    %c0_i32_0 = arith.constant 0 : i32
    %c0_i32_1 = arith.constant 0 : i32
    return %c0_i32, %c0_i32_0 : i32, i32
  }
  func.func @transform_11(%arg0: i32, %arg1: i32) -> (i32, i32, i32) {
    %c0_i32 = arith.constant 0 : i32
    %c0_i32_0 = arith.constant 0 : i32
    %c0_i32_1 = arith.constant 0 : i32
    %c0_i32_2 = arith.constant 0 : i32
    return %c0_i32, %c0_i32_0, %c0_i32_1 : i32, i32, i32
  }
  func.func @transform_12(%arg0: i32, %arg1: i32) -> (i32, i32) {
    %c0_i32 = arith.constant 0 : i32
    %c0_i32_0 = arith.constant 0 : i32
    %c0_i32_1 = arith.constant 0 : i32
    return %c0_i32, %c0_i32_0 : i32, i32
  }
  func.func @transform_13(%arg0: i32, %arg1: i32) -> (i32, i32, i32, i32) {
    %c0_i32 = arith.constant 0 : i32
    %c0_i32_0 = arith.constant 0 : i32
    %c0_i32_1 = arith.constant 0 : i32
    return %arg0, %arg1, %c0_i32, %c0_i32_0 : i32, i32, i32, i32
  }
}

</mosaic_0001>

<bundles_post_ra>
// kernel: fdm_pallas.1
= control target key start
LH: loop header
LB: loop body
LE: loop exit
PB: predicated region body
PF: predicated region fallthrough
CT: control target
= control target key end

     0   :  { %s2539_s25 = smov 0   ;;  %s2541_s26 = smov 0   ;;  %s3563_s0 = inlined_call_operand.vmem [shape: bf16[2,4,32,64], index: 0, kind: input, shape index: {}]   ;;  %s3564_s1 = inlined_call_operand.vmem [shape: bf16[2,4,64,32], index: 1, kind: input, shape index: {}]   ;;  %s3565_s2 = inlined_call_operand.vmem [shape: bf16[2,4,256,64], index: 2, kind: input, shape index: {}]   ;;  %s3566_s3 = inlined_call_operand.vmem [shape: f32[16,1], index: 3, kind: input, shape index: {}]   ;;  %s3567_s4 = inlined_call_operand.vmem [shape: f32[65,32], index: 4, kind: input, shape index: {}]   ;;  %s3568_s5 = inlined_call_operand.vmem [shape: f32[65,32], index: 5, kind: input, shape index: {}]   ;;  %s3569_s6 = inlined_call_operand.vmem [shape: f32[33,32], index: 6, kind: input, shape index: {}]   ;;  %s3570_s7 = inlined_call_operand.vmem [shape: f32[129,64], index: 7, kind: input, shape index: {}]   ;;  %s3571_s8 = inlined_call_operand.vmem [shape: f32[65,32], index: 8, kind: input, shape index: {}]   ;;  %s3572_s9 = inlined_call_operand.vmem [shape: f32[33,16], index: 9, kind: input, shape index: {}]   ;;  %s3573_s10 = inlined_call_operand.vmem [shape: f32[1,17], index: 10, kind: input, shape index: {}]   ;;  %s3574_s11 = inlined_call_operand.vmem [shape: f32[4,9,32], index: 11, kind: input, shape index: {}]   ;;  %s3575_s12 = inlined_call_operand.vmem [shape: f32[9,64], index: 12, kind: input, shape index: {}]   ;;  %s3576_s13 = inlined_call_operand.vmem [shape: f32[2,4,16,1], index: 13, kind: output, shape index: {}]  }
   0x1   :  { %3606 = sst [smem:[#allocation28_spill]] %s3568_s5  ;;  %s2543_s27 = smov 0  }
   0x2   :  { %3607 = sst [smem:[#allocation29_spill]] %s3570_s7  ;;  %s2545_s28 = smov 0  }
   0x3   :  { %3608 = sst [smem:[#allocation30_spill]] %s3571_s8  ;;  %s2547_s29 = smov 0  }
   0x4   :  { %3609 = sst [smem:[#allocation31_spill]] %s3572_s9 }
   0x5   :  { %3610 = sst [smem:[#allocation32_spill]] %s3573_s10 }
   0x6   :  { %3611 = sst [smem:[#allocation33_spill]] %s3575_s12 }
   0x7 LB: > { %3612 = sst [smem:[#allocation4_spill]] %s2453_s27  ;;  %s32_s30 = sadd.s32 1, %s2453_s27  ;;  %s2461_s29 = sphi %s2547_s29, %s23_s29   ;;  %s2457_s28 = sphi %s2545_s28, %s3673_s28   ;;  %s2453_s27 = sphi %s2543_s27, %s3672_s27   ;;  %s2449_s26 = sphi %s2541_s26, %s3671_s26   ;;  %s2445_s25 = sphi %s2539_s25, %s3670_s25  }
   0x8   : > { %3613 = sst [smem:[#allocation5_spill]] %s2457_s28  ;;  %s35_s14 = sadd.s32 1, %s2457_s28 }
   0x9   : > { %3614 = sst [smem:[#allocation6_spill]] %s2461_s29  ;;  %p33_p0 = scmp.ge.s32.totalorder %s32_s30, 4 }
   0xa   : > { %p2146_p1 = scmp.ge.s32.totalorder %s2461_s29, 1  ;;  %p439_p2 = scmp.lt.s32.totalorder %s2461_s29, 9 }
   0xb   : > { %s3675_s30 = smov (%p33_p0, %s32_s30), 0  ;;  %s3677_s14 = smov (!%p33_p0, %s35_s14), %s2457_s28 }
   0xc   : > { %3615 = sst [smem:[#allocation7_spill]] %s3675_s30  ;;  %p440_p3 = pnand %p2146_p1, %p439_p2 }
   0xd   : > { %p37_p4 = scmp.ge.s32.totalorder %s3677_s14, 2 }
   0xe   : > { %443 = sbr.rel (%p440_p3) target bundleno = 1578 (0x62a), region = 72 }
   0xf   : > { %s3679_s14 = smov (%p37_p4, %s3677_s14), 0 }
  0x10   : > { %3616 = sst [smem:[#allocation8_spill]] %s3679_s14 }
  0x13   : > { %p509_p5 = scmp.lt.s32.totalorder %s2449_s26, 1  ;;  %p511_p6 = scmp.lt.s32.totalorder %s2445_s25, 3 }
  0x14   : > { %p2159_p7 = scmp.ne.s32.totalorder %s2445_s25, 0 }
  0x15   : > { %s3681_s26 = smov (!%p509_p5, %s2449_s26), 1 }
  0x16   : > { %s512_s15 = scalar_select %p511_p6, %s2445_s25, 3 }
  0x17   : > { %s2148_s16 = sshll.u32 %s3681_s26, 4  ;;  %s2151_s17 = sshll.u32 %s3681_s26, 5 }
  0x18   : > { %s2147_s18 = sshll.u32 %s512_s15, 2  ;;  %s2150_s19 = sshll.u32 %s512_s15, 3 }
  0x19   : > { %s515_s20 = sadd.s32 %s2148_s16, %s2147_s18  ;;  %s524_s21 = sadd.s32 %s2151_s17, %s2150_s19 }
  0x1a   : > { %s2149_s22 = sshll.u32 %s515_s20, 2  ;;  %s2152_s23 = sshll.u32 %s524_s21, 2 }
  0x1b   : > { %s2576_s28 = scalar_lea.vmem %s3563_s0, %s2149_s22  ;;  %s2581_s29 = scalar_lea.vmem %s3564_s1, %s2152_s23 }
  0x1c   : > { %s2153_s10 = sshll.u32 %s512_s15, 5  ;;  %s2154_s9 = sshll.u32 %s3681_s26, 7 }
  0x1d   : > { %s533_s8 = sadd.s32 %s2154_s9, %s2153_s10  ;;  %s2156_s12 = sshll.u32 %s512_s15, 1 }
  0x1e   : > { %s2155_s7 = sshll.u32 %s533_s8, 2  ;;  %s2157_s5 = sshll.u32 %s3681_s26, 3 }
  0x1f   : > { %s2586_s18 = scalar_lea.vmem %s3565_s2, %s2155_s7  ;;  %s542_s19 = sadd.s32 %s2157_s5, %s2156_s12 }
  0x20   : > { %s2158_s30 = sshll.u32 %s542_s19, 3  ;;  %549 = sbr.rel (%p2159_p7) target bundleno = 48 (0x30), region = 76 }
  0x21   : > { %s2591_s22 = scalar_lea.vmem %s3576_s13, %s2158_s30 }
  0x25   : > { %vm550_vm0 = vcmask 261120   ;;  %v2463_v0 = vmov 0.0   ;;  %vm559_vm1 = vcmask 523264  }
  0x26   : > { %551 = vst.msk [vmem:[#allocation2] sm:$0xff] %vm550_vm0, %v2463_v0 }
  0x27   : > { %552 = vst.msk [vmem:[#allocation2 + $0x8] sm:$0xff] %vm550_vm0, %v2463_v0 }
  0x28   : > { %553 = vst.msk [vmem:[#allocation2 + $0x10] sm:$0xff] %vm550_vm0, %v2463_v0 }
  0x29   : > { %554 = vst.msk [vmem:[#allocation2 + $0x18] sm:$0xff] %vm550_vm0, %v2463_v0 }
  0x2a   : > { %555 = vst.msk [vmem:[#allocation2 + $0x20] sm:$0xff] %vm550_vm0, %v2463_v0 }
  0x2b   : > { %556 = vst.msk [vmem:[#allocation2 + $0x28] sm:$0xff] %vm550_vm0, %v2463_v0 }
  0x2c   : > { %557 = vst.msk [vmem:[#allocation2 + $0x30] sm:$0xff] %vm550_vm0, %v2463_v0 }
  0x2d   : > { %558 = vst.msk [vmem:[#allocation2 + $0x38] sm:$0xff] %vm550_vm0, %v2463_v0 }
  0x2e   : > { %560 = vst.msk [vmem:[#allocation3] sm:$0xff] %vm559_vm1, %v2463_v0 }
  0x2f   : > { %561 = vst.msk [vmem:[#allocation3 + $0x8] sm:$0xff] %vm559_vm1, %v2463_v0 }
  0x30 PF: > { %v592_v1 = vld [vmem:[%s3567_s4 + $0x30] sm:$0xff]  ;;  %v593_v2 = vld [vmem:[%s3567_s4 + $0x38] sm:$0xff]  ;;  %v590_v3 = vld [vmem:[%s3567_s4 + $0x20] sm:$0xff]  ;;  %v2464_v6 = vmov 0   ;;  %vm610_vm2 = vcmask 523264   ;;  %vm1197_vm3 = vcmask 1040384  }
  0x31   : > { %v597_v4 = vpack.c.bf16 %v593_v2, %v592_v1  ;;  %v591_v5 = vld [vmem:[%s3567_s4 + $0x28] sm:$0xff]  ;;  %2351 = vset.pattern.permute.xlu0 %v2464_v6  ;;  %v588_v8 = vld [vmem:[%s3567_s4 + $0x10] sm:$0xff]  ;;  %v562_v9 = vld [vmem:[%s3566_s3] sm:$0xff]  ;;  %vm649_vm4 = vcmask 261120   ;;  %s2465_s7 = smov 32   ;;  %s3631_s10 = sld [smem:[#allocation28_spill]] }
  0x32   : > { %v596_v7 = vpack.c.bf16 %v591_v5, %v590_v3  ;;  %v643_v10 = vld [vmem:[%s3569_s6 + $0x10] sm:$0xff]  ;;  %v589_v11 = vld [vmem:[%s3567_s4 + $0x18] sm:$0xff]  ;;  %1202 = vperm.xlu0 %2351, %v562_v9   ;;  %v641_v13 = vld [vmem:[%s3569_s6] sm:$0xff]  ;;  %s2467_s15 = smov 96   ;;  %vm1411_vm5 = vcmask 785408   ;;  %s3665_s17 = sld [smem:[#allocation33_spill]] }
  0x33   : > { %621 = vmatpush.bf16.msra.mxu0 %v597_v4  ;;  %v644_v12 = vld [vmem:[%s3569_s6 + $0x18] sm:$0xff]  ;;  %v642_v15 = vld [vmem:[%s3569_s6 + $0x8] sm:$0xff]  ;;  %v595_v16 = vpack.c.bf16 %v589_v11, %v588_v8  ;;  %v586_v17 = vld [vmem:[%s3567_s4] sm:$0xff]  ;;  %s3666_s20 = sld [smem:[#allocation30_spill]]  ;;  %vm1971_vm6 = vcmask 130048   ;;  %vm1992_vm7 = vcmask 7168  }
  0x34   : > { %v646_v14 = vpack.c.bf16 %v644_v12, %v643_v10  ;;  %v587_v18 = vld [vmem:[%s3567_s4 + $0x8] sm:$0xff]  ;;  %v645_v20 = vpack.c.bf16 %v642_v15, %v641_v13  ;;  %v2260_v22 = vld [vmem:[%s2576_s28] sm:$0xff]  ;;  %s3668_s24 = sld [smem:[#allocation32_spill]] }
  0x35   : > { %v563_v19 = vld [vmem:[%s3566_s3 + $0x8] sm:$0xff]  ;;  %v594_v21 = vpack.c.bf16 %v587_v18, %v586_v17  ;;  %v1122_v24 = vld [vmem:[%s3574_s11] sm:$0xff] }
  0x36   : > { %681 = vmatpush.bf16.msra.mxu2 %v646_v14  ;;  %737 = vmatpush.bf16.msra.mxu1 %v646_v14  ;;  %v2261_v23 = vld [vmem:[%s2576_s28 + $0x8] sm:$0xff]  ;;  %v1156_v25 = vrot.slane %v1122_v24, 1  ;;  %v1432_v27 = vrot.slane %v1122_v24, 2  ;;  %v1167_v28 = vrot.slane %v1122_v24, 3  ;;  %v564_v31 = vld [vmem:[#allocation2] sm:$0xff]  ;;  %v1440_v33 = vrot.slane %v1122_v24, 4 }
  0x37   : > { %622 = vmatpush.bf16.msra.mxu0 %v596_v7  ;;  %785 = vmatpush.bf16.msra.mxu3 %v646_v14  ;;  %v1123_v30 = vld [vmem:[%s3574_s11 + $0x8] sm:$0x1]  ;;  %v1192_v35 = vrot.slane %v564_v31, 7  ;;  %v2653_v38 = vld [vmem:[%s3567_s4 + $0x40] ss:$0 sm:$0xff]  ;;  %v1212_v46 = vperm.slane %v1122_v24, 0 }
  0x38   : > { %v1158_v26 = vadd.f32 %v1156_v25, %v1122_v24  ;;  %v1446_v34 = vrot.slane %v1123_v30, 5  ;;  %v1180_v43 = vrot.slane %v1123_v30, 4  ;;  %v1169_v54 = vadd.f32 %v1167_v28, %v1122_v24  ;;  %s3640_s28 = sld [smem:[#allocation29_spill]] }
  0x39   : > { %v1198_v40 = vsel %vm1197_vm3, 0.0, %v1192_v35  ;;  %v2661_v57 = vrot.slane %v1122_v24, 6  ;;  %v1573_v2 = vrot.slane %v1123_v30, 7 }
  0x3a   : > { %682 = vmatpush.bf16.msra.mxu2 %v645_v20  ;;  %1207 = vperm.xlu0 %2351, %v563_v19   ;;  %v1434_v29 = vadd.f32 %v1432_v27, %v1158_v26  ;;  %v1176_v41 = vadd.f32 %v1167_v28, %v1158_v26  ;;  %v1254_v49 = vperm.slane %v1158_v26, 1  ;;  %v1286_v61 = vperm.slane %v1169_v54, 3 }
  0x3b   : > { %623 = vmatpush.bf16.msra.mxu0 %v595_v16  ;;  %738 = vmatpush.bf16.msra.mxu1 %v645_v20  ;;  %3619 = vst [vmem:[#allocation11_spill] sm:$0xff] %v2661_v57  ;;  %v2685_v17 = vadd.f32 %v2661_v57, %v1169_v54  ;;  %v1125_v54 = vld [vmem:[%s3574_s11 + $0x18] sm:$0x1] }
  0x3c   : > { %786 = vmatpush.bf16.msra.mxu3 %v645_v20  ;;  %v1438_v32 = vadd.f32 %v1434_v29, %v1167_v28  ;;  %v1452_v42 = vperm.slane %v1434_v29, 0  ;;  %v1563_v50 = vadd.f32 %v1440_v33, %v1176_v41  ;;  %v1182_v53 = vadd.f32 %v1180_v43, %v1176_v41 }
  0x3d   : > { %v1255_v56 = vmul.f32 %v1254_v49, %v564_v31  ;;  %3624 = vst [vmem:[#allocation16_spill] sm:$0xff] %v2685_v17  ;;  %v3586_v26 = vperm.slane %v2685_v17, 0 }
  0x3e   : > { %761 = vmatpush.bf16.msrb.mxu2 %v646_v14  ;;  %v2648_v37 = vadd.f32 %v1440_v33, %v1438_v32  ;;  %v1453_v52 = vmul.f32 %v1452_v42, %v564_v31  ;;  %v1571_v62 = vadd.f32 %v2661_v57, %v1563_v50  ;;  %v1333_v7 = vperm.slane %v1182_v53, 4  ;;  %s3641_s16 = smov %s3640_s28 }
  0x3f   : > { %624 = vmatpush.bf16.msra.mxu0 %v594_v21 }
  0x40   : > { %3617 = vst [vmem:[#allocation9_spill] sm:$0xff] %v2648_v37  ;;  %v1448_v39 = vadd.f32 %v1446_v34, %v2648_v37  ;;  %v2681_v13 = vadd.f32 %v1573_v2, %v1571_v62 }
  0x42   : > { %762 = vmatpush.bf16.msrb.mxu2 %v645_v20  ;;  %2168 = vmatmul.msk.bf16.vlgmr.msra.gmra.mxu0 %vm610_vm2, %v2260_v22  ;;  %v1474_v48 = vperm.slane %v1448_v39, 3  ;;  %3623 = vst [vmem:[#allocation15_spill] sm:$0xff] %v2681_v13  ;;  %v3585_v27 = vperm.slane %v2681_v13, 1 }
  0x43   : > { %659 = vmatpush.bf16.msrb.mxu0 %v646_v14 }
  0x47   : > { %660 = vmatpush.bf16.msrb.mxu0 %v645_v20 }
  0x4b   : > { %713 = vmatpush.bf16.msra.mxu0 %v646_v14 }
  0x4f   : > { %714 = vmatpush.bf16.msra.mxu0 %v645_v20 }
  0x52   : > { %2169 = vmatmul.msk.bf16.gmra.mxu0 %vm610_vm2, %v2261_v23 }
  0xa4   : > { %v2646_v36 = vpop.permute.xlu0 %1202 }
  0xa5   : > { %v1210_v45 = vmul.f32 %v2646_v36, %v1198_v40 }
  0xa7   : > { %v1213_v55 = vmul.f32 %v1212_v46, %v1210_v45 }
  0xa9   : > { %v1257_v5 = vadd.f32 %v1255_v56, %v1213_v55 }
  0xac   : > { %v2663_v58 = vpop.permute.xlu0 %1207 }
  0xbf   : > { %v626_v44 = vpop.f32.mrf.mxu0 }
  0xc0   : > { %v627_v47 = vadd.f32 %v2653_v38, %v626_v44 }
  0xc2   : > { %v2659_v51 = vmax.f32 %v627_v47, 0.0 }
  0xc4   : > { %3618 = vst [vmem:[#allocation10_spill] sm:$0xff] %v2659_v51  ;;  %v1475_v59 = vmul.f32 %v1474_v48, %v2659_v51  ;;  %v1195_v60 = vrot.slane %v2659_v51, 7  ;;  %v1256_v10 = vmul.f32 %v1254_v49, %v2659_v51  ;;  %v1334_v16 = vmul.f32 %v1333_v7, %v2659_v51 }
  0xc5   : > { %v1454_v19 = vmul.f32 %v1452_v42, %v2659_v51 }
  0xc6   : > { %v2668_v63 = vadd.f32 %v1475_v59, %v1453_v52  ;;  %v1199_v0 = vsel %vm1197_vm3, %v1192_v35, %v1195_v60  ;;  %v1283_v1 = vsel %vm1197_vm3, 0.0, %v1195_v60  ;;  %v2716_v35 = vld [vmem:[%s3574_s11 + $0x10] sm:$0xff] }
  0xc7   : > { %v628_v3 = vpop.f32.mrf.mxu0  ;;  %v1211_v4 = vmul.f32 %v2663_v58, %v1199_v0  ;;  %v2674_v6 = vmul.f32 %v1283_v1, %v2646_v36  ;;  %v1160_v39 = vrot.slane %v2716_v35, 1  ;;  %v1435_v41 = vrot.slane %v2716_v35, 2 }
  0xc8   : > { %3620 = vst [vmem:[#allocation12_spill] sm:$0xff] %v2668_v63  ;;  %v629_v8 = vadd.f32 %v2653_v38, %v628_v3  ;;  %v1170_v42 = vrot.slane %v2716_v35, 3  ;;  %v1443_v45 = vrot.slane %v2716_v35, 4  ;;  %v1717_v47 = vrot.slane %v2716_v35, 5 }
  0xc9   : > { %3621 = vst [vmem:[#allocation13_spill] sm:$0xff] %v2674_v6  ;;  %v1214_v9 = vmul.f32 %v1212_v46, %v1211_v4  ;;  %v1287_v11 = vmul.f32 %v1286_v61, %v2674_v6  ;;  %v2720_v40 = vadd.f32 %v1160_v39, %v2716_v35  ;;  %v1568_v53 = vrot.slane %v2716_v35, 6  ;;  %v566_v4 = vld [vmem:[#allocation2 + $0x8] sm:$0xff] }
  0xca   : > { %v2679_v12 = vmax.f32 %v629_v8, 0.0  ;;  %v1725_v56 = vrot.slane %v2716_v35, 7  ;;  %v2737_v1 = vadd.f32 %v1170_v42, %v2716_v35  ;;  %v1216_v8 = vrot.slane %v566_v4, 7 }
  0xcb   : > { %v1258_v14 = vadd.f32 %v1256_v10, %v1214_v9  ;;  %v1289_v15 = vadd.f32 %v1287_v11, %v1257_v5  ;;  %v2725_v43 = vadd.f32 %v1435_v41, %v2720_v40  ;;  %v1177_v49 = vadd.f32 %v1170_v42, %v2720_v40  ;;  %v2745_v5 = vld [vmem:[%s3569_s6 + $0x20] ss:$0 sm:$0xff] }
  0xcc   : > { %3622 = vst [vmem:[#allocation14_spill] sm:$0xff] %v2679_v12  ;;  %v640_v18 = vpack.c.bf16 %v2679_v12, %v2659_v51  ;;  %v1476_v20 = vmul.f32 %v1474_v48, %v2679_v12  ;;  %v1280_v21 = vrot.slane %v2679_v12, 7  ;;  %v1591_v30 = vmul.f32 %v3585_v27, %v2679_v12 }
  0xcd   : > { %1995 = vst.msk [vmem:[#allocation2] sm:$0xff] %vm649_vm4, %v2679_v12  ;;  %v2694_v22 = vadd.f32 %v1334_v16, %v1289_v15  ;;  %v1335_v32 = vmul.f32 %v1333_v7, %v2679_v12  ;;  %v1439_v44 = vadd.f32 %v2725_v43, %v1170_v42  ;;  %v1564_v50 = vadd.f32 %v1443_v45, %v1177_v49 }
  0xce   : > { %2170 = vmatmul.msk.bf16.vlgmr.msrb.gmra.mxu0 %vm649_vm4, %v640_v18  ;;  %v2697_v23 = vadd.f32 %v1476_v20, %v1454_v19  ;;  %v1281_v24 = vsel %vm1197_vm3, %v1195_v60, %v1280_v21  ;;  %v1576_v60 = vrot.slane %v1125_v54, 7  ;;  %v2740_v3 = vadd.f32 %v1568_v53, %v2737_v1 }
  0xcf   : > { %3625 = vst [vmem:[#allocation17_spill] sm:$0xff] %v2694_v22  ;;  %v1285_v25 = vmul.f32 %v1281_v24, %v2663_v58  ;;  %v1445_v46 = vadd.f32 %v1443_v45, %v1439_v44  ;;  %v631_v52 = vpop.f32.mrf.mxu0  ;;  %v1572_v59 = vadd.f32 %v1568_v53, %v1564_v50  ;;  %v1449_v11 = vrot.slane %v1125_v54, 5 }
  0xd0   : > { %3626 = vst [vmem:[#allocation18_spill] sm:$0xff] %v2697_v23  ;;  %v632_v7 = vadd.f32 %v2653_v38, %v631_v52  ;;  %v1221_v16 = vsel %vm1197_vm3, 0.0, %v1216_v8  ;;  %v1582_v39 = vperm.slane %v2740_v3, 0 }
  0xd1   : > { %v1288_v28 = vmul.f32 %v1286_v61, %v1285_v25  ;;  %v1581_v29 = vmul.f32 %v3586_v26, %v1285_v25  ;;  %v1719_v48 = vadd.f32 %v1717_v47, %v1445_v46  ;;  %v1578_v62 = vadd.f32 %v1576_v60, %v1572_v59 }
  0xd2   : > { %v1451_v21 = vadd.f32 %v1449_v11, %v1445_v46  ;;  %v1223_v24 = vmul.f32 %v1221_v16, %v2646_v36  ;;  %v1225_v25 = vperm.slane %v2716_v35, 0  ;;  %v1184_v47 = vrot.slane %v1125_v54, 4 }
  0xd3   : > { %v1290_v31 = vadd.f32 %v1288_v28, %v1258_v14  ;;  %v2709_v33 = vadd.f32 %v1591_v30, %v1581_v29  ;;  %v1721_v55 = vadd.f32 %v1719_v48, %v1568_v53  ;;  %v638_v14 = vmax.f32 %v632_v7, 0.0 }
  0xd4   : > { %v1594_v18 = vperm.slane %v1578_v62, 1  ;;  %v1455_v29 = vperm.slane %v2725_v43, 0  ;;  %v1479_v45 = vperm.slane %v1451_v21, 3  ;;  %v1298_v53 = vperm.slane %v2737_v1, 3 }
  0xd5   : > { %3627 = vst [vmem:[#allocation19_spill] sm:$0xff] %v2709_v33  ;;  %v2711_v34 = vadd.f32 %v1335_v32, %v1290_v31  ;;  %v1727_v61 = vadd.f32 %v1725_v56, %v1721_v55  ;;  %v1259_v32 = vperm.slane %v2720_v40, 1 }
  0xd6   : > { %v1456_v59 = vmul.f32 %v1455_v29, %v566_v4 }
  0xd7   : > { %3628 = vst [vmem:[#allocation20_spill] sm:$0xff] %v2711_v34  ;;  %v1729_v0 = vadd.f32 %v1727_v61, %v1125_v54  ;;  %v633_v2 = vpop.f32.mrf.mxu0  ;;  %v1260_v48 = vmul.f32 %v1259_v32, %v566_v4  ;;  %v1186_v61 = vadd.f32 %v1184_v47, %v1177_v49  ;;  %v831_v47 = vld [vmem:[%s3631_s10 + $0x20] sm:$0xff] }
  0xd8   : > { %v634_v28 = vadd.f32 %v2653_v38, %v633_v2  ;;  %v1226_v38 = vmul.f32 %v1225_v25, %v1223_v24 }
  0xd9   : > { %v1733_v19 = vperm.slane %v1729_v0, 0  ;;  %v1338_v16 = vperm.slane %v1186_v61, 4  ;;  %v1127_v61 = vld [vmem:[%s3574_s11 + $0x28] sm:$0x1] }
  0xda   : > { %v639_v50 = vmax.f32 %v634_v28, 0.0  ;;  %v1262_v62 = vadd.f32 %v1260_v48, %v1226_v38  ;;  %v832_v38 = vld [vmem:[%s3631_s10 + $0x28] sm:$0xff] }
  0xdb   : > { %v837_v48 = vpack.c.bf16 %v832_v38, %v831_v47 }
 0x14b   : > { %v662_v9 = vpop.f32.mrf.mxu0 }
 0x14c   : > { %v663_v10 = vadd.f32 %v2745_v5, %v662_v9 }
 0x14e   : > { %v667_v15 = vmax.f32 %v663_v10, 0.0 }
 0x150   : > { %v669_v20 = vadd.f32 %v667_v15, %v638_v14 }
 0x152   : > { %v1219_v30 = vrot.slane %v669_v20, 7  ;;  %v1595_v41 = vmul.f32 %v1594_v18, %v669_v20  ;;  %v2756_v42 = vmul.f32 %v1733_v19, %v669_v20  ;;  %v1480_v60 = vmul.f32 %v1479_v45, %v669_v20 }
 0x153   : > { %v664_v31 = vpop.f32.mrf.mxu0  ;;  %v1457_v54 = vmul.f32 %v1455_v29, %v669_v20  ;;  %v1261_v14 = vmul.f32 %v1259_v32, %v669_v20 }
 0x154   : > { %3629 = vst [vmem:[#allocation21_spill] sm:$0xff] %v2756_v42  ;;  %v665_v44 = vadd.f32 %v2745_v5, %v664_v31  ;;  %v1222_v46 = vsel %vm1197_vm3, %v1216_v8, %v1219_v30  ;;  %v1295_v35 = vsel %vm1197_vm3, 0.0, %v1219_v30  ;;  %v1482_v1 = vadd.f32 %v1480_v60, %v1456_v59 }
 0x155   : > { %v1296_v43 = vmul.f32 %v1295_v35, %v2646_v36  ;;  %v1224_v40 = vmul.f32 %v1222_v46, %v2663_v58  ;;  %v1339_v31 = vmul.f32 %v1338_v16, %v669_v20  ;;  %v834_v35 = vld [vmem:[%s3631_s10 + $0x38] sm:$0xff] }
 0x156   : > { %v668_v52 = vmax.f32 %v665_v44, 0.0 }
 0x157   : > { %v1583_v55 = vmul.f32 %v1582_v39, %v1296_v43  ;;  %v1227_v8 = vmul.f32 %v1225_v25, %v1224_v40  ;;  %v1299_v9 = vmul.f32 %v1298_v53, %v1296_v43  ;;  %v1126_v43 = vld [vmem:[%s3574_s11 + $0x20] sm:$0xff]  ;;  %v829_v40 = vld [vmem:[%s3631_s10 + $0x10] sm:$0xff] }
 0x158   : > { %v670_v56 = vadd.f32 %v668_v52, %v639_v50  ;;  %v2795_v50 = vld [vmem:[#allocation2 + $0x18] sm:$0xff]  ;;  %v1164_v52 = vrot.slane %v1126_v43, 1  ;;  %v1173_v60 = vrot.slane %v1126_v43, 3 }
 0x159   : > { %v2764_v0 = vadd.f32 %v1595_v41, %v1583_v55  ;;  %v1263_v28 = vadd.f32 %v1261_v14, %v1227_v8  ;;  %v1301_v29 = vadd.f32 %v1299_v9, %v1262_v62  ;;  %v1229_v55 = vrot.slane %v2795_v50, 7  ;;  %v827_v62 = vld [vmem:[%s3631_s10] sm:$0xff]  ;;  %v2294_v8 = vld [vmem:[%s2581_s29 + $0x8] sm:$0xff]   ;;  %v2295_v9 = vld [vmem:[%s2581_s29 + $0x10] sm:$0xff]  }
 0x15a   : > { %v671_v2 = vpack.c.bf16 %v670_v56, %v669_v20  ;;  %v1481_v3 = vmul.f32 %v1479_v45, %v670_v56  ;;  %1996 = vst.msk [vmem:[#allocation2 + $0x8] sm:$0xff] %vm649_vm4, %v670_v56  ;;  %v1292_v7 = vrot.slane %v670_v56, 7  ;;  %v1596_v10 = vmul.f32 %v1594_v18, %v670_v56 }
 0x15b   : > { %v2767_v11 = vmul.f32 %v1733_v19, %v670_v56  ;;  %v1340_v41 = vmul.f32 %v1338_v16, %v670_v56  ;;  %v1166_v59 = vadd.f32 %v1164_v52, %v1126_v43 }
 0x15c   : > { %2171 = vmatmul.msk.bf16.vlgmr.msra.gmra.mxu2 %vm649_vm4, %v671_v2  ;;  %v1483_v4 = vadd.f32 %v1481_v3, %v1457_v54  ;;  %v1293_v49 = vsel %vm1197_vm3, %v1219_v30, %v1292_v7  ;;  %v1341_v30 = vadd.f32 %v1339_v31, %v1301_v29  ;;  %v828_v2 = vld [vmem:[%s3631_s10 + $0x8] sm:$0xff]  ;;  %v2279_v54 = vld [vmem:[%s2581_s29] sm:$0xff]   ;;  %v1234_v3 = vsel %vm1197_vm3, 0.0, %v1229_v55 }
 0x15d   : > { %3630 = vst [vmem:[#allocation22_spill] sm:$0xff] %v2767_v11  ;;  %v1297_v15 = vmul.f32 %v1293_v49, %v2663_v58  ;;  %v835_v7 = vpack.c.bf16 %v828_v2, %v827_v62  ;;  %v2818_v49 = vperm.slane %v1126_v43, 0  ;;  %v2820_v14 = vperm.slane %v1166_v59, 1 }
 0x15e   : > { %v2352_v24 = vpack.i.bf16 %v1483_v4, %v1482_v1  ;;  %v1178_v1 = vadd.f32 %v1173_v60, %v1166_v59  ;;  %v1188_v4 = vrot.slane %v1127_v61, 4  ;;  %v2280_v16 = vunpack.c.l.bf16 %v2279_v54 }
 0x15f   : > { %v1300_v25 = vmul.f32 %v1298_v53, %v1297_v15  ;;  %v1584_v18 = vmul.f32 %v1582_v39, %v1297_v15  ;;  %v833_v39 = vld [vmem:[%s3631_s10 + $0x30] sm:$0xff]  ;;  %v830_v53 = vld [vmem:[%s3631_s10 + $0x18] sm:$0xff] }
 0x160   : > { %2353 = vrot.lane.b32.xlu2 %v2352_v24, %s2465_s7  ;;  %v838_v20 = vpack.c.bf16 %v834_v35, %v833_v39  ;;  %v836_v56 = vpack.c.bf16 %v830_v53, %v829_v40  ;;  %v568_v24 = vld [vmem:[#allocation2 + $0x10] sm:$0xff]  ;;  %v2281_v53 = vunpack.c.h.bf16 %v2279_v54 }
 0x161   : > { %v1302_v19 = vadd.f32 %v1300_v25, %v1263_v28  ;;  %v2775_v44 = vadd.f32 %v1596_v10, %v1584_v18  ;;  %v2296_v10 = vld [vmem:[%s2581_s29 + $0x18] sm:$0xff]   ;;  %v1175_v28 = vadd.f32 %v1173_v60, %v1126_v43  ;;  %v1236_v25 = vmul.f32 %v1234_v3, %v2646_v36  ;;  %s2466_s29 = smov 64  }
 0x162   : > { %973 = vmatpush.bf16.msrb.mxu1 %v838_v20  ;;  %2297 = vmatpush.bf16.msra.mxu2 %v838_v20  ;;  %v2284_v18 = vunpack.c.l.bf16 %v2294_v8  ;;  %v2292_v31 = vunpack.c.l.bf16 %v2296_v10  ;;  %v2289_v60 = vunpack.c.h.bf16 %v2295_v9  ;;  %v2293_v61 = vunpack.c.h.bf16 %v2296_v10 }
 0x163   : > { %v1342_v32 = vadd.f32 %v1340_v41, %v1302_v19  ;;  %2298 = vmatpush.bf16.msrb.mxu3 %v838_v20  ;;  %v2288_v19 = vunpack.c.l.bf16 %v2295_v9  ;;  %v1190_v41 = vadd.f32 %v1188_v4, %v1178_v1  ;;  %v2827_v39 = vperm.slane %v1175_v28, 3 }
 0x164   : > { %v1239_v35 = vmul.f32 %v2818_v49, %v1236_v25  ;;  %v1265_v20 = vmul.f32 %v2820_v14, %v568_v24 }
 0x165   : > { %v2357_v46 = vpack.i.bf16 %v1342_v32, %v1341_v30  ;;  %v1458_v32 = vmul.f32 %v2818_v49, %v568_v24  ;;  %v2839_v52 = vperm.slane %v1190_v41, 4 }
 0x166   : > { %974 = vmatpush.bf16.msrb.mxu1 %v837_v48  ;;  %2299 = vmatpush.bf16.msra.mxu2 %v837_v48  ;;  %v1267_v4 = vadd.f32 %v1265_v20, %v1239_v35 }
 0x167   : > { %2358 = vrot.lane.b32.xlu1 %v2357_v46, %s2465_s7  ;;  %2300 = vmatpush.bf16.msrb.mxu3 %v837_v48  ;;  %v1462_v46 = vmul.f32 %v2820_v14, %v2795_v50  ;;  %v2285_v50 = vunpack.c.h.bf16 %v2294_v8 }
 0x16a   : > { %975 = vmatpush.bf16.msrb.mxu1 %v836_v56  ;;  %2301 = vmatpush.bf16.msra.mxu2 %v836_v56 }
 0x16b   : > { %2302 = vmatpush.bf16.msrb.mxu3 %v836_v56  ;;  %v1464_v56 = vadd.f32 %v1462_v46, %v1458_v32 }
 0x16e   : > { %976 = vmatpush.bf16.msrb.mxu1 %v835_v7  ;;  %2303 = vmatpush.bf16.msra.mxu2 %v835_v7 }
 0x16f   : > { %2304 = vmatpush.bf16.msrb.mxu3 %v835_v7 }
 0x1df   : > { %v684_v15 = vpop.f32.mrf.mxu2 }
 0x1e0   : > { %v685_v29 = vadd.f32 %v2745_v5, %v684_v15 }
 0x1e2   : > { %v689_v30 = vmax.f32 %v685_v29, 0.0 }
 0x1e4   : > { %v2831_v47 = vadd.f32 %v2280_v16, %v689_v30  ;;  %v2833_v38 = vadd.f32 %v2284_v18, %v689_v30  ;;  %v2835_v48 = vadd.f32 %v2288_v19, %v689_v30  ;;  %v2837_v43 = vadd.f32 %v2292_v31, %v689_v30 }
 0x1e6   : > { %v1232_v40 = vrot.slane %v2837_v43, 7  ;;  %v1484_v62 = vmul.f32 %v2827_v39, %v2831_v47  ;;  %v1305_v2 = vrot.slane %v2833_v38, 7  ;;  %v1459_v7 = vmul.f32 %v2818_v49, %v2835_v48 }
 0x1e7   : > { %v686_v59 = vpop.f32.mrf.mxu2  ;;  %v1463_v54 = vmul.f32 %v2820_v14, %v2837_v43  ;;  %v1492_v16 = vmul.f32 %v2839_v52, %v2833_v38  ;;  %v1266_v24 = vmul.f32 %v2820_v14, %v2835_v48  ;;  %v1344_v29 = vmul.f32 %v2839_v52, %v2831_v47 }
 0x1e8   : > { %v687_v3 = vadd.f32 %v2745_v5, %v686_v59  ;;  %v1235_v1 = vsel %vm1197_vm3, %v1229_v55, %v1232_v40  ;;  %v1310_v9 = vsel %vm1197_vm3, 0.0, %v1305_v2  ;;  %v1615_v10 = vsel %vm1197_vm3, 0.0, %v1232_v40 }
 0x1e9   : > { %v1237_v8 = vmul.f32 %v1235_v1, %v2663_v58  ;;  %v1311_v28 = vmul.f32 %v1310_v9, %v2646_v36  ;;  %v1486_v55 = vadd.f32 %v1484_v62, %v1464_v56  ;;  %v1616_v18 = vmul.f32 %v1615_v10, %v2646_v36 }
 0x1ea   : > { %v690_v15 = vmax.f32 %v687_v3, 0.0  ;;  %v1465_v32 = vadd.f32 %v1463_v54, %v1459_v7  ;;  %v1599_v20 = vmul.f32 %v2820_v14, %v2831_v47 }
 0x1eb   : > { %v1240_v25 = vmul.f32 %v2818_v49, %v1237_v8  ;;  %v1314_v46 = vmul.f32 %v2827_v39, %v1311_v28  ;;  %v1585_v35 = vmul.f32 %v1311_v28, %v2818_v49  ;;  %v1618_v54 = vmul.f32 %v1616_v18, %v2827_v39 }
 0x1ec   : > { %v702_v19 = vadd.f32 %v2281_v53, %v690_v15  ;;  %v726_v31 = vadd.f32 %v2285_v50, %v690_v15  ;;  %v750_v41 = vadd.f32 %v2289_v60, %v690_v15  ;;  %v2863_v30 = vadd.f32 %v2293_v61, %v690_v15 }
 0x1ed   : > { %v1494_v61 = vadd.f32 %v1492_v16, %v1486_v55  ;;  %v1268_v7 = vadd.f32 %v1266_v24, %v1240_v25  ;;  %v1316_v15 = vadd.f32 %v1314_v46, %v1267_v4  ;;  %v1601_v28 = vadd.f32 %v1599_v20, %v1585_v35 }
 0x1ee   : > { %v1306_v56 = vrot.slane %v726_v31, 7  ;;  %v1612_v59 = vrot.slane %v2863_v30, 7  ;;  %v703_v62 = vpack.c.bf16 %v702_v19, %v2831_v47  ;;  %v727_v3 = vpack.c.bf16 %v726_v31, %v2833_v38  ;;  %1997 = vst.msk [vmem:[#allocation2 + $0x10] sm:$0xff] %vm649_vm4, %v750_v41 }
 0x1ef   : > { %v751_v53 = vpack.c.bf16 %v750_v41, %v2835_v48  ;;  %v775_v50 = vpack.c.bf16 %v2863_v30, %v2837_v43  ;;  %v1485_v60 = vmul.f32 %v2827_v39, %v702_v19  ;;  %1998 = vst.msk [vmem:[#allocation2 + $0x18] sm:$0xff] %vm649_vm4, %v2863_v30  ;;  %v1493_v9 = vmul.f32 %v2839_v52, %v726_v31 }
 0x1f0   : > { %2172 = vmatmul.msk.bf16.vlgmr.msra.gmra.mxu0 %vm649_vm4, %v703_v62  ;;  %2173 = vmatmul.msk.bf16.vlgmr.msra.gmra.mxu1 %vm649_vm4, %v727_v3  ;;  %v1307_v1 = vsel %vm1197_vm3, %v1305_v2, %v1306_v56  ;;  %v1600_v16 = vmul.f32 %v2820_v14, %v702_v19  ;;  %v1613_v55 = vsel %vm1197_vm3, %v1232_v40, %v1612_v59 }
 0x1f1   : > { %2174 = vmatmul.msk.bf16.vlgmr.msrb.gmra.mxu2 %vm649_vm4, %v751_v53  ;;  %2175 = vmatmul.msk.bf16.vlgmr.msra.gmra.mxu3 %vm649_vm4, %v775_v50  ;;  %v1487_v8 = vadd.f32 %v1485_v60, %v1465_v32  ;;  %v1312_v10 = vmul.f32 %v1307_v1, %v2663_v58  ;;  %v1617_v18 = vmul.f32 %v1613_v55, %v2663_v58  ;;  %v2263_v55 = vld [vmem:[%s2586_s18 + $0x8] sm:$0xff] }
 0x1f2   : > { %v1345_v56 = vmul.f32 %v2839_v52, %v702_v19  ;;  %v1620_v32 = vadd.f32 %v1618_v54, %v1601_v28  ;;  %v1737_v62 = vmul.f32 %v2818_v49, %v702_v19  ;;  %v1741_v3 = vmul.f32 %v2820_v14, %v726_v31 }
 0x1f3   : > { %v1495_v24 = vadd.f32 %v1493_v9, %v1487_v8  ;;  %v1315_v2 = vmul.f32 %v2827_v39, %v1312_v10  ;;  %v1586_v25 = vmul.f32 %v1312_v10, %v2818_v49  ;;  %v1619_v35 = vmul.f32 %v1617_v18, %v2827_v39  ;;  %v2262_v9 = vld [vmem:[%s2586_s18] sm:$0xff]  ;;  %v2272_v18 = vld [vmem:[%s2586_s18 + $0x50] sm:$0xff] }
 0x1f4   : > { %v1636_v40 = vmul.f32 %v2839_v52, %v2835_v48  ;;  %v1736_v20 = vmul.f32 %v2818_v49, %v2831_v47  ;;  %v1740_v59 = vmul.f32 %v2820_v14, %v2833_v38  ;;  %v1346_v19 = vadd.f32 %v1344_v29, %v1316_v15  ;;  %v2269_v14 = vld [vmem:[%s2586_s18 + $0x38] sm:$0xff] }
 0x1f5   : > { %v2362_v4 = vpack.i.bf16 %v1495_v24, %v1494_v61  ;;  %v1317_v46 = vadd.f32 %v1315_v2, %v1268_v7  ;;  %v1602_v53 = vadd.f32 %v1600_v16, %v1586_v25  ;;  %v1637_v60 = vmul.f32 %v2839_v52, %v750_v41  ;;  %v2273_v38 = vld [vmem:[%s2586_s18 + $0x58] sm:$0xff]  ;;  %v2274_v24 = vld [vmem:[%s2586_s18 + $0x60] sm:$0xff]  ;;  %v2264_v2 = vld [vmem:[%s2586_s18 + $0x10] sm:$0xff] }
 0x1f6   : > { %v1638_v7 = vadd.f32 %v1636_v40, %v1620_v32  ;;  %v1743_v54 = vadd.f32 %v1741_v3, %v1737_v62  ;;  %v1742_v49 = vadd.f32 %v1740_v59, %v1736_v20  ;;  %v1753_v47 = vmul.f32 %v2827_v39, %v750_v41  ;;  %v2265_v25 = vld [vmem:[%s2586_s18 + $0x18] sm:$0xff]  ;;  %v2266_v32 = vld [vmem:[%s2586_s18 + $0x20] sm:$0xff]  ;;  %v2267_v3 = vld [vmem:[%s2586_s18 + $0x28] sm:$0xff] }
 0x1f7   : > { %2363 = vrot.lane.b32.xlu0 %v2362_v4, %s2466_s29  ;;  %v1347_v31 = vadd.f32 %v1345_v56, %v1317_v46  ;;  %v1621_v50 = vadd.f32 %v1619_v35, %v1602_v53  ;;  %v1752_v29 = vmul.f32 %v2827_v39, %v2835_v48  ;;  %v1761_v16 = vmul.f32 %v2839_v52, %v2863_v30  ;;  %v2270_v30 = vld [vmem:[%s2586_s18 + $0x40] sm:$0xff]  ;;  %v2276_v56 = vld [vmem:[%s2586_s18 + $0x70] sm:$0xff]  ;;  %v2277_v62 = vld [vmem:[%s2586_s18 + $0x78] sm:$0xff] }
 0x1f8   : > { %v1755_v10 = vadd.f32 %v1753_v47, %v1743_v54  ;;  %v1760_v41 = vmul.f32 %v2839_v52, %v2837_v43  ;;  %v2271_v43 = vld [vmem:[%s2586_s18 + $0x48] sm:$0xff]  ;;  %v2268_v4 = vld [vmem:[%s2586_s18 + $0x30] sm:$0xff] }
 0x1f9   : > { %v2367_v61 = vpack.i.bf16 %v1347_v31, %v1346_v19  ;;  %v1639_v1 = vadd.f32 %v1637_v60, %v1621_v50  ;;  %v1754_v15 = vadd.f32 %v1752_v29, %v1742_v49  ;;  %v2275_v52 = vld [vmem:[%s2586_s18 + $0x68] sm:$0xff]  ;;  %v2950_v50 = vld [vmem:[%s3631_s10 + $0x40] ss:$0 sm:$0xff] }
 0x1fa   : > { %v1763_v28 = vadd.f32 %v1761_v16, %v1755_v10 }
 0x1fb   : > { %2368 = vrot.lane.b32.xlu1 %v2367_v61, %s2466_s29  ;;  %v2382_v8 = vpack.i.bf16 %v1639_v1, %v1638_v7  ;;  %v1762_v39 = vadd.f32 %v1760_v41, %v1754_v15 }
 0x1fd   : > { %v2402_v48 = vpack.i.bf16 %v1763_v28, %v1762_v39 }
 0x1ff   : > { %2383 = vrot.lane.b32.xlu0 %v2382_v8, %s2466_s29 }
 0x200   : > { %2240 = vmatmul.msk.bf16.vlgmr.msrb.gmra.mxu1 %vm610_vm2, %v2262_v9 }
 0x201   : > { %2247 = vmatmul.msk.bf16.vlgmr.msra.gmra.mxu2 %vm610_vm2, %v2269_v14  ;;  %2251 = vmatmul.msk.bf16.vlgmr.msrb.gmra.mxu3 %vm610_vm2, %v2273_v38 }
 0x207   : > { %2403 = vrot.lane.b32.xlu0 %v2402_v48, %s2466_s29 }
 0x210   : > { %2241 = vmatmul.msk.bf16.gmra.mxu1 %vm610_vm2, %v2263_v55 }
 0x211   : > { %2248 = vmatmul.msk.bf16.gmra.mxu2 %vm610_vm2, %v2270_v30  ;;  %2252 = vmatmul.msk.bf16.gmra.mxu3 %vm610_vm2, %v2274_v24 }
 0x220   : > { %2242 = vmatmul.msk.bf16.gmra.mxu1 %vm610_vm2, %v2264_v2 }
 0x221   : > { %2249 = vmatmul.msk.bf16.gmra.mxu2 %vm610_vm2, %v2271_v43  ;;  %2253 = vmatmul.msk.bf16.gmra.mxu3 %vm610_vm2, %v2275_v52 }
 0x230   : > { %2243 = vmatmul.msk.bf16.gmra.mxu1 %vm610_vm2, %v2265_v25 }
 0x231   : > { %2250 = vmatmul.msk.bf16.gmra.mxu2 %vm610_vm2, %v2272_v18  ;;  %2254 = vmatmul.msk.bf16.gmra.mxu3 %vm610_vm2, %v2276_v56  ;;  %v2984_v18 = vld [vmem:[%s3574_s11 + $0x30] sm:$0xff] }
 0x232   : > { %v3085_v33 = vperm.slane %v2984_v18, 6 }
 0x240   : > { %2244 = vmatmul.msk.bf16.gmra.mxu1 %vm610_vm2, %v2266_v32 }
 0x241   : > { %2255 = vmatmul.msk.bf16.gmra.mxu3 %vm610_vm2, %v2277_v62 }
 0x250   : > { %2245 = vmatmul.msk.bf16.gmra.mxu1 %vm610_vm2, %v2267_v3 }
 0x260   : > { %2246 = vmatmul.msk.bf16.gmra.mxu1 %vm610_vm2, %v2268_v4 }
 0x26d   : > { %v740_v46 = vpop.f32.mrf.mxu1  ;;  %v716_v25 = vpop.f32.mrf.mxu0 }
 0x26e   : > { %v741_v47 = vadd.f32 %v2745_v5, %v740_v46  ;;  %v2992_v46 = vperm.slane %v2984_v18, 0 }
 0x270   : > { %v2964_v16 = vmax.f32 %v741_v47, 0.0 }
 0x274   : > { %v2942_v53 = vpop.f32.mrf.mxu2  ;;  %v788_v35 = vpop.f32.mrf.mxu3 }
 0x275   : > { %v742_v40 = vpop.f32.mrf.mxu1  ;;  %v789_v31 = vadd.f32 %v2745_v5, %v788_v35  ;;  %v2995_v35 = vperm.slane %v2984_v18, 1 }
 0x276   : > { %v743_v14 = vadd.f32 %v2745_v5, %v742_v40 }
 0x277   : > { %v2955_v54 = vmax.f32 %v789_v31, 0.0  ;;  %v574_v31 = vld [vmem:[#allocation2 + $0x28] sm:$0xff] }
 0x278   : > { %v2968_v48 = vmax.f32 %v743_v14, 0.0  ;;  %v1460_v47 = vmul.f32 %v2992_v46, %v574_v31 }
 0x27c   : > { %v766_v20 = vpop.f32.mrf.mxu2  ;;  %v790_v59 = vpop.f32.mrf.mxu3 }
 0x27d   : > { %v2944_v19 = vpop.f32.mrf.mxu1  ;;  %v791_v38 = vadd.f32 %v2745_v5, %v790_v59 }
 0x27f   : > { %v2970_v55 = vmax.f32 %v791_v38, 0.0  ;;  %v3014_v38 = vld [vmem:[#allocation2 + $0x38] sm:$0xff] }
 0x284   : > { %v1013_v60 = vpop.f32.mrf.mxu2  ;;  %v1033_v61 = vpop.f32.mrf.mxu3 }
 0x285   : > { %v1034_v7 = vadd.f32 %v2950_v50, %v1033_v61  ;;  %v2953_v1 = vpop.f32.mrf.mxu1  ;;  %v1014_v8 = vadd.f32 %v2950_v50, %v1013_v60  ;;  %v576_v60 = vld [vmem:[#allocation2 + $0x30] sm:$0xff] }
 0x286   : > { %v1466_v14 = vmul.f32 %v2995_v35, %v576_v60 }
 0x287   : > { %v1080_v49 = vmax.f32 %v1034_v7, 0.0  ;;  %v1072_v29 = vmax.f32 %v1014_v8, 0.0  ;;  %v717_v8 = vadd.f32 %v2745_v5, %v716_v25 }
 0x289   : > { %v2960_v9 = vadd.f32 %v1080_v49, %v2955_v54  ;;  %v2973_v30 = vadd.f32 %v1072_v29, %v2964_v16  ;;  %v3016_v29 = vmax.f32 %v717_v8, 0.0 }
 0x28b   : > { %v3588_v56 = vrot.slane %v2973_v30, 7  ;;  %v3587_v32 = vrot.slane %v2960_v9, 7 }
 0x28c   : > { %v1015_v10 = vpop.f32.mrf.mxu2  ;;  %v1035_v15 = vpop.f32.mrf.mxu3 }
 0x28d   : > { %v1016_v41 = vadd.f32 %v2950_v50, %v1015_v10  ;;  %v1036_v28 = vadd.f32 %v2950_v50, %v1035_v15  ;;  %v983_v39 = vpop.f32.mrf.mxu1  ;;  %v3019_v10 = vperm.slane %v2984_v18, 2  ;;  %v767_v15 = vadd.f32 %v2745_v5, %v766_v20 }
 0x28e   : > { %v984_v4 = vadd.f32 %v2950_v50, %v983_v39 }
 0x28f   : > { %v1073_v24 = vmax.f32 %v1016_v41, 0.0  ;;  %v1081_v2 = vmax.f32 %v1036_v28, 0.0  ;;  %v1468_v28 = vadd.f32 %v1466_v14, %v1460_v47  ;;  %v1470_v39 = vmul.f32 %v3019_v10, %v3014_v38 }
 0x290   : > { %v1060_v49 = vmax.f32 %v984_v4, 0.0  ;;  %v3032_v4 = vmax.f32 %v767_v15, 0.0  ;;  %v3589_v15 = vrot.slane %v3014_v38, 7 }
 0x291   : > { %v2976_v43 = vadd.f32 %v1073_v24, %v2968_v48  ;;  %v2979_v52 = vadd.f32 %v1081_v2, %v2970_v55  ;;  %v1472_v20 = vadd.f32 %v1470_v39, %v1468_v28 }
 0x292   : > { %v3023_v41 = vadd.f32 %v1060_v49, %v3016_v29  ;;  %v572_v49 = vld [vmem:[#allocation2 + $0x20] sm:$0xff] }
 0x293   : > { %3632 = vst [vmem:[#allocation23_spill] sm:$0xff] %v2976_v43  ;;  %v1361_v62 = vrot.slane %v2976_v43, 7  ;;  %v1625_v3 = vrot.slane %v2979_v52, 7 }
 0x294   : > { %3633 = vst [vmem:[#allocation24_spill] sm:$0xff] %v2979_v52  ;;  %v2997_v40 = vpop.f32.mrf.mxu3 }
 0x295   : > { %v3002_v59 = vsel %vm1197_vm3, %v3587_v32, %v1625_v3  ;;  %v3004_v61 = vpop.f32.mrf.mxu1  ;;  %v3009_v7 = vsel %vm1197_vm3, %v3588_v56, %v1361_v62  ;;  %v3029_v62 = vperm.slane %v2984_v18, 3 }
 0x297   : > { %v1488_v8 = vmul.f32 %v3029_v62, %v3023_v41 }
 0x29c   : > { %v1040_v24 = vpop.f32.mrf.mxu3 }
 0x29d   : > { %v1041_v2 = vadd.f32 %v2950_v50, %v1040_v24  ;;  %v988_v25 = vpop.f32.mrf.mxu1  ;;  %v3040_v24 = vperm.slane %v2984_v18, 4 }
 0x29e   : > { %v989_v3 = vadd.f32 %v2950_v50, %v988_v25 }
 0x29f   : > { %v1083_v60 = vmax.f32 %v1041_v2, 0.0  ;;  %v1490_v2 = vadd.f32 %v1488_v8, %v1472_v20  ;;  %v979_v20 = vadd.f32 %v2950_v50, %v2944_v19  ;;  %v1270_v8 = vmul.f32 %v2995_v35, %v572_v49 }
 0x2a0   : > { %v1062_v47 = vmax.f32 %v989_v3, 0.0 }
 0x2a1   : > { %v3037_v14 = vadd.f32 %v1083_v60, %v3032_v4  ;;  %v1247_v60 = vsel %vm1197_vm3, 0.0, %v3589_v15 }
 0x2a2   : > { %v1094_v27 = vadd.f32 %v1062_v47, %v2964_v16  ;;  %v1249_v26 = vmul.f32 %v1247_v60, %v2646_v36  ;;  %v3065_v60 = vperm.slane %v2984_v18, 5 }
 0x2a3   : > { %1999 = vst.msk [vmem:[#allocation2 + $0x20] sm:$0xff] %vm649_vm4, %v3037_v14 }
 0x2a4   : > { %v1496_v28 = vmul.f32 %v3040_v24, %v1094_v27  ;;  %v1043_v39 = vpop.f32.mrf.mxu3  ;;  %v1252_v27 = vmul.f32 %v2992_v46, %v1249_v26  ;;  %v1275_v26 = vmul.f32 %v3019_v10, %v574_v31 }
 0x2a5   : > { %v3047_v25 = vpop.f32.mrf.mxu1 }
 0x2a6   : > { %v1498_v3 = vadd.f32 %v1496_v28, %v1490_v2  ;;  %v3059_v28 = vpop.f32.mrf.mxu2  ;;  %v1272_v12 = vadd.f32 %v1270_v8, %v1252_v27  ;;  %v3634_v8 = vrot.slane %v2973_v30, 7 }
 0x2a7   : > { %v1019_v6 = vadd.f32 %v2950_v50, %v3059_v28 }
 0x2a8   : > { %v1365_v31 = vsel %vm1197_vm3, 0.0, %v3634_v8  ;;  %v1044_v8 = vadd.f32 %v2950_v50, %v1043_v39 }
 0x2ac   : > { %v1045_v21 = vpop.f32.mrf.mxu3 }
 0x2ad   : > { %v1046_v47 = vadd.f32 %v2950_v50, %v1045_v21  ;;  %v993_v45 = vpop.f32.mrf.mxu1 }
 0x2ae   : > { %v994_v32 = vadd.f32 %v2950_v50, %v993_v45  ;;  %v1058_v45 = vmax.f32 %v979_v20, 0.0  ;;  %v1277_v20 = vadd.f32 %v1275_v26, %v1272_v12  ;;  %v3082_v37 = vpop.f32.mrf.mxu2  ;;  %v3092_v12 = vmul.f32 %v1365_v31, %v2646_v36 }
 0x2af   : > { %v1085_v2 = vmax.f32 %v1046_v47, 0.0 }
 0x2b0   : > { %v1064_v56 = vmax.f32 %v994_v32, 0.0 }
 0x2b1   : > { %v3062_v15 = vadd.f32 %v1085_v2, %v3032_v4 }
 0x2b2   : > { %v1096_v21 = vadd.f32 %v1064_v56, %v2964_v16  ;;  %v1090_v56 = vadd.f32 %v1058_v45, %v3016_v29 }
 0x2b3   : > { %2000 = vst.msk [vmem:[#allocation2 + $0x28] sm:$0xff] %vm649_vm4, %v3062_v15 }
 0x2b4   : > { %v1320_v19 = vrot.slane %v1096_v21, 7  ;;  %v1500_v49 = vmul.f32 %v3065_v60, %v1096_v21  ;;  %v1048_v47 = vpop.f32.mrf.mxu3  ;;  %v1349_v45 = vmul.f32 %v3040_v24, %v1090_v56  ;;  %v765_v56 = vadd.f32 %v2745_v5, %v2942_v53 }
 0x2b5   : > { %v995_v32 = vpop.f32.mrf.mxu1 }
 0x2b6   : > { %v1325_v2 = vsel %vm1197_vm3, 0.0, %v1320_v19  ;;  %v3073_v63 = vadd.f32 %v1500_v49, %v1498_v3  ;;  %v996_v23 = vadd.f32 %v2950_v50, %v995_v32  ;;  %v1049_v49 = vadd.f32 %v2950_v50, %v1048_v47 }
 0x2b7   : > { %v1326_v27 = vmul.f32 %v1325_v2, %v2646_v36  ;;  %v718_v2 = vpop.f32.mrf.mxu0 }
 0x2b8   : > { %v1065_v57 = vmax.f32 %v996_v23, 0.0  ;;  %v1086_v31 = vmax.f32 %v1049_v49, 0.0  ;;  %v719_v39 = vadd.f32 %v2745_v5, %v718_v2  ;;  %v3121_v49 = vmax.f32 %v765_v56, 0.0  ;;  %v1023_v2 = vpop.f32.mrf.mxu2 }
 0x2b9   : > { %v1329_v21 = vmul.f32 %v3029_v62, %v1326_v27  ;;  %v1354_v27 = vmul.f32 %v3065_v60, %v3023_v41  ;;  %v1369_v41 = vmul.f32 %v3085_v33, %v3092_v12  ;;  %v3636_v5 = vrot.slane %v2960_v9, 7 }
 0x2ba   : > { %v3088_v3 = vadd.f32 %v1065_v57, %v2968_v48 }
 0x2bb   : > { %v1331_v26 = vadd.f32 %v1329_v21, %v1277_v20  ;;  %v981_v20 = vadd.f32 %v2950_v50, %v2953_v1 }
 0x2bc   : > { %v1321_v23 = vrot.slane %v3088_v3, 7  ;;  %v1050_v32 = vpop.f32.mrf.mxu3 }
 0x2bd   : > { %v1051_v57 = vadd.f32 %v2950_v50, %v1050_v32  ;;  %v998_v13 = vpop.f32.mrf.mxu1  ;;  %v1351_v51 = vadd.f32 %v1349_v45, %v1331_v26  ;;  %v986_v45 = vadd.f32 %v2950_v50, %v3004_v61  ;;  %v1084_v26 = vmax.f32 %v1044_v8, 0.0 }
 0x2be   : > { %v3105_v47 = vsel %vm1197_vm3, %v1320_v19, %v1321_v23  ;;  %v1059_v1 = vmax.f32 %v981_v20, 0.0  ;;  %v1039_v19 = vadd.f32 %v2950_v50, %v2997_v40  ;;  %v1629_v23 = vsel %vm1197_vm3, 0.0, %v3636_v5 }
 0x2bf   : > { %v1087_v21 = vmax.f32 %v1051_v57, 0.0  ;;  %v1356_v17 = vadd.f32 %v1354_v27, %v1351_v51  ;;  %v991_v51 = vadd.f32 %v2950_v50, %v3047_v25  ;;  %v3127_v61 = vadd.f32 %v1086_v31, %v2955_v54  ;;  %v3137_v25 = vld [vmem:[%s3574_s11 + $0x38] ss:$0 sm:$0xff] }
 0x2c0   : > { %v999_v40 = vadd.f32 %v2950_v50, %v998_v13  ;;  %v1061_v8 = vmax.f32 %v986_v45, 0.0  ;;  %v3140_v57 = vadd.f32 %v1084_v26, %v3121_v49  ;;  %v1630_v31 = vmul.f32 %v1629_v23, %v2646_v36 }
 0x2c1   : > { %v3113_v53 = vadd.f32 %v1087_v21, %v2970_v55  ;;  %v3115_v32 = vadd.f32 %v1369_v41, %v1356_v17  ;;  %3637 = vst [vmem:[#allocation26_spill] sm:$0xff] %v3127_v61  ;;  %v3131_v17 = vmax.f32 %v719_v39, 0.0  ;;  %v1082_v41 = vmax.f32 %v1039_v19, 0.0 }
 0x2c2   : > { %v1063_v39 = vmax.f32 %v991_v51, 0.0  ;;  %v1467_v13 = vmul.f32 %v2995_v35, %v3127_v61  ;;  %v3150_v45 = vperm.slane %v2984_v18, 7  ;;  %v1066_v26 = vmax.f32 %v999_v40, 0.0 }
 0x2c3   : > { %3635 = vst [vmem:[#allocation25_spill] sm:$0xff] %v3113_v53  ;;  %v1091_v21 = vadd.f32 %v1059_v1, %v3131_v17  ;;  %v3157_v23 = vadd.f32 %v1061_v8, %v3131_v17  ;;  %v1461_v1 = vmul.f32 %v2992_v46, %v3140_v57  ;;  %v3165_v51 = vmul.f32 %v1630_v31, %v3029_v62 }
 0x2c4   : > { %2001 = vst.msk [vmem:[#allocation2 + $0x30] sm:$0xff] %vm649_vm4, %v3113_v53  ;;  %v1053_v27 = vpop.f32.mrf.mxu3  ;;  %v3169_v28 = vadd.f32 %v1082_v41, %v3121_v49  ;;  %v1095_v40 = vadd.f32 %v1063_v39, %v2968_v48  ;;  %v1074_v31 = vmax.f32 %v1019_v6, 0.0  ;;  %v1098_v42 = vadd.f32 %v1066_v26, %v3016_v29  ;;  %v1025_v26 = vpop.f32.mrf.mxu2 }
 0x2c5   : > { %v1054_v56 = vadd.f32 %v2950_v50, %v1053_v27  ;;  %v1000_v20 = vpop.f32.mrf.mxu1  ;;  %v3154_v27 = vmul.f32 %v3137_v25, %v2973_v30  ;;  %v1350_v18 = vmul.f32 %v3040_v24, %v1091_v21  ;;  %v1587_v21 = vmul.f32 %v3092_v12, %v2992_v46 }
 0x2c6   : > { %v1001_v34 = vadd.f32 %v2950_v50, %v1000_v20  ;;  %v1489_v39 = vmul.f32 %v3029_v62, %v3157_v23  ;;  %v1271_v6 = vmul.f32 %v2995_v35, %v3169_v28 }
 0x2c7   : > { %v1088_v5 = vmax.f32 %v1054_v56, 0.0  ;;  %v1469_v56 = vadd.f32 %v1467_v13, %v1461_v1  ;;  %v3639_v13 = vrot.slane %v3014_v38, 7 }
 0x2c8   : > { %v1067_v38 = vmax.f32 %v1001_v34, 0.0  ;;  %v1021_v34 = vadd.f32 %v2950_v50, %v3082_v37 }
 0x2c9   : > { %v3162_v19 = vadd.f32 %v1088_v5, %v2955_v54  ;;  %v1631_v5 = vmul.f32 %v3002_v59, %v2663_v58  ;;  %v1024_v59 = vadd.f32 %v2950_v50, %v1023_v2  ;;  %v1106_v2 = vadd.f32 %v1074_v31, %v3121_v49 }
 0x2ca   : > { %v1099_v31 = vadd.f32 %v1067_v38, %v3131_v17 }
 0x2cb   : > { %3638 = vst [vmem:[#allocation27_spill] sm:$0xff] %v3162_v19  ;;  %v1245_v8 = vrot.slane %v3162_v19, 7  ;;  %v1471_v22 = vmul.f32 %v3019_v10, %v3162_v19  ;;  %v1497_v19 = vmul.f32 %v3040_v24, %v1095_v40 }
 0x2cc   : > { %v1055_v41 = vpop.f32.mrf.mxu3 }
 0x2cd   : > { %v1248_v1 = vsel %vm1197_vm3, %v3639_v13, %v1245_v8  ;;  %v1473_v11 = vadd.f32 %v1471_v22, %v1469_v56  ;;  %v1056_v20 = vadd.f32 %v2950_v50, %v1055_v41  ;;  %v1003_v53 = vpop.f32.mrf.mxu1  ;;  %v1327_v22 = vmul.f32 %v3105_v47, %v2663_v58 }
 0x2ce   : > { %v1250_v12 = vmul.f32 %v1248_v1, %v2663_v58  ;;  %v1004_v52 = vadd.f32 %v2950_v50, %v1003_v53  ;;  %v1603_v56 = vmul.f32 %v2995_v35, %v1098_v42  ;;  %v1501_v1 = vmul.f32 %v3065_v60, %v3088_v3 }
 0x2cf   : > { %v1491_v61 = vadd.f32 %v1489_v39, %v1473_v11  ;;  %v1089_v43 = vmax.f32 %v1056_v20, 0.0  ;;  %v1276_v11 = vmul.f32 %v3019_v10, %v3140_v57  ;;  %v1330_v3 = vmul.f32 %v3029_v62, %v1327_v22 }
 0x2d0   : > { %v1253_v41 = vmul.f32 %v2992_v46, %v1250_v12  ;;  %v1068_v13 = vmax.f32 %v1004_v52, 0.0  ;;  %v1076_v52 = vmax.f32 %v1024_v59, 0.0  ;;  %v1605_v37 = vadd.f32 %v1603_v56, %v1587_v21 }
 0x2d1   : > { %v3201_v53 = vadd.f32 %v1089_v43, %v2970_v55  ;;  %v1499_v40 = vadd.f32 %v1497_v19, %v1491_v61  ;;  %v1367_v59 = vmul.f32 %v3009_v7, %v2663_v58  ;;  %v1640_v22 = vmul.f32 %v3040_v24, %v1106_v2  ;;  %v1028_v7 = vpop.f32.mrf.mxu2 }
 0x2d2   : > { %v1273_v47 = vadd.f32 %v1271_v6, %v1253_v41  ;;  %v3208_v39 = vadd.f32 %v1068_v13, %v3016_v29  ;;  %v1633_v29 = vmul.f32 %v1631_v5, %v3029_v62  ;;  %v1026_v6 = vadd.f32 %v2950_v50, %v1025_v26 }
 0x2d3   : > { %v1649_v20 = vrot.slane %v3201_v53, 7  ;;  %2002 = vst.msk [vmem:[#allocation2 + $0x38] sm:$0xff] %vm649_vm4, %v3201_v53  ;;  %v3214_v43 = vadd.f32 %v1501_v1, %v1499_v40  ;;  %v1652_v41 = vsel %vm1197_vm3, 0.0, %v1245_v8  ;;  %v1075_v56 = vmax.f32 %v1021_v34, 0.0 }
 0x2d4   : > { %v1278_v61 = vadd.f32 %v1276_v11, %v1273_v47  ;;  %v1607_v19 = vmul.f32 %v3019_v10, %v3208_v39  ;;  %v1108_v40 = vadd.f32 %v1076_v52, %v3121_v49  ;;  %v1604_v5 = vmul.f32 %v2995_v35, %v1099_v31 }
 0x2d5   : > { %v1650_v12 = vsel %vm1197_vm3, %v1245_v8, %v1649_v20  ;;  %v1005_v38 = vpop.f32.mrf.mxu1  ;;  %v1355_v26 = vmul.f32 %v3065_v60, %v3157_v23  ;;  %v1077_v8 = vmax.f32 %v1026_v6, 0.0  ;;  %v1588_v2 = vmul.f32 %v1367_v59, %v2992_v46 }
 0x2d6   : > { %v1332_v13 = vadd.f32 %v1330_v3, %v1278_v61  ;;  %v1609_v1 = vadd.f32 %v1607_v19, %v1605_v37  ;;  %v1006_v21 = vadd.f32 %v2950_v50, %v1005_v38  ;;  %v1653_v3 = vmul.f32 %v1652_v41, %v2646_v36 }
 0x2d7   : > { %v1370_v37 = vmul.f32 %v3085_v33, %v1367_v59  ;;  %v1374_v34 = vmul.f32 %v3150_v45, %v1098_v42  ;;  %v1107_v23 = vadd.f32 %v1075_v56, %v3032_v4  ;;  %v1606_v19 = vadd.f32 %v1604_v5, %v1588_v2 }
 0x2d8   : > { %v1352_v11 = vadd.f32 %v1350_v18, %v1332_v13  ;;  %v1634_v47 = vadd.f32 %v3165_v51, %v1609_v1  ;;  %v1069_v20 = vmax.f32 %v1006_v21, 0.0  ;;  %v1644_v18 = vmul.f32 %v3065_v60, %v1108_v40 }
 0x2d9   : > { %v1375_v51 = vmul.f32 %v3150_v45, %v1099_v31  ;;  %v1379_v59 = vmul.f32 %v3137_v25, %v3208_v39  ;;  %v1029_v41 = vadd.f32 %v2950_v50, %v1028_v7  ;;  %v1655_v31 = vmul.f32 %v1653_v3, %v3085_v33 }
 0x2da   : > { %v1357_v49 = vadd.f32 %v1355_v26, %v1352_v11  ;;  %v3237_v52 = vadd.f32 %v1069_v20, %v3131_v17  ;;  %v1642_v61 = vadd.f32 %v1640_v22, %v1634_v47  ;;  %v3249_v17 = vadd.f32 %v1077_v8, %v3032_v4 }
 0x2db   : > { %v1376_v21 = vadd.f32 %v1374_v34, %v3115_v32  ;;  %v1641_v26 = vmul.f32 %v3040_v24, %v1107_v23  ;;  %v1654_v11 = vmul.f32 %v1650_v12, %v2663_v58  ;;  %v1504_v4 = vmul.f32 %v3085_v33, %v3208_v39 }
 0x2dc   : > { %v1372_v6 = vadd.f32 %v1370_v37, %v1357_v49  ;;  %v1608_v38 = vmul.f32 %v3019_v10, %v3237_v52  ;;  %v1380_v42 = vmul.f32 %v3137_v25, %v3237_v52  ;;  %v1646_v1 = vadd.f32 %v1644_v18, %v1642_v61  ;;  %v1030_v49 = vpop.f32.mrf.mxu2 }
 0x2dd   : > { %v1008_v13 = vpop.f32.mrf.mxu1  ;;  %v1381_v8 = vadd.f32 %v1379_v59, %v1376_v21  ;;  %v1748_v3 = vmul.f32 %v3019_v10, %v2973_v30  ;;  %v1659_v32 = vmul.f32 %v3150_v45, %v3169_v28  ;;  %v1660_v2 = vmul.f32 %v3150_v45, %v3037_v14 }
 0x2de   : > { %v1377_v22 = vadd.f32 %v1375_v51, %v1372_v6  ;;  %v1610_v56 = vadd.f32 %v1608_v38, %v1606_v19  ;;  %v1009_v5 = vadd.f32 %v2950_v50, %v1008_v13  ;;  %v1657_v47 = vadd.f32 %v1655_v31, %v1646_v1  ;;  %v1143_v1 = vld [vmem:[%s3641_s16 + $0x68] sm:$0xff] }
 0x2df   : > { %v1078_v34 = vmax.f32 %v1029_v41, 0.0  ;;  %v1645_v12 = vmul.f32 %v3065_v60, %v3249_v17  ;;  %v1756_v18 = vmul.f32 %v3029_v62, %v1108_v40  ;;  %v1506_v51 = vadd.f32 %v1504_v4, %v3073_v63  ;;  %v1144_v63 = vld [vmem:[%s3640_s28 + $0x70] sm:$0xff]  ;;  %v1142_v40 = vld [vmem:[%s3641_s16 + $0x60] sm:$0xff]  ;;  %s2468_s28 = smov 112  }
 0x2e0   : > { %v1635_v20 = vadd.f32 %v1633_v29, %v1610_v56  ;;  %v1070_v7 = vmax.f32 %v1009_v5, 0.0  ;;  %v1382_v37 = vadd.f32 %v1380_v42, %v1377_v22  ;;  %v1738_v30 = vmul.f32 %v2992_v46, %v3208_v39  ;;  %v1145_v39 = vld [vmem:[%s3641_s16 + $0x78] sm:$0xff] }
 0x2e1   : > { %v1663_v28 = vmul.f32 %v3137_v25, %v3140_v57  ;;  %v1656_v6 = vmul.f32 %v1654_v11, %v3085_v33  ;;  %v1110_v38 = vadd.f32 %v1078_v34, %v2955_v54  ;;  %v1031_v59 = vadd.f32 %v2950_v50, %v1030_v49 }
 0x2e2   : > { %v1102_v61 = vadd.f32 %v1070_v7, %v2964_v16  ;;  %v2372_v29 = vpack.i.bf16 %v1382_v37, %v1381_v8  ;;  %v1643_v23 = vadd.f32 %v1641_v26, %v1635_v20  ;;  %v1661_v41 = vadd.f32 %v1659_v32, %v1657_v47  ;;  %v1141_v7 = vld [vmem:[%s3641_s16 + $0x58] sm:$0xff] }
 0x2e3   : > { %v3289_v13 = vpack.c.bf16 %v1145_v39, %v1144_v63  ;;  %v1664_v5 = vmul.f32 %v3137_v25, %v3062_v15  ;;  %v1505_v54 = vmul.f32 %v3085_v33, %v3237_v52  ;;  %v3300_v26 = vpack.c.bf16 %v1143_v1, %v1142_v40  ;;  %v1137_v40 = vld [vmem:[%s3641_s16 + $0x38] sm:$0xff] }
 0x2e4   : > { %v1508_v14 = vmul.f32 %v3150_v45, %v1102_v61  ;;  %v1744_v19 = vmul.f32 %v2995_v35, %v1102_v61  ;;  %2373 = vrot.lane.b32.xlu2 %v2372_v29, %s2467_s15  ;;  %v1647_v16 = vadd.f32 %v1645_v12, %v1643_v23  ;;  %v1768_v8 = vmul.f32 %v3065_v60, %v2960_v9 }
 0x2e5   : > { %v1010_v42 = vpop.f32.mrf.mxu1  ;;  %1416 = vmatpush.bf16.msrb.mxu0 %v3289_v13  ;;  %1698 = vmatpush.bf16.msra.mxu3 %v3289_v13  ;;  %v1764_v37 = vmul.f32 %v3040_v24, %v1110_v38  ;;  %v1507_v12 = vadd.f32 %v1505_v54, %v3214_v43  ;;  %v1739_v49 = vmul.f32 %v2992_v46, %v3237_v52  ;;  %v1138_v46 = vld [vmem:[%s3641_s16 + $0x40] sm:$0xff]  ;;  %v1139_v52 = vld [vmem:[%s3641_s16 + $0x48] sm:$0xff] }
 0x2e6   : > { %v1510_v31 = vadd.f32 %v1508_v14, %v1506_v51  ;;  %v1746_v21 = vadd.f32 %v1744_v19, %v1738_v30  ;;  %v1011_v22 = vadd.f32 %v2950_v50, %v1010_v42  ;;  %v1658_v56 = vadd.f32 %v1656_v6, %v1647_v16  ;;  %v1140_v50 = vld [vmem:[%s3641_s16 + $0x50] sm:$0xff]  ;;  %1547 = vmatpush.bf16.msrb.mxu2 %v3289_v13  ;;  %v3644_v6 = vld [vmem:[#allocation26_spill] sm:$0xff] }
 0x2e7   : > { %v3319_v61 = vpack.c.bf16 %v1141_v7, %v1140_v50  ;;  %v1757_v19 = vmul.f32 %v3029_v62, %v3249_v17  ;;  %v1150_v16 = vpack.c.bf16 %v1139_v52, %v1138_v46  ;;  %v3645_v17 = vld [vmem:[#allocation27_spill] sm:$0xff]  ;;  %v1773_v54 = vmul.f32 %v3085_v33, %v3062_v15  ;;  %v1132_v50 = vld [vmem:[%s3641_s16 + $0x10] sm:$0xff]  ;;  %v1133_v7 = vld [vmem:[%s3641_s16 + $0x18] sm:$0xff] }
 0x2e8   : > { %v1750_v11 = vadd.f32 %v1748_v3, %v1746_v21  ;;  %v1071_v4 = vmax.f32 %v1011_v22, 0.0  ;;  %v1662_v47 = vadd.f32 %v1660_v2, %v1658_v56  ;;  %v1514_v20 = vadd.f32 %v3154_v27, %v1510_v31  ;;  %v3646_v31 = vld [vmem:[#allocation24_spill] sm:$0xff]  ;;  %v1134_v56 = vld [vmem:[%s3641_s16 + $0x20] sm:$0xff]  ;;  %v3652_v52 = vld [vmem:[#allocation17_spill] sm:$0xff] }
 0x2e9   : > { %v1079_v3 = vmax.f32 %v1031_v59, 0.0  ;;  %v1665_v27 = vadd.f32 %v1663_v28, %v1661_v41  ;;  %1417 = vmatpush.bf16.msrb.mxu0 %v3300_v26  ;;  %1699 = vmatpush.bf16.msra.mxu3 %v3300_v26  ;;  %v1780_v38 = vmul.f32 %v3137_v25, %v3645_v17  ;;  %v1769_v21 = vmul.f32 %v3065_v60, %v3646_v31  ;;  %v3651_v46 = vld [vmem:[#allocation20_spill] sm:$0xff] }
 0x2ea   : > { %v1758_v32 = vadd.f32 %v1756_v18, %v1750_v11  ;;  %v1103_v2 = vadd.f32 %v1071_v4, %v2968_v48  ;;  %v1666_v34 = vadd.f32 %v1664_v5, %v1662_v47  ;;  %v3642_v48 = vpack.i.bf16 %v2775_v44, %v2764_v0  ;;  %v3643_v18 = vld [vmem:[#allocation23_spill] sm:$0xff]  ;;  %1548 = vmatpush.bf16.msrb.mxu2 %v3300_v26  ;;  %v1135_v5 = vld [vmem:[%s3641_s16 + $0x28] sm:$0xff]  ;;  %v3647_v4 = vld [vmem:[#allocation25_spill] sm:$0xff] }
 0x2eb   : > { %v1513_v51 = vmul.f32 %v3137_v25, %v3643_v18  ;;  %v1111_v30 = vadd.f32 %v1079_v3, %v2970_v55  ;;  %v1772_v0 = vmul.f32 %v3085_v33, %v3140_v57  ;;  %v1136_v57 = vld [vmem:[%s3641_s16 + $0x30] sm:$0xff]  ;;  %v1148_v60 = vpack.c.bf16 %v1135_v5, %v1134_v56 }
 0x2ec   : > { %v1766_v9 = vadd.f32 %v1764_v37, %v1758_v32  ;;  %v1509_v29 = vmul.f32 %v3150_v45, %v1103_v2  ;;  %v1745_v23 = vmul.f32 %v2995_v35, %v1103_v2  ;;  %2378 = vrot.lane.b32.xlu2 %v3642_v48, %s2465_s7  ;;  %v2397_v43 = vpack.i.bf16 %v1666_v34, %v1665_v27  ;;  %v3648_v37 = vld [vmem:[#allocation22_spill] sm:$0xff]  ;;  %v2359_v34 = vpop.permute.xlu1 %2358 }
 0x2ed   : > { %v1749_v35 = vmul.f32 %v3019_v10, %v3643_v18  ;;  %1418 = vmatpush.bf16.msrb.mxu0 %v3319_v61  ;;  %1700 = vmatpush.bf16.msra.mxu3 %v3319_v61  ;;  %v1776_v10 = vmul.f32 %v3150_v45, %v3644_v6  ;;  %v1765_v62 = vmul.f32 %v3040_v24, %v1111_v30  ;;  %v2364_v30 = vpop.permute.xlu0 %2363 }
 0x2ee   : > { %v1511_v44 = vadd.f32 %v1509_v29, %v1507_v12  ;;  %v1747_v28 = vadd.f32 %v1745_v23, %v1739_v49  ;;  %v1770_v14 = vadd.f32 %v1768_v8, %v1766_v9  ;;  %1549 = vmatpush.bf16.msrb.mxu2 %v3319_v61  ;;  %v1149_v1 = vpack.c.bf16 %v1137_v40, %v1136_v57  ;;  %v2354_v12 = vpop.permute.xlu2 %2353 }
 0x2ef   : > { %v1777_v47 = vmul.f32 %v3150_v45, %v3647_v4  ;;  %v1781_v33 = vmul.f32 %v3137_v25, %v3201_v53  ;;  %v1147_v8 = vpack.c.bf16 %v1133_v7, %v1132_v50  ;;  %v3649_v45 = vld [vmem:[#allocation21_spill] sm:$0xff]  ;;  %v1130_v25 = vld [vmem:[%s3641_s16] sm:$0xff]  ;;  %v1131_v53 = vld [vmem:[%s3641_s16 + $0x8] sm:$0xff]  ;;  %v2361_v9 = vunpack.i.h.bf16 %v2359_v34 }
 0x2f0   : > { %v1751_v55 = vadd.f32 %v1749_v35, %v1747_v28  ;;  %v1515_v63 = vadd.f32 %v1513_v51, %v1511_v44  ;;  %v1774_v39 = vadd.f32 %v1772_v0, %v1770_v14  ;;  %v3650_v3 = vpack.i.bf16 %v3648_v37, %v3649_v45  ;;  %v2421_v4 = vld [vmem:[%s3574_s11] sm:$0xff] }
 0x2f1   : > { %1419 = vmatpush.bf16.msrb.mxu0 %v1150_v16  ;;  %1701 = vmatpush.bf16.msra.mxu3 %v1150_v16  ;;  %v1146_v27 = vpack.c.bf16 %v1131_v53, %v1130_v25  ;;  %v2360_v29 = vunpack.i.l.bf16 %v2359_v34  ;;  %v3661_v7 = vld [vmem:[#allocation11_spill] sm:$0xff]  ;;  %v2355_v37 = vunpack.i.l.bf16 %v2354_v12  ;;  %v2366_v45 = vunpack.i.h.bf16 %v2364_v30  ;;  %v3662_v25 = vld [vmem:[#allocation18_spill] sm:$0xff] }
 0x2f2   : > { %v1759_v59 = vadd.f32 %v1757_v19, %v1751_v55  ;;  %v2387_v42 = vpack.i.bf16 %v1515_v63, %v1514_v20  ;;  %v1778_v41 = vadd.f32 %v1776_v10, %v1774_v39  ;;  %1550 = vmatpush.bf16.msrb.mxu2 %v1150_v16  ;;  %v3653_v19 = vld [vmem:[#allocation13_spill] sm:$0xff]  ;;  %v3656_v55 = vld [vmem:[#allocation10_spill] sm:$0xff]  ;;  %v3657_v63 = vld [vmem:[#allocation15_spill] sm:$0xff] }
 0x2f3   : > { %v3658_v39 = vperm.slane %v3657_v63, 1 }
 0x2f4   : > { %v1767_v22 = vadd.f32 %v1765_v62, %v1759_v59  ;;  %2398 = vrot.lane.b32.xlu2 %v2397_v43, %s2467_s15  ;;  %2388 = vrot.lane.b32.xlu1 %v2387_v42, %s2467_s15  ;;  %v1782_v24 = vadd.f32 %v1780_v38, %v1778_v41  ;;  %v2369_v49 = vpop.permute.xlu1 %2368  ;;  %v3659_v59 = vld [vmem:[#allocation19_spill] sm:$0xff] }
 0x2f5   : > { %1420 = vmatpush.bf16.msrb.mxu0 %v1149_v1  ;;  %1702 = vmatpush.bf16.msra.mxu3 %v1149_v1  ;;  %v2371_v23 = vunpack.i.h.bf16 %v2369_v49  ;;  %v2370_v48 = vunpack.i.l.bf16 %v2369_v49  ;;  %v1590_v57 = vmul.f32 %v3658_v39, %v3656_v55  ;;  %v2384_v17 = vpop.permute.xlu0 %2383 }
 0x2f6   : > { %v1771_v11 = vadd.f32 %v1769_v21, %v1767_v22  ;;  %1551 = vmatpush.bf16.msrb.mxu2 %v1149_v1  ;;  %v2385_v31 = vunpack.i.l.bf16 %v2384_v17 }
 0x2f8   : > { %v1775_v20 = vadd.f32 %v1773_v54, %v1771_v11 }
 0x2f9   : > { %1421 = vmatpush.bf16.msrb.mxu0 %v1148_v60  ;;  %1703 = vmatpush.bf16.msra.mxu3 %v1148_v60 }
 0x2fa   : > { %v1779_v15 = vadd.f32 %v1777_v47, %v1775_v20  ;;  %1552 = vmatpush.bf16.msrb.mxu2 %v1148_v60  ;;  %v1714_v47 = vrot.slane %v2421_v4, 5  ;;  %v3660_v20 = vld [vmem:[#allocation9_spill] sm:$0xff] }
 0x2fc   : > { %2393 = vrot.lane.b32.xlu1 %v3650_v3, %s2465_s7  ;;  %v1783_v32 = vadd.f32 %v1781_v33, %v1779_v15  ;;  %v1716_v50 = vadd.f32 %v1714_v47, %v3660_v20  ;;  %v1722_v15 = vrot.slane %v2421_v4, 7  ;;  %v2365_v3 = vunpack.i.l.bf16 %v2364_v30  ;;  %v3664_v30 = vld [vmem:[#allocation14_spill] sm:$0xff]  ;;  %s3667_s7 = sld [smem:[#allocation31_spill]] }
 0x2fd   : > { %1422 = vmatpush.bf16.msrb.mxu0 %v1147_v8  ;;  %1704 = vmatpush.bf16.msra.mxu3 %v1147_v8 }
 0x2fe   : > { %v2407_v2 = vpack.i.bf16 %v1783_v32, %v1782_v24  ;;  %1553 = vmatpush.bf16.msrb.mxu2 %v1147_v8  ;;  %v1720_v33 = vadd.f32 %v1716_v50, %v3661_v7  ;;  %v1910_v50 = vld [vmem:[%s3666_s20 + $0x30] sm:$0xff]  ;;  %v1911_v7 = vld [vmem:[%s3666_s20 + $0x38] sm:$0xff] }
 0x301   : > { %1423 = vmatpush.bf16.msrb.mxu0 %v1146_v27  ;;  %1705 = vmatpush.bf16.msra.mxu3 %v1146_v27 }
 0x302   : > { %1554 = vmatpush.bf16.msrb.mxu2 %v1146_v27 }
 0x304   : > { %2408 = vrot.lane.b32.xlu1 %v2407_v2, %s2467_s15  ;;  %v1724_v2 = vadd.f32 %v1722_v15, %v1720_v33  ;;  %v1908_v33 = vld [vmem:[%s3666_s20 + $0x20] sm:$0xff] }
 0x305   : > { %1815 = vmatpush.bf16.msra.mxu0 %v3289_v13  ;;  %v1408_v13 = vsel %vm649_vm4, %v3651_v46, %v2361_v9  ;;  %v2422_v46 = vld [vmem:[%s3574_s11 + $0x8] sm:$0x1] }
 0x306   : > { %v1410_v35 = vsel %vm610_vm2, %v1408_v13, %v2371_v23  ;;  %v1728_v13 = vadd.f32 %v2422_v46, %v1724_v2 }
 0x309   : > { %1816 = vmatpush.bf16.msra.mxu0 %v3300_v26  ;;  %v1407_v26 = vsel %vm649_vm4, %v3652_v52, %v2360_v29 }
 0x30a   : > { %v1409_v51 = vsel %vm610_vm2, %v1407_v26, %v2370_v48  ;;  %v1730_v26 = vperm.slane %v1728_v13, 0 }
 0x30d   : > { %1817 = vmatpush.bf16.msra.mxu0 %v3319_v61 }
 0x311   : > { %1818 = vmatpush.bf16.msra.mxu0 %v1150_v16  ;;  %v3654_v16 = vld [vmem:[#allocation16_spill] sm:$0xff] }
 0x312   : > { %v3655_v6 = vperm.slane %v3654_v16, 0 }
 0x314   : > { %v1580_v10 = vmul.f32 %v3655_v6, %v3653_v19 }
 0x315   : > { %1819 = vmatpush.bf16.msra.mxu0 %v1149_v1  ;;  %v2386_v1 = vunpack.i.h.bf16 %v2384_v17  ;;  %v3442_v17 = vld [vmem:[%s3641_s16 + $0x80] ss:$0 sm:$0xff] }
 0x316   : > { %v1592_v38 = vadd.f32 %v1590_v57, %v1580_v10 }
 0x319   : > { %1820 = vmatpush.bf16.msra.mxu0 %v1148_v60 }
 0x31d   : > { %1821 = vmatpush.bf16.msra.mxu0 %v1147_v8  ;;  %v2356_v8 = vunpack.i.h.bf16 %v2354_v12 }
 0x31f   : > { %v1541_v53 = vsel %vm649_vm4, %v3662_v25, %v2356_v8  ;;  %v1915_v8 = vpack.c.bf16 %v1911_v7, %v1910_v50  ;;  %v1940_v25 = vld [vmem:[%s3667_s7 + $0x10] sm:$0xff] }
 0x320   : > { %v1543_v29 = vsel %vm610_vm2, %v1541_v53, %v2366_v45 }
 0x321   : > { %1822 = vmatpush.bf16.msra.mxu0 %v1146_v27  ;;  %v3663_v27 = vld [vmem:[#allocation12_spill] sm:$0xff]  ;;  %1925 = vmatpush.bf16.msra.mxu2 %v1915_v8 }
 0x322   : > { %v1540_v34 = vsel %vm649_vm4, %v3663_v27, %v2355_v37  ;;  %v1909_v37 = vld [vmem:[%s3666_s20 + $0x28] sm:$0xff] }
 0x323   : > { %v1542_v23 = vsel %vm610_vm2, %v1540_v34, %v2365_v3  ;;  %v1914_v27 = vpack.c.bf16 %v1909_v37, %v1908_v33  ;;  %v1941_v34 = vld [vmem:[%s3667_s7 + $0x18] sm:$0xff] }
 0x325   : > { %1926 = vmatpush.bf16.msra.mxu2 %v1914_v27 }
 0x33e   : > { %v2374_v43 = vpop.permute.xlu2 %2373 }
 0x33f   : > { %v2376_v61 = vunpack.i.h.bf16 %v2374_v43  ;;  %v2375_v18 = vunpack.i.l.bf16 %v2374_v43 }
 0x341   : > { %v1412_v0 = vsel %vm1411_vm5, %v1409_v51, %v2375_v18  ;;  %v1413_v44 = vsel %vm1411_vm5, %v1410_v35, %v2376_v61  ;;  %v2404_v51 = vpop.permute.xlu0 %2403  ;;  %v1731_v35 = vmul.f32 %v1730_v26, %v3656_v55 }
 0x342   : > { %v1414_v28 = vpack.c.bf16 %v1413_v44, %v1412_v0  ;;  %v1732_v0 = vmul.f32 %v1730_v26, %v3664_v30  ;;  %v2405_v19 = vunpack.i.l.bf16 %v2404_v51 }
 0x344   : > { %1424 = vmatmul.bf16.vlgmr.msrb.gmra.mxu0 %v1414_v28 }
 0x346   : > { %v2379_v14 = vpop.permute.xlu2 %2378 }
 0x347   : > { %v2381_v40 = vunpack.i.h.bf16 %v2379_v14  ;;  %v2380_v62 = vunpack.i.l.bf16 %v2379_v14  ;;  %v2406_v14 = vunpack.i.h.bf16 %v2404_v51 }
 0x349   : > { %v1692_v42 = vsel %vm649_vm4, %v3659_v59, %v2381_v40  ;;  %v1691_v41 = vsel %vm649_vm4, %v1592_v38, %v2380_v62 }
 0x34a   : > { %v1693_v56 = vsel %vm610_vm2, %v1691_v41, %v2385_v31  ;;  %v1694_v5 = vsel %vm610_vm2, %v1692_v42, %v2386_v1  ;;  %v579_v41 = vld [vmem:[#allocation3] sm:$0xff]  ;;  %v581_v31 = vld [vmem:[#allocation3 + $0x8] sm:$0xff] }
 0x34e   : > { %v2399_v21 = vpop.permute.xlu2 %2398 }
 0x34f   : > { %v2401_v22 = vunpack.i.h.bf16 %v2399_v21  ;;  %v2400_v24 = vunpack.i.l.bf16 %v2399_v21  ;;  %v1834_v21 = vrot.slane %v581_v31, 7 }
 0x351   : > { %v1695_v54 = vsel %vm1411_vm5, %v1693_v56, %v2400_v24  ;;  %v1696_v11 = vsel %vm1411_vm5, %v1694_v5, %v2401_v22  ;;  %v3454_v24 = vld [vmem:[%s3665_s17] sm:$0xff]  ;;  %v1839_v56 = vsel %vm1197_vm3, 0.0, %v1834_v21 }
 0x352   : > { %v1697_v60 = vpack.c.bf16 %v1696_v11, %v1695_v54  ;;  %v1843_v4 = vperm.slane %v3454_v24, 0  ;;  %v1846_v47 = vperm.slane %v3454_v24, 1 }
 0x354   : > { %1706 = vmatmul.bf16.vlgmr.msra.gmra.mxu3 %v1697_v60  ;;  %v1841_v60 = vmul.f32 %v1839_v56, %v2646_v36  ;;  %v1847_v3 = vmul.f32 %v1846_v47, %v579_v41 }
 0x356   : > { %v1844_v45 = vmul.f32 %v1843_v4, %v1841_v60 }
 0x358   : > { %v1849_v26 = vadd.f32 %v1847_v3, %v1844_v45 }
 0x366   : > { %v2389_v32 = vpop.permute.xlu1 %2388 }
 0x367   : > { %v2391_v49 = vunpack.i.h.bf16 %v2389_v32  ;;  %v2390_v9 = vunpack.i.l.bf16 %v2389_v32  ;;  %v1851_v32 = vperm.slane %v3454_v24, 2 }
 0x369   : > { %v1544_v48 = vsel %vm1411_vm5, %v1542_v23, %v2390_v9  ;;  %v1545_v12 = vsel %vm1411_vm5, %v1543_v29, %v2391_v49  ;;  %v1866_v9 = vperm.slane %v3454_v24, 3  ;;  %v1906_v23 = vld [vmem:[%s3666_s20 + $0x10] sm:$0xff] }
 0x36a   : > { %v1546_v43 = vpack.c.bf16 %v1545_v12, %v1544_v48  ;;  %v1907_v48 = vld [vmem:[%s3666_s20 + $0x18] sm:$0xff]  ;;  %v1943_v12 = vpack.c.bf16 %v1941_v34, %v1940_v25 }
 0x36c   : > { %1555 = vmatmul.bf16.vlgmr.msrb.gmra.mxu2 %v1546_v43  ;;  %1955 = vmatpush.bf16.msrb.mxu3 %v1943_v12 }
 0x36e   : > { %v2394_v52 = vpop.permute.xlu1 %2393 }
 0x36f   : > { %v2396_v61 = vunpack.i.h.bf16 %v2394_v52  ;;  %v2395_v18 = vunpack.i.l.bf16 %v2394_v52 }
 0x371   : > { %v1809_v44 = vsel %vm649_vm4, %v1732_v0, %v2396_v61  ;;  %v1808_v28 = vsel %vm649_vm4, %v1731_v35, %v2395_v18  ;;  %v1852_v61 = vmul.f32 %v1851_v32, %v581_v31  ;;  %v1913_v35 = vpack.c.bf16 %v1907_v48, %v1906_v23  ;;  %v1904_v0 = vld [vmem:[%s3666_s20] sm:$0xff] }
 0x372   : > { %v1810_v63 = vsel %vm610_vm2, %v1808_v28, %v2405_v19  ;;  %v1811_v39 = vsel %vm610_vm2, %v1809_v44, %v2406_v14  ;;  %v1905_v44 = vld [vmem:[%s3666_s20 + $0x8] sm:$0xff]  ;;  %v1871_v14 = vperm.slane %v3454_v24, 4  ;;  %v1876_v31 = vperm.slane %v3454_v24, 5 }
 0x373   : > { %1927 = vmatpush.bf16.msra.mxu2 %v1913_v35 }
 0x376   : > { %v2409_v16 = vpop.permute.xlu1 %2408 }
 0x377   : > { %v2411_v6 = vunpack.i.h.bf16 %v2409_v16  ;;  %v2410_v10 = vunpack.i.l.bf16 %v2409_v16 }
 0x379   : > { %v1812_v57 = vsel %vm1411_vm5, %v1810_v63, %v2410_v10  ;;  %v1813_v40 = vsel %vm1411_vm5, %v1811_v39, %v2411_v6  ;;  %v1854_v6 = vadd.f32 %v1852_v61, %v1849_v26  ;;  %v1939_v26 = vld [vmem:[%s3667_s7 + $0x8] sm:$0xff]  ;;  %v2418_v61 = vld [vmem:[%s3666_s20 + $0x40] ss:$0 sm:$0xff] }
 0x37a   : > { %v1814_v55 = vpack.c.bf16 %v1813_v40, %v1812_v57  ;;  %v1912_v57 = vpack.c.bf16 %v1905_v44, %v1904_v0 }
 0x37c   : > { %1823 = vmatmul.bf16.vlgmr.msra.gmra.mxu0 %v1814_v55  ;;  %1928 = vmatpush.bf16.msra.mxu2 %v1912_v57 }
 0x3c1   : > { %v1425_v1 = vpop.f32.mrf.mxu0 }
 0x3c2   : > { %v1426_v43 = vadd.f32 %v3442_v17, %v1425_v1 }
 0x3c4   : > { %v1430_v28 = vmax.f32 %v1426_v43, 0.0 }
 0x3c6   : > { %v1872_v41 = vmul.f32 %v1871_v14, %v1430_v28  ;;  %v2419_v28 = vld [vmem:[%s3667_s7 + $0x20] ss:$0 sm:$0xff] }
 0x3c9   : > { %v1427_v54 = vpop.f32.mrf.mxu0 }
 0x3ca   : > { %v1428_v40 = vadd.f32 %v3442_v17, %v1427_v54 }
 0x3cc   : > { %v1431_v54 = vmax.f32 %v1428_v40, 0.0 }
 0x3ce   : > { %v1873_v3 = vmul.f32 %v1871_v14, %v1431_v54 }
 0x3d7   : > { %v1707_v62 = vpop.f32.mrf.mxu3 }
 0x3d8   : > { %v1708_v46 = vadd.f32 %v3442_v17, %v1707_v62 }
 0x3da   : > { %v1712_v19 = vmax.f32 %v1708_v46, 0.0 }
 0x3dc   : > { %v1848_v1 = vmul.f32 %v1846_v47, %v1712_v19 }
 0x3df   : > { %v1709_v38 = vpop.f32.mrf.mxu3 }
 0x3e0   : > { %v3445_v59 = vadd.f32 %v3442_v17, %v1709_v38 }
 0x3e2   : > { %v1713_v42 = vmax.f32 %v3445_v59, 0.0 }
 0x3e4   : > { %2003 = vst.msk [vmem:[#allocation3] sm:$0xff] %vm610_vm2, %v1713_v42 }
 0x3ef   : > { %v1556_v22 = vpop.f32.mrf.mxu2 }
 0x3f0   : > { %v3458_v5 = vadd.f32 %v3442_v17, %v1556_v22 }
 0x3f2   : > { %v1561_v11 = vmax.f32 %v3458_v5, 0.0  ;;  %v2417_v5 = vld [vmem:[%s3665_s17 + $0x8] ss:$0 sm:$0xff] }
 0x3f4   : > { %v1858_v20 = vrot.slane %v1561_v11, 7  ;;  %v1877_v47 = vmul.f32 %v1876_v31, %v1561_v11 }
 0x3f6   : > { %v1863_v15 = vsel %vm1197_vm3, 0.0, %v1858_v20 }
 0x3f7   : > { %v1558_v2 = vpop.f32.mrf.mxu2  ;;  %v1864_v49 = vmul.f32 %v1863_v15, %v2646_v36 }
 0x3f8   : > { %v3484_v53 = vadd.f32 %v3442_v17, %v1558_v2 }
 0x3f9   : > { %v1824_v29 = vpop.f32.mrf.mxu0  ;;  %v1867_v30 = vmul.f32 %v1866_v9, %v1864_v49 }
 0x3fa   : > { %v1562_v13 = vmax.f32 %v3484_v53, 0.0  ;;  %v1825_v52 = vadd.f32 %v3442_v17, %v1824_v29 }
 0x3fb   : > { %v1869_v55 = vadd.f32 %v1867_v30, %v1854_v6 }
 0x3fc   : > { %v1859_v18 = vrot.slane %v1562_v13, 7  ;;  %v1829_v51 = vmax.f32 %v1825_v52, 0.0  ;;  %v1878_v27 = vmul.f32 %v1876_v31, %v1562_v13  ;;  %v1938_v52 = vld [vmem:[%s3667_s7] sm:$0xff] }
 0x3fd   : > { %v1874_v7 = vadd.f32 %v1872_v41, %v1869_v55  ;;  %v1942_v59 = vpack.c.bf16 %v1939_v26, %v1938_v52 }
 0x3fe   : > { %v1837_v16 = vrot.slane %v1829_v51, 7  ;;  %v1860_v10 = vsel %vm1197_vm3, %v1858_v20, %v1859_v18  ;;  %v1888_v20 = vperm.slane %v3454_v24, 6  ;;  %v1853_v15 = vmul.f32 %v1851_v32, %v1829_v51 }
 0x3ff   : > { %v1865_v56 = vmul.f32 %v1860_v10, %v2663_v58  ;;  %v1879_v2 = vadd.f32 %v1877_v47, %v1874_v7  ;;  %v1899_v48 = vmul.f32 %v2417_v5, %v1829_v51  ;;  %1956 = vmatpush.bf16.msrb.mxu3 %v1942_v59 }
 0x400   : > { %v1840_v63 = vsel %vm1197_vm3, %v1834_v21, %v1837_v16  ;;  %v1885_v39 = vsel %vm1197_vm3, 0.0, %v1837_v16 }
 0x401   : > { %v1842_v62 = vmul.f32 %v1840_v63, %v2663_v58  ;;  %v1826_v38 = vpop.f32.mrf.mxu0  ;;  %v1886_v21 = vmul.f32 %v1885_v39, %v2646_v36 }
 0x402   : > { %v1827_v22 = vadd.f32 %v3442_v17, %v1826_v38  ;;  %v1868_v17 = vmul.f32 %v1866_v9, %v1865_v56 }
 0x403   : > { %v1845_v60 = vmul.f32 %v1843_v4, %v1842_v62  ;;  %v1889_v45 = vmul.f32 %v1888_v20, %v1886_v21  ;;  %v1893_v4 = vperm.slane %v3454_v24, 7 }
 0x404   : > { %v1830_v50 = vmax.f32 %v1827_v22, 0.0 }
 0x405   : > { %v1850_v33 = vadd.f32 %v1848_v1, %v1845_v60  ;;  %v1891_v34 = vadd.f32 %v1889_v45, %v1879_v2  ;;  %v1894_v49 = vmul.f32 %v1893_v4, %v1712_v19  ;;  %v1895_v24 = vmul.f32 %v1893_v4, %v1713_v42 }
 0x406   : > { %v1882_v8 = vrot.slane %v1830_v50, 7  ;;  %2004 = vst.msk [vmem:[#allocation3 + $0x8] sm:$0xff] %vm610_vm2, %v1830_v50  ;;  %v1900_v43 = vmul.f32 %v2417_v5, %v1830_v50 }
 0x407   : > { %v1855_v37 = vadd.f32 %v1853_v15, %v1850_v33  ;;  %v1896_v29 = vadd.f32 %v1894_v49, %v1891_v34 }
 0x408   : > { %v1883_v36 = vsel %vm1197_vm3, %v1837_v16, %v1882_v8  ;;  %v2420_v16 = vld [vmem:[%s3668_s24] ss:$0 sm:$0xff] }
 0x409   : > { %v1870_v25 = vadd.f32 %v1868_v17, %v1855_v37  ;;  %v1887_v53 = vmul.f32 %v1883_v36, %v2663_v58  ;;  %v1901_v46 = vadd.f32 %v1899_v48, %v1896_v29 }
 0x40b   : > { %v1875_v32 = vadd.f32 %v1873_v3, %v1870_v25  ;;  %v1890_v9 = vmul.f32 %v1888_v20, %v1887_v53 }
 0x40d   : > { %v1880_v11 = vadd.f32 %v1878_v27, %v1875_v32 }
 0x40f   : > { %v1892_v23 = vadd.f32 %v1890_v9, %v1880_v11 }
 0x411   : > { %v1897_v12 = vadd.f32 %v1895_v24, %v1892_v23 }
 0x413   : > { %v1902_v58 = vadd.f32 %v1900_v43, %v1897_v12 }
 0x415   : > { %v1903_v13 = vpack.c.bf16 %v1902_v58, %v1901_v46 }
 0x417   : > { %2256 = vmatmul.msk.bf16.vlgmr.msra.gmra.mxu2 %vm610_vm2, %v1903_v13 }
 0x49a   : > { %v1930_v42 = vpop.f32.mrf.mxu2 }
 0x49b   : > { %v1931_v18 = vadd.f32 %v2418_v61, %v1930_v42 }
 0x49d   : > { %v1935_v30 = vmax.f32 %v1931_v18, 0.0 }
 0x4a2   : > { %v1932_v51 = vpop.f32.mrf.mxu2 }
 0x4a3   : > { %v1933_v35 = vadd.f32 %v2418_v61, %v1932_v51 }
 0x4a5   : > { %v1936_v0 = vmax.f32 %v1933_v35, 0.0 }
 0x4a7   : > { %v1937_v44 = vpack.c.bf16 %v1936_v0, %v1935_v30 }
 0x4a9   : > { %2257 = vmatmul.msk.bf16.vlgmr.msrb.gmra.mxu3 %vm649_vm4, %v1937_v44 }
 0x52c   : > { %v1958_v14 = vpop.f32.mrf.mxu3 }
 0x52d   : > { %v1959_v19 = vadd.f32 %v2419_v28, %v1958_v14 }
 0x52f   : > { %v1963_v6 = vmax.f32 %v1959_v19, 0.0 }
 0x531   : > { %v1969_v10 = vmul.f32 %v2420_v16, %v1963_v6 }
 0x533   : > { %v1972_v63 = vsel %vm1971_vm6, %v1969_v10, 0.0 }
 0x534   : > { %v1960_v39 = vpop.f32.mrf.mxu3  ;;  %1973 = vadd.xlane.f32.xlu2 %v1972_v63 }
 0x535   : > { %v1961_v57 = vadd.f32 %v2419_v28, %v1960_v39 }
 0x537   : > { %v1964_v40 = vmax.f32 %v1961_v57, 0.0 }
 0x539   : > { %v1970_v55 = vmul.f32 %v2420_v16, %v1964_v40 }
 0x53b   : > { %v1975_v62 = vsel %vm1971_vm6, %v1970_v55, 0.0 }
 0x53c   : > { %1976 = vadd.xlane.f32.xlu0 %v1975_v62 }
 0x5a7   : > { %v1974_v38 = vpop.xlane.xlu2 %1973 }
 0x5a8   : > { %v1978_v41 = vadd.f32 %v2420_v16, %v1974_v38 }
 0x5aa   : > { %v1980_v1 = vmax.f32 %v1978_v41, 0.0 }
 0x5ac   : > { %v1982_v31 = vand.u32 2147483647, %v1980_v1 }
 0x5ae   : > { %1986 = vrot.lane.b32.xlu1 %v1982_v31, %s2468_s28 }
 0x5af   : > { %v1977_v22 = vpop.xlane.xlu0 %1976 }
 0x5b0   : > { %v1979_v56 = vadd.f32 %v2420_v16, %v1977_v22 }
 0x5b2   : > { %v1981_v60 = vmax.f32 %v1979_v56, 0.0 }
 0x5b4   : > { %v1983_v21 = vand.u32 2147483647, %v1981_v60 }
 0x5b6   : > { %1988 = vrot.lane.b32.xlu1 %v1983_v21, %s2468_s28 }
 0x620   : > { %v1987_v20 = vpop.permute.xlu1 %1986 }
 0x621   : > { %1993 = vst.msk [vmem:[%s2591_s22] sm:$0xff] %vm1992_vm7, %v1987_v20 }
 0x628   : > { %v1989_v50 = vpop.permute.xlu1 %1988 }
 0x629   : > { %1994 = vst.msk [vmem:[%s2591_s22 + $0x8] sm:$0xff] %vm1992_vm7, %v1989_v50 }
 0x62a PF: > { %s3669_s19 = sld [smem:[#allocation6_spill]] }
 0x62b   : > { %s3670_s25 = sld [smem:[#allocation4_spill]] }
 0x62c   : > { %s3671_s26 = sld [smem:[#allocation5_spill]] }
 0x62d   : > { %s3672_s27 = sld [smem:[#allocation7_spill]] }
 0x62e   : > { %s3673_s28 = sld [smem:[#allocation8_spill]] }
 0x630   : > { %s23_s29 = sadd.s32 1, %s3669_s19  }
 0x631   : > { %p20_p8 = scmp.ge.s32.totalorder %s23_s29, 10  }
 0x633   :  { %22 = sbr.rel (!%p20_p8) target bundleno = 7 (0x7), region = 120 }

</bundles_post_ra>
